<compile_context>
chip_gen: v7x
topology: tpu7x:2x2x1
jax: 0.10.0
libtpu: 0.0.40
codegen_flags: <defaults>
</compile_context>

<pallas_src>
import functools
import math

import jax
import jax.numpy as jnp
from jax import lax
from jax.experimental import pallas as pl
from jax.experimental.pallas import tpu as pltpu

# keep reference einsums / kernel dots numerically comparable
jax.config.update("jax_default_matmul_precision", "highest")


# ---------------------------------------------------------------------------
# Fused kernel (one grid step == one batch element)
# ---------------------------------------------------------------------------
def _st_block6_kernel(x_ref, aexp_ref, wres_ref, bres_ref, wt_ref, bt_ref,
                      wg_ref, bg_ref, o_ref, *, T, pad):
    """ST_BLOCK_6 forward for one batch element, all stages fused.

    x_ref    : (1, c_in, N*T)      input block (channel-major, lane-dense)
    aexp_ref : (N*T, N*T)          kron(adj^T, I_T) graph propagation operator
    wres_ref : (c_out, c_in)       conv_1 (1x1) weight
    bres_ref : (c_out, 1)
    wt_ref   : (Kt, c_out, c_in)   conv1 (1,Kt) weight, tap-major
    bt_ref   : (c_out, 1)
    wg_ref   : (K, 2*c_out, c_out) cheby 1x1-mix weight, order-major
    bg_ref   : (2*c_out, 1)
    o_ref    : (1, c_out, N*T)
    """
    c_out = wres_ref.shape[0]
    Kt = wt_ref.shape[0]
    K = wg_ref.shape[0]
    NT = x_ref.shape[2]

    xmat = x_ref[0]                                            # (c_in, NT)

    # ---- residual branch: 1x1 conv -------------------------------------
    res = jnp.dot(wres_ref[...], xmat,
                  preferred_element_type=jnp.float32) + bres_ref[...]

    # ---- conv1: (1, Kt) temporal conv, zero-padded by `pad` in time -----
    # Tap s = kt - pad reads x[..., t + s]; realised as a lane roll (XLU)
    # plus a mask that zeroes positions where t + s falls outside [0, T-1]
    # (this also kills the circular wrap across node boundaries).
    t_idx = lax.broadcasted_iota(jnp.int32, (1, NT), 1) % T    # time within node
    x1 = bt_ref[...]                                           # (c_out, 1)
    for kt in range(Kt):                                       # static unroll
        s = kt - pad
        if s == 0:
            tap = xmat
        else:
            rolled = pltpu.roll(xmat, (-s) % NT, 1)            # tap[j] = x[j+s]
            valid = jnp.logical_and(t_idx + s >= 0, t_idx + s <= T - 1)
            tap = jnp.where(valid, rolled, 0.0)
        x1 = x1 + jnp.dot(wt_ref[kt], tap,
                          preferred_element_type=jnp.float32)  # (c_out, NT)

    # ---- cheby_conv: K-order Chebyshev propagation + fused 1x1 mix ------
    # P0 = x1 ; P1 = x1.Aexp ; Pk = 2*P(k-1).Aexp - P(k-2)
    aexp = aexp_ref[...]
    x2 = bg_ref[...] + jnp.dot(wg_ref[0], x1,
                               preferred_element_type=jnp.float32)
    p_km2 = x1
    p_km1 = jnp.dot(x1, aexp, preferred_element_type=jnp.float32)
    x2 = x2 + jnp.dot(wg_ref[1], p_km1, preferred_element_type=jnp.float32)
    for k in range(2, K):                                      # static unroll
        p_k = 2.0 * jnp.dot(p_km1, aexp,
                            preferred_element_type=jnp.float32) - p_km2
        x2 = x2 + jnp.dot(wg_ref[k], p_k,
                          preferred_element_type=jnp.float32)
        p_km2, p_km1 = p_km1, p_k

    # ---- gating: (filter + residual) * sigmoid(gate) --------------------
    filt = x2[:c_out]
    gate = x2[c_out:]
    sig = pl.reciprocal(1.0 + jnp.exp(-gate), approx=True)
    o_ref[0] = (filt + res) * sig


# ---------------------------------------------------------------------------
# Wrapper
# ---------------------------------------------------------------------------
@functools.partial(jax.jit, static_argnames=("K", "Kt"))
def st_block_6_forward(x, supports, params, *, K, Kt):
    """x: (B, c_in, N, T) NCHW like PyTorch; supports: (N, N). -> (B, c_out, N, T)."""
    B, c_in, N, T = x.shape
    c_out = params["W_res"].shape[0]
    NT = N * T

    # lane-dense view of the input (free bitcast) and one-off weight re-layouts
    x2d = x.reshape(B, c_in, NT)
    a_exp = jnp.kron(jnp.transpose(supports),
                     jnp.eye(T, dtype=jnp.float32)).astype(jnp.float32)
    wres = params["W_res"][:, :, 0, 0]                               # (co, ci)
    bres = params["b_res"].reshape(c_out, 1)
    wt = jnp.transpose(params["W_time"][:, :, 0, :], (2, 0, 1))      # (Kt, co, ci)
    bt = params["b_time"].reshape(c_out, 1)
    wg = jnp.transpose(
        params["W_gcn"][:, :, 0, 0].reshape(2 * c_out, c_out, K),
        (2, 0, 1))                                                   # (K, 2co, co)
    bg = params["b_gcn"].reshape(2 * c_out, 1)

    kernel = functools.partial(_st_block6_kernel, T=T, pad=1)
    out = pl.pallas_call(
        kernel,
        out_shape=jax.ShapeDtypeStruct((B, c_out, NT), jnp.float32),
        grid=(B,),
        in_specs=[
            pl.BlockSpec((1, c_in, NT), lambda b: (b, 0, 0)),
            pl.BlockSpec((NT, NT), lambda b: (0, 0)),
            pl.BlockSpec((c_out, c_in), lambda b: (0, 0)),
            pl.BlockSpec((c_out, 1), lambda b: (0, 0)),
            pl.BlockSpec((Kt, c_out, c_in), lambda b: (0, 0, 0)),
            pl.BlockSpec((c_out, 1), lambda b: (0, 0)),
            pl.BlockSpec((K, 2 * c_out, c_out), lambda b: (0, 0, 0)),
            pl.BlockSpec((2 * c_out, 1), lambda b: (0, 0)),
        ],
        out_specs=pl.BlockSpec((1, c_out, NT), lambda b: (b, 0, 0)),
        compiler_params=pltpu.CompilerParams(
            dimension_semantics=("parallel",)),
    )(x2d, a_exp, wres, bres, wt, bt, wg, bg)
    return out.reshape(B, c_out, N, T)


# ---------------------------------------------------------------------------
# Parameters (PyTorch Conv2d default init: U(-1/sqrt(fan_in), 1/sqrt(fan_in)))
# ---------------------------------------------------------------------------
def init_params(key, c_in, c_out, K, Kt):
    ks = jax.random.split(key, 6)

    def u(k, shape, fan_in):
        b = 1.0 / math.sqrt(fan_in)
        return jax.random.uniform(k, shape, jnp.float32, -b, b)

    return {
        "W_res": u(ks[0], (c_out, c_in, 1, 1), c_in),
        "b_res": u(ks[1], (c_out,), c_in),
        "W_time": u(ks[2], (c_out, c_in, 1, Kt), c_in * Kt),
        "b_time": u(ks[3], (c_out,), c_in * Kt),
        "W_gcn": u(ks[4], (2 * c_out, K * c_out, 1, 1), K * c_out),
        "b_gcn": u(ks[5], (2 * c_out,), K * c_out),
    }


# ---------------------------------------------------------------------------
# Pure-JAX reference (mirrors the PyTorch module), for a numerical check
# ---------------------------------------------------------------------------
def st_block_6_reference(x, supports, params, *, K, Kt):
    B, c_in, N, T = x.shape
    c_out = params["W_res"].shape[0]
    x_input1 = (jnp.einsum("oc,bcnt->bont", params["W_res"][:, :, 0, 0], x)
                + params["b_res"][None, :, None, None])
    xp = jnp.pad(x, ((0, 0), (0, 0), (0, 0), (1, 1)))
    x1 = params["b_time"][None, :, None, None]
    for kt in range(Kt):
        x1 = x1 + jnp.einsum("oc,bcnt->bont",
                             params["W_time"][:, :, 0, kt],
                             xp[:, :, :, kt:kt + T])
    Ls = [jnp.eye(N, dtype=jnp.float32), supports]
    for _ in range(2, K):
        Ls.append(2.0 * supports @ Ls[-1] - Ls[-2])
    lap = jnp.swapaxes(jnp.stack(Ls, 0), -1, -2)
    xc = jnp.einsum("bcnl,knq->bckql", x1, lap).reshape(B, c_out * K, N, T)
    x2 = (jnp.einsum("oj,bjnt->bont", params["W_gcn"][:, :, 0, 0], xc)
          + params["b_gcn"][None, :, None, None])
    filt, gate = x2[:, :c_out], x2[:, c_out:]
    return (filt + x_input1) * jax.nn.sigmoid(gate)


# ---------------------------------------------------------------------------
if __name__ == "__main__":
    B, c_in, c_out, N, T = 2, 4, 8, 16, 16
    K, Kt = 3, 3                       # Kt=3 so padding=(0,1) preserves T

    key = jax.random.PRNGKey(0)
    kx, ka, kp = jax.random.split(key, 3)
    x = jax.random.normal(kx, (B, c_in, N, T), jnp.float32)
    supports = jax.random.uniform(ka, (N, N), jnp.float32) / N
    params = init_params(kp, c_in, c_out, K, Kt)

    out = st_block_6_forward(x, supports, params, K=K, Kt=Kt)
    out = jax.block_until_ready(out)
    assert out.shape == (B, c_out, N, T), out.shape
    assert bool(jnp.all(jnp.isfinite(out)))

    ref = st_block_6_reference(x, supports, params, K=K, Kt=Kt)
    err = float(jnp.max(jnp.abs(out - ref)))
    assert err < 2e-2, f"max abs err vs reference: {err}"
    print("KERNEL_OK")
</pallas_src>

<mosaic_0001>
module attributes {stable_mosaic.version = 11 : i64} {
  func.func @_st_block6_kernel(%arg0: i32, %arg1: memref<1x4x256xf32, #tpu.memory_space<vmem>>, %arg2: memref<256x256xf32, #tpu.memory_space<vmem>>, %arg3: memref<8x4xf32, #tpu.memory_space<vmem>>, %arg4: memref<8x1xf32, #tpu.memory_space<vmem>>, %arg5: memref<3x8x4xf32, #tpu.memory_space<vmem>>, %arg6: memref<8x1xf32, #tpu.memory_space<vmem>>, %arg7: memref<3x16x8xf32, #tpu.memory_space<vmem>>, %arg8: memref<16x1xf32, #tpu.memory_space<vmem>>, %arg9: memref<1x8x256xf32, #tpu.memory_space<vmem>>) attributes {dimension_semantics = [#tpu.dimension_semantics<parallel>], iteration_bounds = array<i64: 2>, scalar_prefetch = 0 : i64, scratch_operands = 0 : i64, tpu.core_type = #tpu.core_type<tc>, window_params = [{transform_indices = @transform_0, window_bounds = array<i64: 1, 4, 256>}, {pipeline_mode = #tpu.pipeline_mode<synchronous>, transform_indices = @transform_1, window_bounds = array<i64: 256, 256>}, {pipeline_mode = #tpu.pipeline_mode<synchronous>, transform_indices = @transform_2, window_bounds = array<i64: 8, 4>}, {pipeline_mode = #tpu.pipeline_mode<synchronous>, transform_indices = @transform_3, window_bounds = array<i64: 8, 1>}, {pipeline_mode = #tpu.pipeline_mode<synchronous>, transform_indices = @transform_4, window_bounds = array<i64: 3, 8, 4>}, {pipeline_mode = #tpu.pipeline_mode<synchronous>, transform_indices = @transform_5, window_bounds = array<i64: 8, 1>}, {pipeline_mode = #tpu.pipeline_mode<synchronous>, transform_indices = @transform_6, window_bounds = array<i64: 3, 16, 8>}, {pipeline_mode = #tpu.pipeline_mode<synchronous>, transform_indices = @transform_7, window_bounds = array<i64: 16, 1>}, {transform_indices = @transform_8, window_bounds = array<i64: 1, 8, 256>}]} {
    %c0 = arith.constant 0 : index
    %c0_0 = arith.constant 0 : index
    %c0_1 = arith.constant 0 : index
    %0 = vector.load %arg1[%c0, %c0_0, %c0_1] : memref<1x4x256xf32, #tpu.memory_space<vmem>>, vector<1x4x256xf32>
    %1 = vector.shape_cast %0 : vector<1x4x256xf32> to vector<4x256xf32>
    %c0_2 = arith.constant 0 : index
    %c0_3 = arith.constant 0 : index
    %2 = vector.load %arg3[%c0_2, %c0_3] : memref<8x4xf32, #tpu.memory_space<vmem>>, vector<8x4xf32>
    %cst = arith.constant dense<0.000000e+00> : vector<8x256xf32>
    %3 = tpu.matmul %2, %1, %cst {dimension_numbers = #tpu.dot_dimension_numbers<[1], [0], [0], [1], [0, 0, 1, 1], [], []>, precision = #tpu.contract_precision<fp32>} : vector<8x4xf32>, vector<4x256xf32>, vector<8x256xf32> -> vector<8x256xf32>
    %c0_4 = arith.constant 0 : index
    %c0_5 = arith.constant 0 : index
    %4 = vector.load %arg4[%c0_4, %c0_5] : memref<8x1xf32, #tpu.memory_space<vmem>>, vector<8x1xf32>
    %5 = vector.broadcast %4 : vector<8x1xf32> to vector<8x256xf32>
    %6 = arith.addf %3, %5 : vector<8x256xf32>
    %7 = tpu.iota {dimensions = array<i32: 1>} : vector<1x256xi32>
    %c16_i32 = arith.constant 16 : i32
    %c0_i32 = arith.constant 0 : i32
    %8 = arith.cmpi eq, %c16_i32, %c0_i32 : i32
    %c1_i32 = arith.constant 1 : i32
    %9 = arith.select %8, %c1_i32, %c16_i32 : i32
    %10 = vector.broadcast %9 : i32 to vector<1x256xi32>
    %11 = arith.remsi %7, %10 : vector<1x256xi32>
    %c0_i32_6 = arith.constant 0 : i32
    %12 = vector.broadcast %c0_i32_6 : i32 to vector<1x256xi32>
    %13 = arith.cmpi ne, %11, %12 : vector<1x256xi32>
    %c0_i32_7 = arith.constant 0 : i32
    %14 = vector.broadcast %c0_i32_7 : i32 to vector<1x256xi32>
    %15 = arith.cmpi slt, %11, %14 : vector<1x256xi32>
    %c0_i32_8 = arith.constant 0 : i32
    %16 = arith.cmpi slt, %9, %c0_i32_8 : i32
    %17 = vector.broadcast %16 : i1 to vector<1x256xi1>
    %18 = vector.broadcast %17 : vector<1x256xi1> to vector<1x256xi1>
    %19 = arith.xori %15, %18 : vector<1x256xi1>
    %20 = arith.andi %19, %13 : vector<1x256xi1>
    %21 = vector.broadcast %9 : i32 to vector<1x256xi32>
    %22 = arith.addi %11, %21 : vector<1x256xi32>
    %23 = arith.select %20, %22, %11 : vector<1x256xi1>, vector<1x256xi32>
    %c0_9 = arith.constant 0 : index
    %c0_10 = arith.constant 0 : index
    %24 = vector.load %arg6[%c0_9, %c0_10] : memref<8x1xf32, #tpu.memory_space<vmem>>, vector<8x1xf32>
    %c1_i32_11 = arith.constant 1 : i32
    %25 = tpu.dynamic_rotate %1 by %c1_i32_11 dim 1 : vector<4x256xf32>, i32 -> vector<4x256xf32>
    %c-1_i32 = arith.constant -1 : i32
    %26 = vector.broadcast %c-1_i32 : i32 to vector<1x256xi32>
    %27 = arith.addi %23, %26 : vector<1x256xi32>
    %c0_i32_12 = arith.constant 0 : i32
    %28 = vector.broadcast %c0_i32_12 : i32 to vector<1x256xi32>
    %29 = arith.cmpi sge, %27, %28 : vector<1x256xi32>
    %c-1_i32_13 = arith.constant -1 : i32
    %30 = vector.broadcast %c-1_i32_13 : i32 to vector<1x256xi32>
    %31 = arith.addi %23, %30 : vector<1x256xi32>
    %c15_i32 = arith.constant 15 : i32
    %32 = vector.broadcast %c15_i32 : i32 to vector<1x256xi32>
    %33 = arith.cmpi sle, %31, %32 : vector<1x256xi32>
    %34 = arith.andi %29, %33 : vector<1x256xi1>
    %cst_14 = arith.constant 0.000000e+00 : f32
    %35 = vector.shape_cast %34 : vector<1x256xi1> to vector<1x256xi1>
    %36 = vector.broadcast %35 : vector<1x256xi1> to vector<4x256xi1>
    %37 = vector.broadcast %cst_14 : f32 to vector<4x256xf32>
    %38 = arith.select %36, %25, %37 : vector<4x256xi1>, vector<4x256xf32>
    %c0_15 = arith.constant 0 : index
    %c0_16 = arith.constant 0 : index
    %c0_17 = arith.constant 0 : index
    %39 = vector.load %arg5[%c0_15, %c0_16, %c0_17] : memref<3x8x4xf32, #tpu.memory_space<vmem>>, vector<1x8x4xf32>
    %40 = vector.shape_cast %39 : vector<1x8x4xf32> to vector<8x4xf32>
    %cst_18 = arith.constant dense<0.000000e+00> : vector<8x256xf32>
    %41 = tpu.matmul %40, %38, %cst_18 {dimension_numbers = #tpu.dot_dimension_numbers<[1], [0], [0], [1], [0, 0, 1, 1], [], []>, precision = #tpu.contract_precision<fp32>} : vector<8x4xf32>, vector<4x256xf32>, vector<8x256xf32> -> vector<8x256xf32>
    %42 = vector.broadcast %24 : vector<8x1xf32> to vector<8x256xf32>
    %43 = arith.addf %42, %41 : vector<8x256xf32>
    %c1 = arith.constant 1 : index
    %c0_19 = arith.constant 0 : index
    %c0_20 = arith.constant 0 : index
    %44 = vector.load %arg5[%c1, %c0_19, %c0_20] : memref<3x8x4xf32, #tpu.memory_space<vmem>>, vector<1x8x4xf32>
    %45 = vector.shape_cast %44 : vector<1x8x4xf32> to vector<8x4xf32>
    %cst_21 = arith.constant dense<0.000000e+00> : vector<8x256xf32>
    %46 = tpu.matmul %45, %1, %cst_21 {dimension_numbers = #tpu.dot_dimension_numbers<[1], [0], [0], [1], [0, 0, 1, 1], [], []>, precision = #tpu.contract_precision<fp32>} : vector<8x4xf32>, vector<4x256xf32>, vector<8x256xf32> -> vector<8x256xf32>
    %47 = arith.addf %43, %46 : vector<8x256xf32>
    %c255_i32 = arith.constant 255 : i32
    %48 = tpu.dynamic_rotate %1 by %c255_i32 dim 1 : vector<4x256xf32>, i32 -> vector<4x256xf32>
    %c1_i32_22 = arith.constant 1 : i32
    %49 = vector.broadcast %c1_i32_22 : i32 to vector<1x256xi32>
    %50 = arith.addi %23, %49 : vector<1x256xi32>
    %c0_i32_23 = arith.constant 0 : i32
    %51 = vector.broadcast %c0_i32_23 : i32 to vector<1x256xi32>
    %52 = arith.cmpi sge, %50, %51 : vector<1x256xi32>
    %c1_i32_24 = arith.constant 1 : i32
    %53 = vector.broadcast %c1_i32_24 : i32 to vector<1x256xi32>
    %54 = arith.addi %23, %53 : vector<1x256xi32>
    %c15_i32_25 = arith.constant 15 : i32
    %55 = vector.broadcast %c15_i32_25 : i32 to vector<1x256xi32>
    %56 = arith.cmpi sle, %54, %55 : vector<1x256xi32>
    %57 = arith.andi %52, %56 : vector<1x256xi1>
    %cst_26 = arith.constant 0.000000e+00 : f32
    %58 = vector.shape_cast %57 : vector<1x256xi1> to vector<1x256xi1>
    %59 = vector.broadcast %58 : vector<1x256xi1> to vector<4x256xi1>
    %60 = vector.broadcast %cst_26 : f32 to vector<4x256xf32>
    %61 = arith.select %59, %48, %60 : vector<4x256xi1>, vector<4x256xf32>
    %c2 = arith.constant 2 : index
    %c0_27 = arith.constant 0 : index
    %c0_28 = arith.constant 0 : index
    %62 = vector.load %arg5[%c2, %c0_27, %c0_28] : memref<3x8x4xf32, #tpu.memory_space<vmem>>, vector<1x8x4xf32>
    %63 = vector.shape_cast %62 : vector<1x8x4xf32> to vector<8x4xf32>
    %cst_29 = arith.constant dense<0.000000e+00> : vector<8x256xf32>
    %64 = tpu.matmul %63, %61, %cst_29 {dimension_numbers = #tpu.dot_dimension_numbers<[1], [0], [0], [1], [0, 0, 1, 1], [], []>, precision = #tpu.contract_precision<fp32>} : vector<8x4xf32>, vector<4x256xf32>, vector<8x256xf32> -> vector<8x256xf32>
    %65 = arith.addf %47, %64 : vector<8x256xf32>
    %c0_30 = arith.constant 0 : index
    %c0_31 = arith.constant 0 : index
    %66 = vector.load %arg2[%c0_30, %c0_31] : memref<256x256xf32, #tpu.memory_space<vmem>>, vector<256x256xf32>
    %c0_32 = arith.constant 0 : index
    %c0_33 = arith.constant 0 : index
    %67 = vector.load %arg8[%c0_32, %c0_33] : memref<16x1xf32, #tpu.memory_space<vmem>>, vector<16x1xf32>
    %c0_34 = arith.constant 0 : index
    %c0_35 = arith.constant 0 : index
    %c0_36 = arith.constant 0 : index
    %68 = vector.load %arg7[%c0_34, %c0_35, %c0_36] : memref<3x16x8xf32, #tpu.memory_space<vmem>>, vector<1x16x8xf32>
    %69 = vector.shape_cast %68 : vector<1x16x8xf32> to vector<16x8xf32>
    %cst_37 = arith.constant dense<0.000000e+00> : vector<16x256xf32>
    %70 = tpu.matmul %69, %65, %cst_37 {dimension_numbers = #tpu.dot_dimension_numbers<[1], [0], [0], [1], [0, 0, 1, 1], [], []>, precision = #tpu.contract_precision<fp32>} : vector<16x8xf32>, vector<8x256xf32>, vector<16x256xf32> -> vector<16x256xf32>
    %71 = vector.broadcast %67 : vector<16x1xf32> to vector<16x256xf32>
    %72 = arith.addf %71, %70 : vector<16x256xf32>
    %cst_38 = arith.constant dense<0.000000e+00> : vector<8x256xf32>
    %73 = tpu.matmul %65, %66, %cst_38 {dimension_numbers = #tpu.dot_dimension_numbers<[1], [0], [0], [1], [0, 0, 1, 1], [], []>, precision = #tpu.contract_precision<fp32>} : vector<8x256xf32>, vector<256x256xf32>, vector<8x256xf32> -> vector<8x256xf32>
    %c1_39 = arith.constant 1 : index
    %c0_40 = arith.constant 0 : index
    %c0_41 = arith.constant 0 : index
    %74 = vector.load %arg7[%c1_39, %c0_40, %c0_41] : memref<3x16x8xf32, #tpu.memory_space<vmem>>, vector<1x16x8xf32>
    %75 = vector.shape_cast %74 : vector<1x16x8xf32> to vector<16x8xf32>
    %cst_42 = arith.constant dense<0.000000e+00> : vector<16x256xf32>
    %76 = tpu.matmul %75, %73, %cst_42 {dimension_numbers = #tpu.dot_dimension_numbers<[1], [0], [0], [1], [0, 0, 1, 1], [], []>, precision = #tpu.contract_precision<fp32>} : vector<16x8xf32>, vector<8x256xf32>, vector<16x256xf32> -> vector<16x256xf32>
    %77 = arith.addf %72, %76 : vector<16x256xf32>
    %cst_43 = arith.constant dense<0.000000e+00> : vector<8x256xf32>
    %78 = tpu.matmul %73, %66, %cst_43 {dimension_numbers = #tpu.dot_dimension_numbers<[1], [0], [0], [1], [0, 0, 1, 1], [], []>, precision = #tpu.contract_precision<fp32>} : vector<8x256xf32>, vector<256x256xf32>, vector<8x256xf32> -> vector<8x256xf32>
    %cst_44 = arith.constant 2.000000e+00 : f32
    %79 = vector.broadcast %cst_44 : f32 to vector<8x256xf32>
    %80 = arith.mulf %79, %78 : vector<8x256xf32>
    %81 = arith.subf %80, %65 : vector<8x256xf32>
    %c2_45 = arith.constant 2 : index
    %c0_46 = arith.constant 0 : index
    %c0_47 = arith.constant 0 : index
    %82 = vector.load %arg7[%c2_45, %c0_46, %c0_47] : memref<3x16x8xf32, #tpu.memory_space<vmem>>, vector<1x16x8xf32>
    %83 = vector.shape_cast %82 : vector<1x16x8xf32> to vector<16x8xf32>
    %cst_48 = arith.constant dense<0.000000e+00> : vector<16x256xf32>
    %84 = tpu.matmul %83, %81, %cst_48 {dimension_numbers = #tpu.dot_dimension_numbers<[1], [0], [0], [1], [0, 0, 1, 1], [], []>, precision = #tpu.contract_precision<fp32>} : vector<16x8xf32>, vector<8x256xf32>, vector<16x256xf32> -> vector<16x256xf32>
    %85 = arith.addf %77, %84 : vector<16x256xf32>
    %86 = vector.extract_strided_slice %85 {offsets = [0, 0], sizes = [8, 256], strides = [1, 1]} : vector<16x256xf32> to vector<8x256xf32>
    %87 = vector.extract_strided_slice %85 {offsets = [8, 0], sizes = [8, 256], strides = [1, 1]} : vector<16x256xf32> to vector<8x256xf32>
    %cst_49 = arith.constant 0.000000e+00 : f32
    %88 = vector.broadcast %cst_49 : f32 to vector<8x256xf32>
    %89 = arith.subf %88, %87 : vector<8x256xf32>
    %90 = math.exp %89 : vector<8x256xf32>
    %cst_50 = arith.constant 1.000000e+00 : f32
    %91 = vector.broadcast %cst_50 : f32 to vector<8x256xf32>
    %92 = arith.addf %91, %90 : vector<8x256xf32>
    %93 = tpu.reciprocal %92 {approx = true} : vector<8x256xf32> -> vector<8x256xf32>
    %94 = arith.addf %86, %6 : vector<8x256xf32>
    %95 = arith.mulf %94, %93 : vector<8x256xf32>
    %c0_51 = arith.constant 0 : index
    %c0_52 = arith.constant 0 : index
    %c0_53 = arith.constant 0 : index
    %96 = vector.load %arg9[%c0_51, %c0_52, %c0_53] : memref<1x8x256xf32, #tpu.memory_space<vmem>>, vector<1x8x256xf32>
    %97 = vector.shape_cast %96 : vector<1x8x256xf32> to vector<8x256xf32>
    %98 = vector.shape_cast %95 : vector<8x256xf32> to vector<1x8x256xf32>
    tpu.vector_store %arg9[%c0_51, %c0_52, %c0_53], %98 {strides = array<i32>} : memref<1x8x256xf32, #tpu.memory_space<vmem>>, vector<1x8x256xf32>,
    return
  }
  func.func @transform_0(%arg0: i32) -> (i32, i32, i32) {
    %c0_i32 = arith.constant 0 : i32
    %c0_i32_0 = arith.constant 0 : i32
    %c0_i32_1 = arith.constant 0 : i32
    return %arg0, %c0_i32, %c0_i32_0 : i32, i32, i32
  }
  func.func @transform_1(%arg0: i32) -> (i32, i32) {
    %c0_i32 = arith.constant 0 : i32
    %c0_i32_0 = arith.constant 0 : i32
    %c0_i32_1 = arith.constant 0 : i32
    return %c0_i32, %c0_i32_0 : i32, i32
  }
  func.func @transform_2(%arg0: i32) -> (i32, i32) {
    %c0_i32 = arith.constant 0 : i32
    %c0_i32_0 = arith.constant 0 : i32
    %c0_i32_1 = arith.constant 0 : i32
    return %c0_i32, %c0_i32_0 : i32, i32
  }
  func.func @transform_3(%arg0: i32) -> (i32, i32) {
    %c0_i32 = arith.constant 0 : i32
    %c0_i32_0 = arith.constant 0 : i32
    %c0_i32_1 = arith.constant 0 : i32
    return %c0_i32, %c0_i32_0 : i32, i32
  }
  func.func @transform_4(%arg0: i32) -> (i32, i32, i32) {
    %c0_i32 = arith.constant 0 : i32
    %c0_i32_0 = arith.constant 0 : i32
    %c0_i32_1 = arith.constant 0 : i32
    %c0_i32_2 = arith.constant 0 : i32
    return %c0_i32, %c0_i32_0, %c0_i32_1 : i32, i32, i32
  }
  func.func @transform_5(%arg0: i32) -> (i32, i32) {
    %c0_i32 = arith.constant 0 : i32
    %c0_i32_0 = arith.constant 0 : i32
    %c0_i32_1 = arith.constant 0 : i32
    return %c0_i32, %c0_i32_0 : i32, i32
  }
  func.func @transform_6(%arg0: i32) -> (i32, i32, i32) {
    %c0_i32 = arith.constant 0 : i32
    %c0_i32_0 = arith.constant 0 : i32
    %c0_i32_1 = arith.constant 0 : i32
    %c0_i32_2 = arith.constant 0 : i32
    return %c0_i32, %c0_i32_0, %c0_i32_1 : i32, i32, i32
  }
  func.func @transform_7(%arg0: i32) -> (i32, i32) {
    %c0_i32 = arith.constant 0 : i32
    %c0_i32_0 = arith.constant 0 : i32
    %c0_i32_1 = arith.constant 0 : i32
    return %c0_i32, %c0_i32_0 : i32, i32
  }
  func.func @transform_8(%arg0: i32) -> (i32, i32, i32) {
    %c0_i32 = arith.constant 0 : i32
    %c0_i32_0 = arith.constant 0 : i32
    %c0_i32_1 = arith.constant 0 : i32
    return %arg0, %c0_i32, %c0_i32_0 : i32, i32, i32
  }
}

</mosaic_0001>

<bundles_post_ra>
// kernel: squeeze.5
= control target key start
LH: loop header
LB: loop body
LE: loop exit
PB: predicated region body
PF: predicated region fallthrough
CT: control target
= control target key end

     0   :  { %vm3_vm0 = vcmask 130048   ;;  %s134_s0 = inlined_call_operand.vmem [shape: f32[16,24,1,1], index: 0, kind: input, shape index: {}]   ;;  %s135_s1 = inlined_call_operand.vmem [shape: f32[16,8,3], index: 1, kind: output, shape index: {}]  }
   0x1   :  { %v2_v0 = vld [vmem:[%s134_s0] sm:$0xff]   ;;  %v82_v1 = vld [vmem:[%s134_s0 + $0x8] sm:$0xff]   ;;  %v83_v2 = vld [vmem:[%s134_s0 + $0x10] sm:$0xff]  }
   0x2   :  { %4 = vst.msk [vmem:[#allocation0] sm:$0x7] %vm3_vm0, %v2_v0   ;;  %6 = vst.msk [vmem:[#allocation0 + $0x5] sm:$0x38] %vm3_vm0, %v2_v0  }
   0x3   :  { %8 = vst.msk [vmem:[#allocation0 + $0xa] sm:$0xc0] %vm3_vm0, %v2_v0   ;;  %13 = vst.msk [vmem:[#allocation0 + $0x12] ss:$6 sm:$0x3] %vm3_vm0, %v82_v1  }
   0x4   :  { %15 = vst.msk [vmem:[#allocation0 + $0x17] sm:$0xc] %vm3_vm0, %v82_v1   ;;  %17 = vst.msk [vmem:[#allocation0 + $0x1c] sm:$0x70] %vm3_vm0, %v82_v1  }
   0x5   :  { %19 = vst.msk [vmem:[#allocation0 + $0x21] sm:$0x80] %vm3_vm0, %v82_v1   ;;  %24 = vst.msk [vmem:[#allocation0 + $0x29] sm:$0x3] %vm3_vm0, %v83_v2  }
   0x6   :  { %26 = vst.msk [vmem:[#allocation0 + $0x2e] sm:$0x1c] %vm3_vm0, %v83_v2   ;;  %28 = vst.msk [vmem:[#allocation0 + $0x33] sm:$0xe0] %vm3_vm0, %v83_v2  }
   0x9   :  { %v32_v3 = vld [vmem:[#allocation0] sm:$0xf]  ;;  %v36_v4 = vld [vmem:[#allocation0 + $0x8] sm:$0xf] }
   0xa   :  { %v41_v5 = vld [vmem:[#allocation0 + $0x10] sm:$0xf]  ;;  %34 = vst [vmem:[%s135_s1] sm:$0xf] %v32_v3  ;;  %84 = vst [vmem:[%s135_s1 + $0x4] sm:$0xf] %v36_v4 }
   0xb   :  { %85 = vst [vmem:[%s135_s1 + $0x8] sm:$0xf] %v41_v5  ;;  %v47_v6 = vld [vmem:[#allocation0 + $0x18] sm:$0xf]  ;;  %v53_v7 = vld [vmem:[#allocation0 + $0x20] sm:$0xf] }
   0xc   :  { %v59_v8 = vld [vmem:[#allocation0 + $0x28] sm:$0xf]  ;;  %86 = vst [vmem:[%s135_s1 + $0xc] sm:$0xf] %v47_v6  ;;  %87 = vst [vmem:[%s135_s1 + $0x10] sm:$0xf] %v53_v7 }
   0xd   :  { %88 = vst [vmem:[%s135_s1 + $0x14] sm:$0xf] %v59_v8  ;;  %v65_v9 = vld [vmem:[#allocation0 + $0x30] sm:$0xf]  ;;  %v71_v10 = vld [vmem:[#allocation0 + $0x38] sm:$0xf] }
   0xe   :  { %89 = vst [vmem:[%s135_s1 + $0x18] sm:$0xf] %v65_v9  ;;  %90 = vst [vmem:[%s135_s1 + $0x1c] sm:$0xf] %v71_v10 }

// kernel: st_block_6_forward.1
= control target key start
LH: loop header
LB: loop body
LE: loop exit
PB: predicated region body
PF: predicated region fallthrough
CT: control target
= control target key end

     0   :  { %s7602_s27 = smov 0   ;;  %s9908_s0 = inlined_call_operand.vmem [shape: f32[2,4,256], index: 0, kind: input, shape index: {}]   ;;  %s9909_s1 = inlined_call_operand.vmem [shape: f32[256,256], index: 1, kind: input, shape index: {}]   ;;  %s9910_s2 = inlined_call_operand.vmem [shape: f32[8,4], index: 2, kind: input, shape index: {}]   ;;  %s9911_s3 = inlined_call_operand.vmem [shape: f32[8,1], index: 3, kind: input, shape index: {}]   ;;  %s9912_s4 = inlined_call_operand.vmem [shape: f32[3,8,4], index: 4, kind: input, shape index: {}]   ;;  %s9913_s5 = inlined_call_operand.vmem [shape: f32[8,1], index: 5, kind: input, shape index: {}]   ;;  %s9914_s6 = inlined_call_operand.vmem [shape: f32[3,16,8], index: 6, kind: input, shape index: {}]   ;;  %s9915_s7 = inlined_call_operand.vmem [shape: f32[16,1], index: 7, kind: input, shape index: {}]   ;;  %s9916_s8 = inlined_call_operand.vmem [shape: f32[2,8,256], index: 8, kind: output, shape index: {}]  }
   0x1 LB: > { %s6593_s28 = sadd.s32 4294967295, %s7551_s27   ;;  %p6597_p0 = scmp.ge.s32.totalorder %s7551_s27, 1  ;;  %s7551_s27 = sphi %s7602_s27, %s18_s27  }
   0x2   : > { %p262_p1 = scmp.lt.s32.totalorder %s7551_s27, 3 }
   0x4   : > { %p263_p2 = pnand %p6597_p0, %p262_p1 }
   0x6   : > { %266 = sbr.rel (%p263_p2) target bundleno = 1895 (0x767), region = 52 }
   0xd   : > { %p296_p3 = scmp.lt.s32.totalorder %s6593_s28, 1  ;;  %v307_v0 = vld [vmem:[%s9910_s2] sm:$0xff]  ;;  %vm316_vm0 = vcmask 31744   ;;  %v9949_v1 = vmov 0.0   ;;  %vm320_vm1 = vcmask 1043456   ;;  %s7554_s13 = smov 1   ;;  %v790_v22 = vlaneseq }
   0xe   : > { %391 = vmatprep.mubr.f32.mxu0 %v9949_v1  ;;  %v318_v2 = vsel %vm316_vm0, %v307_v0, 0  ;;  %1233 = vmatprep.mubr.f32.mxu1 %v9949_v1  ;;  %s7555_s14 = smov 127   ;;  %v840_v23 = vld [vmem:[%s9912_s4] sm:$0xff]  ;;  %v2358_v29 = vld [vmem:[%s9915_s7 + $0x8] sm:$0xff]  ;;  %v7556_v30 = vmov 0   ;;  %vm2361_vm8 = vcmask 64512  }
   0xf   : > { %s10914_s28 = smov (!%p296_p3, %s6593_s28), 1  ;;  %v392_v3 = vand.u32 4294901760, %v318_v2  ;;  %v7669_v24 = vand.u32 127, %v790_v22  ;;  %v842_v25 = vsel %vm316_vm0, %v840_v23, 0  ;;  %v817_v28 = vld [vmem:[%s9913_s5] sm:$0xff]  ;;  %7534 = vset.pattern.permute.xlu0 %v7556_v30  ;;  %7535 = vset.pattern.permute.xlu1 %v7556_v30  ;;  %v6602_v46 = vld [vmem:[%s9912_s4 + $0x8] sm:$0xff] }
  0x10   : > { %s6610_s9 = sshll.u32 %s10914_s28, 3  ;;  %v7675_v27 = vand.u32 4294901760, %v842_v25  ;;  %v308_v33 = vld [vmem:[%s9911_s3] sm:$0xff]  ;;  %v1325_v52 = vsel %vm316_vm0, %v6602_v46, 0  ;;  %v7823_v46 = vld [vmem:[%s9909_s1 + $0x58] sm:$0xff] }
  0x11   : > { %v393_v4 = vsub.f32 %v318_v2, %v392_v3  ;;  %s300_s12 = scalar_lea.vmem %s9908_s0, %s6610_s9  ;;  %v7673_v26 = vadd.s32 128, %v7669_v24  ;;  %v797_v31 = vand.u32 15, %v7669_v24  ;;  %v2357_v34 = vld [vmem:[%s9915_s7] sm:$0xff]  ;;  %vm823_vm2 = vcmp.lt.s32.totalorder %v7669_v24, 1  ;;  %s6611_s9 = sshll.u32 %s10914_s28, 4 }
  0x12   : > { %v306_v5 = vld [vmem:[%s300_s12] sm:$0xff]  ;;  %v7692_v35 = vsub.f32 %v842_v25, %v7675_v27  ;;  %v7707_v57 = vand.u32 4294901760, %v1325_v52  ;;  %vm1798_vm5 = vcmp.lt.s32.totalorder %v7669_v24, 127  ;;  %s305_s12 = scalar_lea.vmem %s9916_s8, %s6611_s9 }
  0x13   : > { %v394_v6 = vand.u32 4294901760, %v393_v4  ;;  %819 = vrot.lane.b32.xlu0 %v306_v5, %s7554_s13  ;;  %v321_v7 = vsel %vm320_vm1, %v306_v5, 0  ;;  %v315_v8 = vcombine.high %v306_v5, %v306_v5  ;;  %1794 = vrot.lane.b32.xlu1 %v306_v5, %s7555_s14  ;;  %v804_v32 = vand.u32 15, %v7673_v26 }
  0x14   : > { %v7623_v9 = vand.u32 4294901760, %v321_v7  ;;  %v826_v36 = vadd.s32 4294967295, %v797_v31  ;;  %v919_v39 = vand.u32 4294901760, %v7692_v35  ;;  %v1395_v62 = vsub.f32 %v1325_v52, %v7707_v57 }
  0x15   : > { %v395_v10 = vsub.f32 %v393_v4, %v394_v6  ;;  %v323_v11 = vsel %vm320_vm1, %v315_v8, 0  ;;  %v827_v37 = vadd.s32 4294967295, %v804_v32  ;;  %v9933_v52 = vand.u32 4294901760, %v7823_v46 }
  0x16   : > { %v7627_v12 = vsub.f32 %v321_v7, %v7623_v9  ;;  %v7629_v13 = vand.u32 4294901760, %v323_v11  ;;  %vm828_vm3 = vcmp.ge.s32.totalorder %v826_v36, 0  ;;  %v920_v41 = vsub.f32 %v7692_v35, %v919_v39  ;;  %v7786_v36 = vld [vmem:[%s9909_s1 + $0x10] sm:$0xff] }
  0x17   : > { %v396_v14 = vand.u32 4294901760, %v395_v10  ;;  %821 = vrot.lane.b32.xlu0 %v315_v8, %s7554_s13  ;;  %1796 = vrot.lane.b32.xlu1 %v315_v8, %s7555_s14  ;;  %vm829_vm4 = vcmp.ge.s32.totalorder %v827_v37, 0  ;;  %v1396_v63 = vand.u32 4294901760, %v1395_v62  ;;  %v1801_v8 = vadd.s32 1, %v797_v31  ;;  %v7767_v31 = vld [vmem:[%s9909_s1 + $0x18] sm:$0xff]  ;;  %v7791_v37 = vld [vmem:[%s9909_s1 + $0x28] sm:$0xff] }
  0x18   : > { %v7632_v15 = vsub.f32 %v323_v11, %v7629_v13  ;;  %326 = vmatprep.subr.mxu0 %v7629_v13  ;;  %v7636_v16 = vand.u32 4294901760, %v7627_v12  ;;  %v921_v51 = vand.u32 4294901760, %v920_v41  ;;  %v9942_v41 = vand.u32 4294901760, %v7791_v37 }
  0x19   : > { %328 = vmatpush1.msra.mxu0 %v7623_v9  ;;  %v1397_v0 = vsub.f32 %v1395_v62, %v1396_v63  ;;  %vm1805_vm7 = vcmp.le.s32.totalorder %v1801_v8, 15 }
  0x1a   : > { %397 = vmatmul.mubr.f32.vlgmr.msra.gmra.mrb[0].mxu0 %v396_v14  ;;  %v7640_v17 = vand.u32 4294901760, %v7632_v15  ;;  %v412_v18 = vsub.f32 %v7627_v12, %v7636_v16  ;;  %v6603_v14 = vld [vmem:[%s9912_s4 + $0x10] sm:$0xff] }
  0x1b   : > { %477 = vmatprep.mubr.f32.mxu0 %v9949_v1  ;;  %1317 = vperm.xlu0 %7534, %v817_v28   ;;  %v1398_v2 = vand.u32 4294901760, %v1397_v0  ;;  %v7888_v0 = vld [vmem:[%s9909_s1 + $0x70] sm:$0xff] }
  0x1c   : > { %v406_v19 = vsub.f32 %v7632_v15, %v7640_v17  ;;  %v7647_v20 = vand.u32 4294901760, %v412_v18  ;;  %2889 = vperm.xlu1 %7535, %v2358_v29   ;;  %10279 = vst [vmem:[#allocation7_spill] sm:$0xff] %v7888_v0 }
  0x1e   : > { %v7649_v21 = vand.u32 4294901760, %v406_v19 }
  0x1f   : > { %2884 = vperm.xlu0 %7534, %v2357_v34  }
  0x20   : > { %408 = vmatprep.subr.mxu0 %v7649_v21  ;;  %311 = vperm.xlu1 %7535, %v308_v33   ;;  %v9945_v33 = vand.u32 4294901760, %v7767_v31 }
  0x21   : > { %414 = vmatpush1.msra.mxu0 %v7647_v20 }
  0x22   : > { %479 = vmatmul.mubr.f32.vlgmr.msra.gmra.mrb[0].mxu0 %v392_v3  ;;  %487 = vmatprep.subr.mxu0 %v7632_v15 }
  0x23   : > { %490 = vmatpush1.msra.mxu0 %v7627_v12  ;;  %553 = vmatprep.mubr.f32.mxu0 %v9949_v1 }
  0x24   : > { %563 = vmatprep.subr.mxu0 %v7629_v13 }
  0x2a   : > { %556 = vmatmul.mubr.f32.vlgmr.msra.gmra.mrb[0].mxu0 %v393_v4  ;;  %v1802_v4 = vadd.s32 1, %v804_v32 }
  0x2b   : > { %565 = vmatpush1.msra.mxu0 %v7623_v9  ;;  %628 = vmatprep.mubr.f32.mxu0 %v9949_v1 }
  0x2c   : > { %641 = vmatprep.subr.mxu0 %v7640_v17  ;;  %vm1806_vm6 = vcmp.le.s32.totalorder %v1802_v4, 15 }
  0x32   : > { %632 = vmatmul.mubr.f32.vlgmr.msra.gmra.mrb[0].mxu0 %v394_v6 }
  0x33   : > { %645 = vmatpush1.msra.mxu0 %v7636_v16  ;;  %708 = vmatprep.mubr.f32.mxu0 %v9949_v1 }
  0x34   : > { %717 = vmatprep.subr.mxu0 %v7629_v13 }
  0x3a   : > { %710 = vmatmul.mubr.f32.vlgmr.msra.gmra.mrb[0].mxu0 %v392_v3 }
  0x3b   : > { %719 = vmatpush1.msra.mxu0 %v7623_v9  ;;  %782 = vmatprep.mubr.f32.mxu0 %v9949_v1 }
  0x42   : > { %784 = vmatmul.mubr.f32.vlgmr.msra.gmra.mrb[0].mxu0 %v392_v3 }
  0x43   : > { %916 = vmatprep.mubr.f32.mxu0 %v9949_v1 }
  0x85   : > { %v820_v38 = vpop.permute.xlu0 %819  ;;  %v1795_v3 = vpop.permute.xlu1 %1794 }
  0x89   : > { %v822_v40 = vpop.permute.xlu0 %821  ;;  %v1797_v5 = vpop.permute.xlu1 %1796 }
  0x8a   : > { %v824_v42 = vsel %vm823_vm2, %v820_v38, %v822_v40  ;;  %v825_v43 = vsel %vm823_vm2, %v822_v40, %v820_v38  ;;  %v1800_v6 = vsel %vm1798_vm5, %v1797_v5, %v1795_v3  ;;  %v1799_v11 = vsel %vm1798_vm5, %v1795_v3, %v1797_v5  ;;  %v7796_v38 = vld [vmem:[%s9909_s1 + $0x38] sm:$0xff] }
  0x8b   : > { %v838_v44 = vsel %vm828_vm3, %v825_v43, 0.0  ;;  %v839_v45 = vsel %vm829_vm4, %v824_v42, 0.0  ;;  %v1814_v7 = vsel %vm1806_vm6, %v1800_v6, 0.0  ;;  %v9943_v40 = vand.u32 4294901760, %v7786_v36  ;;  %v7808_v43 = vld [vmem:[%s9909_s1 + $0x20] sm:$0xff]  ;;  %v7898_v3 = vld [vmem:[%s9909_s1 + $0x98] sm:$0xff] }
  0x8c   : > { %v845_v47 = vsel %vm320_vm1, %v838_v44, 0  ;;  %v848_v48 = vsel %vm320_vm1, %v839_v45, 0  ;;  %v1824_v10 = vsel %vm320_vm1, %v1814_v7, 0  ;;  %v9939_v42 = vand.u32 4294901760, %v7796_v38  ;;  %v7813_v44 = vld [vmem:[%s9909_s1 + $0x30] sm:$0xff]  ;;  %v7818_v45 = vld [vmem:[%s9909_s1 + $0x48] sm:$0xff] }
  0x8d   : > { %v850_v49 = vand.u32 4294901760, %v848_v48  ;;  %v852_v50 = vand.u32 4294901760, %v845_v47  ;;  %10281 = vst [vmem:[#allocation9_spill] sm:$0xff] %v7898_v3  ;;  %v9923_v6 = vand.u32 4294901760, %v7888_v0 }
  0x8f   : > { %v929_v53 = vsub.f32 %v848_v48, %v850_v49  ;;  %v935_v54 = vsub.f32 %v845_v47, %v852_v50  ;;  %851 = vmatprep.subr.mxu0 %v850_v49  ;;  %v9936_v48 = vand.u32 4294901760, %v7808_v43 }
  0x90   : > { %853 = vmatpush1.msra.mxu0 %v852_v50 }
  0x91   : > { %922 = vmatmul.mubr.f32.vlgmr.msra.gmra.mrb[2].mxu0 %v921_v51  ;;  %v930_v55 = vand.u32 4294901760, %v929_v53  ;;  %v936_v56 = vand.u32 4294901760, %v935_v54  ;;  %v9934_v51 = vand.u32 4294901760, %v7818_v45 }
  0x92   : > { %1002 = vmatprep.mubr.f32.mxu0 %v9949_v1 }
  0x93   : > { %v931_v58 = vsub.f32 %v929_v53, %v930_v55  ;;  %1166 = vmatprep.subr.mxu1 %v930_v55  ;;  %v937_v59 = vsub.f32 %v935_v54, %v936_v56  ;;  %v7854_v55 = vld [vmem:[%s9909_s1 + $0x68] sm:$0xff] }
  0x94   : > { %1170 = vmatpush1.msra.mxu1 %v936_v56  ;;  %v7859_v56 = vld [vmem:[%s9909_s1 + $0x78] sm:$0xff] }
  0x95   : > { %v938_v60 = vand.u32 4294901760, %v937_v59  ;;  %1235 = vmatmul.mubr.f32.vlgmr.msra.gmra.mrb[0].mxu1 %v7675_v27  ;;  %1242 = vmatprep.subr.mxu1 %v850_v49  ;;  %v932_v61 = vand.u32 4294901760, %v931_v58 }
  0x96   : > { %1244 = vmatpush1.msra.mxu1 %v852_v50  ;;  %1307 = vmatprep.mubr.f32.mxu1 %v9949_v1 }
  0x97   : > { %933 = vmatprep.subr.mxu0 %v932_v61  ;;  %1328 = vmatprep.subr.mxu1 %v7629_v13  ;;  %v9926_v61 = vand.u32 4294901760, %v7854_v55 }
  0x98   : > { %939 = vmatpush1.msra.mxu0 %v938_v60  ;;  %v7876_v60 = vpack.c.bf16 %v9933_v52, %v9934_v51 }
  0x99   : > { %1004 = vmatmul.mubr.f32.vlgmr.msra.gmra.mrb[2].mxu0 %v7675_v27  ;;  %1012 = vmatprep.subr.mxu0 %v929_v53  ;;  %v7844_v53 = vld [vmem:[%s9909_s1 + $0x40] sm:$0xff] }
  0x9a   : > { %1015 = vmatpush1.msra.mxu0 %v935_v54  ;;  %1078 = vmatprep.mubr.f32.mxu0 %v9949_v1  ;;  %v7849_v54 = vld [vmem:[%s9909_s1 + $0x50] sm:$0xff]  ;;  %v9932_v58 = vand.u32 4294901760, %v7844_v53  ;;  %10278 = vst [vmem:[#allocation6_spill] sm:$0xff] %v7876_v60 }
  0x9b   : > { %1088 = vmatprep.subr.mxu0 %v850_v49  ;;  %v9935_v49 = vand.u32 4294901760, %v7813_v44  ;;  %v9929_v59 = vand.u32 4294901760, %v7849_v54 }
  0x9d   : > { %1309 = vmatmul.mubr.f32.vlgmr.msra.gmra.mrb[0].mxu1 %v7675_v27  ;;  %v7905_v4 = vpack.c.bf16 %v9929_v59, %v9932_v58  ;;  %v8045_v59 = vld [vmem:[%s9909_s1 + $0x108] sm:$0xff] }
  0x9e   : > { %1330 = vmatpush1.msra.mxu1 %v7623_v9  ;;  %1393 = vmatprep.mubr.f32.mxu1 %v9949_v1  ;;  %10304 = vst [vmem:[#allocation32_spill] sm:$0xff] %v8045_v59 }
  0x9f   : > { %1410 = vmatprep.subr.mxu1 %v7649_v21  ;;  %10282 = vst [vmem:[#allocation10_spill] sm:$0xff] %v7905_v4 }
  0xa1   : > { %1081 = vmatmul.mubr.f32.vlgmr.msra.gmra.mrb[2].mxu0 %v7692_v35  ;;  %v7781_v35 = vld [vmem:[%s9909_s1] sm:$0xff] }
  0xa2   : > { %1090 = vmatpush1.msra.mxu0 %v852_v50  ;;  %1153 = vmatprep.mubr.f32.mxu0 %v9949_v1  ;;  %v7837_v50 = vpack.c.bf16 %v9939_v42, %v9942_v41  ;;  %v8083_v42 = vld [vmem:[%s9909_s1 + $0x128] sm:$0xff] }
  0xa3   : > { %10308 = vst [vmem:[#allocation36_spill] sm:$0xff] %v8083_v42 }
  0xa4   : > { %10276 = vst [vmem:[#allocation4_spill] sm:$0xff] %v7837_v50 }
  0xa5   : > { %1399 = vmatmul.mubr.f32.vlgmr.msra.gmra.mrb[0].mxu1 %v1398_v2  ;;  %v7893_v2 = vld [vmem:[%s9909_s1 + $0x88] sm:$0xff] }
  0xa6   : > { %1416 = vmatpush1.msra.mxu1 %v7647_v20  ;;  %1479 = vmatprep.mubr.f32.mxu1 %v9949_v1  ;;  %10280 = vst [vmem:[#allocation8_spill] sm:$0xff] %v7893_v2  ;;  %v9922_v8 = vand.u32 4294901760, %v7893_v2 }
  0xa7   : > { %1489 = vmatprep.subr.mxu1 %v7632_v15  ;;  %v1813_v15 = vsel %vm1805_vm7, %v1799_v11, 0.0  ;;  %v7921_v11 = vld [vmem:[%s9909_s1 + $0x80] sm:$0xff] }
  0xa8   : > { %v1821_v19 = vsel %vm320_vm1, %v1813_v15, 0  ;;  %10284 = vst [vmem:[#allocation12_spill] sm:$0xff] %v7921_v11  ;;  %v7936_v15 = vld [vmem:[%s9909_s1 + $0xb8] sm:$0xff] }
  0xa9   : > { %1157 = vmatmul.mubr.f32.vlgmr.msra.gmra.mrb[2].mxu0 %v919_v39  ;;  %v1828_v22 = vand.u32 4294901760, %v1821_v19  ;;  %v9944_v39 = vand.u32 4294901760, %v7781_v35  ;;  %10287 = vst [vmem:[#allocation15_spill] sm:$0xff] %v7936_v15 }
  0xaa   : > { %2434 = vmatprep.mubr.f32.mxu0 %v9949_v1 }
  0xab   : > { %v1911_v24 = vsub.f32 %v1821_v19, %v1828_v22  ;;  %v7829_v47 = vpack.c.bf16 %v9943_v40, %v9944_v39 }
  0xad   : > { %1481 = vmatmul.mubr.f32.vlgmr.msra.gmra.mrb[0].mxu1 %v7707_v57  ;;  %10275 = vst [vmem:[#allocation3_spill] sm:$0xff] %v7829_v47 }
  0xae   : > { %1492 = vmatpush1.msra.mxu1 %v7627_v12  ;;  %1555 = vmatprep.mubr.f32.mxu1 %v9949_v1  ;;  %v1826_v12 = vand.u32 4294901760, %v1824_v10 }
  0xaf   : > { %1565 = vmatprep.subr.mxu1 %v7629_v13 }
  0xb0   : > { %v1905_v18 = vsub.f32 %v1824_v10, %v1826_v12  ;;  %v9919_v10 = vand.u32 4294901760, %v7898_v3 }
  0xb2   : > { %v1906_v21 = vand.u32 4294901760, %v1905_v18 }
  0xb5   : > { %1558 = vmatmul.mubr.f32.vlgmr.msra.gmra.mrb[0].mxu1 %v1395_v62  ;;  %v9925_v62 = vand.u32 4294901760, %v7859_v56 }
  0xb6   : > { %1567 = vmatpush1.msra.mxu1 %v7623_v9  ;;  %1630 = vmatprep.mubr.f32.mxu1 %v9949_v1 }
  0xb7   : > { %1643 = vmatprep.subr.mxu1 %v7640_v17  ;;  %v1818_v17 = vsel %vm316_vm0, %v6603_v14, 0  ;;  %v7914_v7 = vpack.c.bf16 %v9925_v62, %v9926_v61  ;;  %v7931_v14 = vld [vmem:[%s9909_s1 + $0xa8] sm:$0xff] }
  0xb8   : > { %v7747_v20 = vand.u32 4294901760, %v1818_v17  ;;  %10286 = vst [vmem:[#allocation14_spill] sm:$0xff] %v7931_v14 }
  0xb9   : > { %10283 = vst [vmem:[#allocation11_spill] sm:$0xff] %v7914_v7 }
  0xba   : > { %v1894_v23 = vsub.f32 %v1818_v17, %v7747_v20 }
  0xbc   : > { %v1895_v25 = vand.u32 4294901760, %v1894_v23 }
  0xbd   : > { %1634 = vmatmul.mubr.f32.vlgmr.msra.gmra.mrb[0].mxu1 %v1396_v63  ;;  %v7883_v63 = vld [vmem:[%s9909_s1 + $0x60] sm:$0xff] }
  0xbe   : > { %1647 = vmatpush1.msra.mxu1 %v7636_v16  ;;  %1710 = vmatprep.mubr.f32.mxu1 %v9949_v1  ;;  %v1907_v16 = vsub.f32 %v1905_v18, %v1906_v21  ;;  %v1896_v27 = vsub.f32 %v1894_v23, %v1895_v25  ;;  %v9924_v5 = vand.u32 4294901760, %v7883_v63 }
  0xbf   : > { %1719 = vmatprep.subr.mxu1 %v7629_v13  ;;  %v1912_v13 = vand.u32 4294901760, %v1911_v24 }
  0xc0   : > { %v1908_v26 = vand.u32 4294901760, %v1907_v16  ;;  %v1897_v29 = vand.u32 4294901760, %v1896_v27  ;;  %v7943_v17 = vpack.c.bf16 %v9923_v6, %v9924_v5  ;;  %v7964_v16 = vld [vmem:[%s9909_s1 + $0xb0] sm:$0xff] }
  0xc1   : > { %v1913_v28 = vsub.f32 %v1911_v24, %v1912_v13  ;;  %10291 = vst [vmem:[#allocation19_spill] sm:$0xff] %v7964_v16  ;;  %v9927_v27 = vand.u32 4294901760, %v7964_v16 }
  0xc2   : > { %10288 = vst [vmem:[#allocation16_spill] sm:$0xff] %v7943_v17 }
  0xc3   : > { %v1914_v30 = vand.u32 4294901760, %v1913_v28 }
  0xc5   : > { %1712 = vmatmul.mubr.f32.vlgmr.msra.gmra.mrb[0].mxu1 %v7707_v57 }
  0xc6   : > { %1721 = vmatpush1.msra.mxu1 %v7623_v9  ;;  %1784 = vmatprep.mubr.f32.mxu1 %v9949_v1  ;;  %v7762_v9 = vld [vmem:[%s9909_s1 + $0x8] sm:$0xff] }
  0xc7   : > { %1827 = vmatprep.subr.mxu1 %v1826_v12  ;;  %v9946_v32 = vand.u32 4294901760, %v7762_v9  ;;  %v10358_v0 = vand.u32 4294901760, %v7762_v9 }
  0xc9   : > { %v7776_v34 = vpack.c.bf16 %v9945_v33, %v9946_v32  ;;  %v8159_v33 = vld [vmem:[%s9909_s1 + $0x168] sm:$0xff] }
  0xca   : > { %10318 = vst [vmem:[#allocation44_spill] sm:$0xff] %v8159_v33 }
  0xcb   : > { %10274 = vst [vmem:[#allocation2_spill] sm:$0xff] %v7776_v34 }
  0xcd   : > { %1786 = vmatmul.mubr.f32.vlgmr.msra.gmra.mrb[0].mxu1 %v7707_v57  ;;  %v7867_v57 = vpack.c.bf16 %v9935_v49, %v9936_v48  ;;  %v9952_v49 = vand.u32 4294901760, %v8045_v59 }
  0xce   : > { %1829 = vmatpush1.msra.mxu1 %v1828_v22  ;;  %1892 = vmatprep.mubr.f32.mxu1 %v9949_v1 }
  0xcf   : > { %1909 = vmatprep.subr.mxu1 %v1908_v26  ;;  %10277 = vst [vmem:[#allocation5_spill] sm:$0xff] %v7867_v57 }
  0xd5   : > { %1898 = vmatmul.mubr.f32.vlgmr.msra.gmra.mrb[0].mxu1 %v1897_v29 }
  0xd6   : > { %1915 = vmatpush1.msra.mxu1 %v1914_v30  ;;  %1978 = vmatprep.mubr.f32.mxu1 %v9949_v1 }
  0xd7   : > { %1988 = vmatprep.subr.mxu1 %v1905_v18  ;;  %v9918_v18 = vand.u32 4294901760, %v7921_v11  ;;  %v2359_v11 = vld [vmem:[%s9914_s6] sm:$0xff] }
  0xdd   : > { %1980 = vmatmul.mubr.f32.vlgmr.msra.gmra.mrb[0].mxu1 %v7747_v20 }
  0xde   : > { %1991 = vmatpush1.msra.mxu1 %v1911_v24  ;;  %2054 = vmatprep.mubr.f32.mxu1 %v9949_v1  ;;  %v7969_v24 = vld [vmem:[%s9909_s1 + $0xc8] sm:$0xff] }
  0xdf   : > { %2064 = vmatprep.subr.mxu1 %v1826_v12  ;;  %10292 = vst [vmem:[#allocation20_spill] sm:$0xff] %v7969_v24  ;;  %v9931_v29 = vand.u32 4294901760, %v7969_v24 }
  0xe5   : > { %2057 = vmatmul.mubr.f32.vlgmr.msra.gmra.mrb[0].mxu1 %v1894_v23  ;;  %v7959_v23 = vld [vmem:[%s9909_s1 + $0xa0] sm:$0xff] }
  0xe6   : > { %2066 = vmatpush1.msra.mxu1 %v1828_v22  ;;  %2129 = vmatprep.mubr.f32.mxu1 %v9949_v1  ;;  %10290 = vst [vmem:[#allocation18_spill] sm:$0xff] %v7959_v23 }
  0xe7   : > { %2142 = vmatprep.subr.mxu1 %v1906_v21  ;;  %v9921_v21 = vand.u32 4294901760, %v7931_v14 }
  0xed   : > { %2133 = vmatmul.mubr.f32.vlgmr.msra.gmra.mrb[0].mxu1 %v1895_v25  ;;  %v7974_v25 = vld [vmem:[%s9909_s1 + $0xd8] sm:$0xff] }
  0xee   : > { %2146 = vmatpush1.msra.mxu1 %v1912_v13  ;;  %2209 = vmatprep.mubr.f32.mxu1 %v9949_v1  ;;  %10293 = vst [vmem:[#allocation21_spill] sm:$0xff] %v7974_v25  ;;  %v9928_v13 = vand.u32 4294901760, %v7959_v23  ;;  %v9930_v30 = vand.u32 4294901760, %v7974_v25 }
  0xef   : > { %2218 = vmatprep.subr.mxu1 %v1826_v12  ;;  %v7926_v12 = vld [vmem:[%s9909_s1 + $0x90] sm:$0xff] }
  0xf0   : > { %10285 = vst [vmem:[#allocation13_spill] sm:$0xff] %v7926_v12  ;;  %v9917_v19 = vand.u32 4294901760, %v7926_v12  ;;  %v8028_v5 = vpack.c.bf16 %v9930_v30, %v9931_v29  ;;  %v8050_v30 = vld [vmem:[%s9909_s1 + $0x118] sm:$0xff] }
  0xf1   : > { %10305 = vst [vmem:[#allocation33_spill] sm:$0xff] %v8050_v30  ;;  %v9951_v48 = vand.u32 4294901760, %v8050_v30  ;;  %v10315_v30 = vand.u32 4294901760, %v8083_v42 }
  0xf2   : > { %v7981_v26 = vpack.c.bf16 %v9917_v19, %v9918_v18  ;;  %v7997_v19 = vld [vmem:[%s9909_s1 + $0xc0] sm:$0xff]  ;;  %v8002_v18 = vld [vmem:[%s9909_s1 + $0xd0] sm:$0xff]  ;;  %10301 = vst [vmem:[#allocation29_spill] sm:$0xff] %v8028_v5 }
  0xf3   : > { %10296 = vst [vmem:[#allocation24_spill] sm:$0xff] %v7997_v19  ;;  %10297 = vst [vmem:[#allocation25_spill] sm:$0xff] %v8002_v18  ;;  %v9937_v6 = vand.u32 4294901760, %v8002_v18  ;;  %v8104_v39 = vpack.c.bf16 %v9951_v48, %v9952_v49  ;;  %v8126_v48 = vld [vmem:[%s9909_s1 + $0x158] sm:$0xff] }
  0xf4   : > { %10294 = vst [vmem:[#allocation22_spill] sm:$0xff] %v7981_v26 }
  0xf5   : > { %2211 = vmatmul.mubr.f32.vlgmr.msra.gmra.mrb[0].mxu1 %v7747_v20  ;;  %10311 = vst [vmem:[#allocation39_spill] sm:$0xff] %v8104_v39 }
  0xf6   : > { %2220 = vmatpush1.msra.mxu1 %v1828_v22  ;;  %2283 = vmatprep.mubr.f32.mxu1 %v9949_v1  ;;  %v9920_v22 = vand.u32 4294901760, %v7936_v15  ;;  %v8121_v1 = vld [vmem:[%s9909_s1 + $0x148] sm:$0xff]  ;;  %v8339_v15 = vld [vmem:[%s9909_s1 + $0x1f8] sm:$0xff] }
  0xf7   : > { %6613 = vmatprep.subr.bf16.mxu1 %v7776_v34  ;;  %v10322_v42 = vand.u32 4294901760, %v8121_v1  ;;  %10340 = vst [vmem:[#allocation60_spill] sm:$0xff] %v8339_v15 }
  0xf8   : > { %v7990_v28 = vpack.c.bf16 %v9920_v22, %v9921_v21  ;;  %v8012_v22 = vld [vmem:[%s9909_s1 + $0xf8] sm:$0xff]  ;;  %v8019_v21 = vpack.c.bf16 %v9927_v27, %v9928_v13  ;;  %v8035_v27 = vld [vmem:[%s9909_s1 + $0xe0] sm:$0xff]  ;;  %v8040_v13 = vld [vmem:[%s9909_s1 + $0xf0] sm:$0xff] }
  0xf9   : > { %10299 = vst [vmem:[#allocation27_spill] sm:$0xff] %v8012_v22  ;;  %v9940_v61 = vand.u32 4294901760, %v8012_v22  ;;  %10302 = vst [vmem:[#allocation30_spill] sm:$0xff] %v8035_v27  ;;  %v9948_v58 = vand.u32 4294901760, %v8035_v27  ;;  %v9947_v52 = vand.u32 4294901760, %v8040_v13 }
  0xfa   : > { %10295 = vst [vmem:[#allocation23_spill] sm:$0xff] %v7990_v28  ;;  %10300 = vst [vmem:[#allocation28_spill] sm:$0xff] %v8019_v21 }
  0xfb   : > { %10303 = vst [vmem:[#allocation31_spill] sm:$0xff] %v8040_v13 }
  0xfd   : > { %2285 = vmatmul.mubr.f32.vlgmr.msra.gmra.mrb[0].mxu1 %v7747_v20  ;;  %v7952_v20 = vpack.c.bf16 %v9919_v10, %v9922_v8  ;;  %v8007_v10 = vld [vmem:[%s9909_s1 + $0xe8] sm:$0xff]  ;;  %v9938_v8 = vand.u32 4294901760, %v7997_v19 }
  0xfe   : > { %6615 = vmatpush1.bf16.msra.mxu1 %v7829_v47  ;;  %10298 = vst [vmem:[#allocation26_spill] sm:$0xff] %v8007_v10  ;;  %v9941_v62 = vand.u32 4294901760, %v8007_v10  ;;  %v10323_v10 = vand.u32 4294901760, %v8126_v48 }
  0xff   : > { %6617 = vmatprep.subr.bf16.mxu1 %v7837_v50  ;;  %10289 = vst [vmem:[#allocation17_spill] sm:$0xff] %v7952_v20  ;;  %v8057_v29 = vpack.c.bf16 %v9937_v6, %v9938_v8  ;;  %v8073_v6 = vld [vmem:[%s9909_s1 + $0x100] sm:$0xff]  ;;  %v8078_v8 = vld [vmem:[%s9909_s1 + $0x110] sm:$0xff] }
 0x100   : > { %v8066_v51 = vpack.c.bf16 %v9940_v61, %v9941_v62  ;;  %v8088_v61 = vld [vmem:[%s9909_s1 + $0x138] sm:$0xff]  ;;  %v8095_v62 = vpack.c.bf16 %v9947_v52, %v9948_v58  ;;  %v9964_v41 = vand.u32 4294901760, %v8073_v6  ;;  %v9963_v40 = vand.u32 4294901760, %v8078_v8  ;;  %v8111_v52 = vld [vmem:[%s9909_s1 + $0x120] sm:$0xff]  ;;  %v8116_v58 = vld [vmem:[%s9909_s1 + $0x130] sm:$0xff] }
 0x101   : > { %10306 = vst [vmem:[#allocation34_spill] sm:$0xff] %v8057_v29  ;;  %10309 = vst [vmem:[#allocation37_spill] sm:$0xff] %v8088_v61  ;;  %v9977_v32 = vand.u32 4294901760, %v8111_v52  ;;  %v10316_v59 = vand.u32 4294901760, %v8088_v61  ;;  %v8180_v18 = vpack.c.bf16 %v10323_v10, %v10322_v42  ;;  %v8197_v61 = vld [vmem:[%s9909_s1 + $0x188] sm:$0xff]  ;;  %v8202_v42 = vld [vmem:[%s9909_s1 + $0x198] sm:$0xff] }
 0x102   : > { %6619 = vmatpush1.bf16.msra.mxu1 %v7867_v57  ;;  %10307 = vst [vmem:[#allocation35_spill] sm:$0xff] %v8066_v51  ;;  %10310 = vst [vmem:[#allocation38_spill] sm:$0xff] %v8095_v62  ;;  %v8133_v49 = vpack.c.bf16 %v9963_v40, %v9964_v41  ;;  %v8149_v40 = vld [vmem:[%s9909_s1 + $0x140] sm:$0xff]  ;;  %v8154_v41 = vld [vmem:[%s9909_s1 + $0x150] sm:$0xff]  ;;  %v9993_v24 = vand.u32 4294901760, %v8202_v42 }
 0x103   : > { %6621 = vmatprep.subr.bf16.mxu1 %v7876_v60  ;;  %10312 = vst [vmem:[#allocation40_spill] sm:$0xff] %v8111_v52  ;;  %10313 = vst [vmem:[#allocation41_spill] sm:$0xff] %v8116_v58  ;;  %v8142_v13 = vpack.c.bf16 %v10316_v59, %v10315_v30  ;;  %v8164_v59 = vld [vmem:[%s9909_s1 + $0x178] sm:$0xff]  ;;  %v10320_v30 = vand.u32 4294901760, %v8116_v58  ;;  %v9992_v27 = vand.u32 4294901760, %v8149_v40  ;;  %v10325_v10 = vand.u32 4294901760, %v8154_v41 }
 0x104   : > { %10314 = vst [vmem:[#allocation42_spill] sm:$0xff] %v8133_v49  ;;  %10319 = vst [vmem:[#allocation45_spill] sm:$0xff] %v8164_v59  ;;  %v10328_v19 = vand.u32 4294901760, %v8164_v59  ;;  %v8264_v59 = vld [vmem:[%s9909_s1 + $0x1b8] sm:$0xff] }
 0x105   : > { %10317 = vst [vmem:[#allocation43_spill] sm:$0xff] %v8142_v13  ;;  %v8171_v22 = vpack.c.bf16 %v10320_v30, %v9977_v32  ;;  %10324 = vst [vmem:[#allocation47_spill] sm:$0xff] %v8180_v18  ;;  %v8187_v30 = vld [vmem:[%s9909_s1 + $0x160] sm:$0xff]  ;;  %v8192_v32 = vld [vmem:[%s9909_s1 + $0x170] sm:$0xff]  ;;  %v8209_v52 = vpack.c.bf16 %v10325_v10, %v9992_v27 }
 0x106   : > { %6623 = vmatpush1.bf16.msra.mxu1 %v7905_v4  ;;  %v9990_v58 = vand.u32 4294901760, %v8192_v32 }
 0x107   : > { %6625 = vmatprep.subr.bf16.mxu1 %v7914_v7  ;;  %10321 = vst [vmem:[#allocation46_spill] sm:$0xff] %v8171_v22  ;;  %10326 = vst [vmem:[#allocation48_spill] sm:$0xff] %v8209_v52 }
 0x10a   : > { %6627 = vmatpush1.bf16.msra.mxu1 %v7943_v17 }
 0x10b   : > { %6629 = vmatprep.subr.bf16.mxu1 %v7952_v20 }
 0x10e   : > { %6631 = vmatpush1.bf16.msra.mxu1 %v7981_v26 }
 0x10f   : > { %6633 = vmatprep.subr.bf16.mxu1 %v7990_v28  ;;  %v8443_v28 = vsub.f32 %v7762_v9, %v10358_v0  ;;  %v10363_v9 = vand.u32 4294901760, %v7786_v36 }
 0x111   : > { %v8462_v0 = vsub.f32 %v7786_v36, %v10363_v9  ;;  %v10370_v36 = vand.u32 4294901760, %v7796_v38 }
 0x112   : > { %6635 = vmatpush1.bf16.msra.mxu1 %v8019_v21 }
 0x113   : > { %6637 = vmatprep.subr.bf16.mxu1 %v8028_v5  ;;  %10364 = vst [vmem:[#allocation77_spill] sm:$0xff] %v8462_v0 }
 0x116   : > { %6639 = vmatpush1.bf16.msra.mxu1 %v8057_v29 }
 0x117   : > { %6641 = vmatprep.subr.bf16.mxu1 %v8066_v51 }
 0x11a   : > { %6643 = vmatpush1.bf16.msra.mxu1 %v8095_v62 }
 0x11b   : > { %6645 = vmatprep.subr.bf16.mxu1 %v8104_v39  ;;  %v8301_v39 = vld [vmem:[%s9909_s1 + $0x1d8] sm:$0xff] }
 0x11e   : > { %6647 = vmatpush1.bf16.msra.mxu1 %v8133_v49  ;;  %v9991_v49 = vand.u32 4294901760, %v8187_v30 }
 0x11f   : > { %6649 = vmatprep.subr.bf16.mxu1 %v8142_v13  ;;  %v10327_v13 = vand.u32 4294901760, %v8159_v33 }
 0x120   : > { %v8227_v10 = vpack.c.bf16 %v9990_v58, %v9991_v49  ;;  %v8246_v58 = vld [vmem:[%s9909_s1 + $0x190] sm:$0xff] }
 0x121   : > { %v8218_v25 = vpack.c.bf16 %v10328_v19, %v10327_v13  ;;  %v8241_v13 = vld [vmem:[%s9909_s1 + $0x180] sm:$0xff]  ;;  %v10003_v27 = vand.u32 4294901760, %v8246_v58 }
 0x122   : > { %6651 = vmatpush1.bf16.msra.mxu1 %v8171_v22  ;;  %v9994_v22 = vand.u32 4294901760, %v8197_v61  ;;  %10330 = vst [vmem:[#allocation50_spill] sm:$0xff] %v8227_v10  ;;  %v10004_v49 = vand.u32 4294901760, %v8241_v13 }
 0x123   : > { %6653 = vmatprep.subr.bf16.mxu1 %v8180_v18  ;;  %10329 = vst [vmem:[#allocation49_spill] sm:$0xff] %v8218_v25 }
 0x124   : > { %v8234_v19 = vpack.c.bf16 %v9993_v24, %v9994_v22  ;;  %v8254_v24 = vpack.c.bf16 %v10003_v27, %v10004_v49  ;;  %v8259_v22 = vld [vmem:[%s9909_s1 + $0x1a8] sm:$0xff]  ;;  %v8276_v27 = vld [vmem:[%s9909_s1 + $0x1b0] sm:$0xff] }
 0x125   : > { %v10016_v33 = vand.u32 4294901760, %v8259_v22 }
 0x126   : > { %6655 = vmatpush1.bf16.msra.mxu1 %v8209_v52  ;;  %10331 = vst [vmem:[#allocation51_spill] sm:$0xff] %v8234_v19  ;;  %10332 = vst [vmem:[#allocation52_spill] sm:$0xff] %v8254_v24 }
 0x127   : > { %6657 = vmatprep.subr.bf16.mxu1 %v8218_v25  ;;  %v10017_v25 = vand.u32 4294901760, %v8276_v27 }
 0x12a   : > { %6659 = vmatpush1.bf16.msra.mxu1 %v8227_v10  ;;  %v8271_v10 = vld [vmem:[%s9909_s1 + $0x1a0] sm:$0xff] }
 0x12b   : > { %6661 = vmatprep.subr.bf16.mxu1 %v8234_v19  ;;  %v10015_v19 = vand.u32 4294901760, %v8264_v59  ;;  %v10018_v49 = vand.u32 4294901760, %v8271_v10 }
 0x12d   : > { %v8285_v52 = vpack.c.bf16 %v10015_v19, %v10016_v33  ;;  %v8291_v18 = vpack.c.bf16 %v10017_v25, %v10018_v49  ;;  %v10031_v33 = vand.u32 4294901760, %v8301_v39  ;;  %v8309_v25 = vld [vmem:[%s9909_s1 + $0x1c0] sm:$0xff]  ;;  %v8314_v49 = vld [vmem:[%s9909_s1 + $0x1d0] sm:$0xff] }
 0x12e   : > { %6663 = vmatpush1.bf16.msra.mxu1 %v8254_v24  ;;  %v8296_v24 = vld [vmem:[%s9909_s1 + $0x1c8] sm:$0xff]  ;;  %10335 = vst [vmem:[#allocation55_spill] sm:$0xff] %v8309_v25  ;;  %10336 = vst [vmem:[#allocation56_spill] sm:$0xff] %v8314_v49  ;;  %v10034_v62 = vand.u32 4294901760, %v8309_v25 }
 0x12f   : > { %10333 = vst [vmem:[#allocation53_spill] sm:$0xff] %v8285_v52  ;;  %10334 = vst [vmem:[#allocation54_spill] sm:$0xff] %v8291_v18  ;;  %6665 = vmatprep.subr.bf16.mxu1 %v8285_v52  ;;  %v10032_v19 = vand.u32 4294901760, %v8296_v24  ;;  %v10033_v52 = vand.u32 4294901760, %v8314_v49 }
 0x131   : > { %v8323_v16 = vpack.c.bf16 %v10031_v33, %v10032_v19  ;;  %v8329_v23 = vpack.c.bf16 %v10033_v52, %v10034_v62  ;;  %v10049_v19 = vand.u32 4294901760, %v8339_v15  ;;  %v8347_v52 = vld [vmem:[%s9909_s1 + $0x1e0] sm:$0xff]  ;;  %v8352_v62 = vld [vmem:[%s9909_s1 + $0x1f0] sm:$0xff] }
 0x132   : > { %6667 = vmatpush1.bf16.msra.mxu1 %v8291_v18  ;;  %v8334_v18 = vld [vmem:[%s9909_s1 + $0x1e8] sm:$0xff]  ;;  %10341 = vst [vmem:[#allocation61_spill] sm:$0xff] %v8347_v52  ;;  %10342 = vst [vmem:[#allocation62_spill] sm:$0xff] %v8352_v62  ;;  %v10051_v51 = vand.u32 4294901760, %v8347_v52 }
 0x133   : > { %10337 = vst [vmem:[#allocation57_spill] sm:$0xff] %v8323_v16  ;;  %10338 = vst [vmem:[#allocation58_spill] sm:$0xff] %v8329_v23  ;;  %6669 = vmatprep.subr.bf16.mxu1 %v8323_v16  ;;  %v10052_v33 = vand.u32 4294901760, %v8334_v18  ;;  %v10050_v16 = vand.u32 4294901760, %v8352_v62 }
 0x134   : > { %10339 = vst [vmem:[#allocation59_spill] sm:$0xff] %v8334_v18 }
 0x135   : > { %v8361_v14 = vpack.c.bf16 %v10049_v19, %v10052_v33  ;;  %v8367_v12 = vpack.c.bf16 %v10050_v16, %v10051_v51  ;;  %v2363_v19 = vsel %vm2361_vm8, %v2359_v11, 0  ;;  %v2360_v16 = vld [vmem:[%s9914_s6 + $0x8] sm:$0xff] }
 0x136   : > { %6671 = vmatpush1.bf16.msra.mxu1 %v8329_v23  ;;  %v8379_v51 = vand.u32 4294901760, %v2363_v19  ;;  %v2366_v33 = vsel %vm2361_vm8, %v2360_v16, 0 }
 0x137   : > { %10343 = vst [vmem:[#allocation63_spill] sm:$0xff] %v8361_v14  ;;  %10344 = vst [vmem:[#allocation64_spill] sm:$0xff] %v8367_v12  ;;  %6673 = vmatprep.subr.bf16.mxu1 %v8361_v14  ;;  %v1318_v14 = vpop.permute.xlu0 %1317 }
 0x13a   : > { %6675 = vmatpush1.bf16.msra.mxu1 %v8367_v12  ;;  %v8383_v12 = vsub.f32 %v2363_v19, %v8379_v51 }
 0x13b   : > { %6997 = vmatprep.subr.bf16.mxu1 %v7776_v34  ;;  %v8385_v34 = vand.u32 4294901760, %v2366_v33 }
 0x13c   : > { %v10076_v62 = vand.u32 4294901760, %v8383_v12 }
 0x13d   : > { %v8389_v52 = vsub.f32 %v2366_v33, %v8385_v34 }
 0x13e   : > { %v2438_v18 = vsub.f32 %v8383_v12, %v10076_v62 }
 0x13f   : > { %v10075_v16 = vand.u32 4294901760, %v8389_v52 }
 0x17c   : > { %v1158_v23 = vpop.f32.mrb[2].mxu0 }
 0x17d   : > { %v1160_v29 = vpop.f32.mrb[3].mxu0  ;;  %v7384_v11 = vadd.f32 %v1318_v14, %v1158_v23  ;;  %v2439_v23 = vand.u32 4294901760, %v2438_v18 }
 0x17e   : > { %v7386_v5 = vadd.f32 %v1318_v14, %v1160_v29  ;;  %v2449_v14 = vsub.f32 %v8389_v52, %v10075_v16 }
 0x180   : > { %v2450_v18 = vand.u32 4294901760, %v2449_v14 }
 0x1d0   : > { %v2286_v15 = vpop.f32.mrb[0].mxu1 }
 0x1d1   : > { %v8395_v21 = vadd.f32 %v7384_v11, %v2286_v15  ;;  %v2288_v19 = vpop.f32.mrb[1].mxu1 }
 0x1d2   : > { %v8397_v3 = vadd.f32 %v7386_v5, %v2288_v19  ;;  %v10353_v19 = vmov 0.0  }
 0x1d3   : > { %10345 = vst [vmem:[#allocation65_spill] sm:$0xff] %v8395_v21  ;;  %v8400_v2 = vand.u32 4294901760, %v8395_v21 }
 0x1d4   : > { %10346 = vst [vmem:[#allocation66_spill] sm:$0xff] %v8397_v3  ;;  %v8403_v33 = vand.u32 4294901760, %v8397_v3 }
 0x1d5   : > { %10347 = vst [vmem:[#allocation67_spill] sm:$0xff] %v8400_v2  ;;  %v8410_v29 = vsub.f32 %v8395_v21, %v8400_v2  ;;  %v10354_v21 = vand.u32 4294901760, %v8073_v6 }
 0x1d6   : > { %10348 = vst [vmem:[#allocation68_spill] sm:$0xff] %v8403_v33  ;;  %v8414_v15 = vsub.f32 %v8397_v3, %v8403_v33  ;;  %2369 = vmatprep.subr.mxu0 %v8403_v33 }
 0x1d7   : > { %10349 = vst [vmem:[#allocation69_spill] sm:$0xff] %v8410_v29  ;;  %2371 = vmatpush1.msra.mxu0 %v8400_v2  ;;  %v8419_v5 = vand.u32 4294901760, %v8410_v29  ;;  %v8432_v49 = vsub.f32 %v8073_v6, %v10354_v21  ;;  %v10360_v6 = vand.u32 4294901760, %v7781_v35 }
 0x1d8   : > { %10350 = vst [vmem:[#allocation70_spill] sm:$0xff] %v8414_v15  ;;  %2440 = vmatmul.mubr.f32.vlgmr.msra.gmra.mrb[0].mxu0 %v2439_v23  ;;  %v8422_v11 = vand.u32 4294901760, %v8414_v15  ;;  %v10356_v23 = vand.u32 4294901760, %v8078_v8 }
 0x1d9   : > { %10351 = vst [vmem:[#allocation71_spill] sm:$0xff] %v8419_v5  ;;  %2445 = vmatprep.mubr.f32.mxu0 %v10353_v19  ;;  %v2466_v16 = vsub.f32 %v8410_v29, %v8419_v5  ;;  %10355 = vst [vmem:[#allocation73_spill] sm:$0xff] %v8432_v49 }
 0x1da   : > { %10352 = vst [vmem:[#allocation72_spill] sm:$0xff] %v8422_v11  ;;  %v2460_v62 = vsub.f32 %v8414_v15, %v8422_v11  ;;  %v8437_v14 = vsub.f32 %v8078_v8, %v10356_v23  ;;  %v8453_v8 = vsub.f32 %v7781_v35, %v10360_v6  ;;  %v10367_v23 = vand.u32 4294901760, %v8121_v1 }
 0x1db   : > { %v2467_v25 = vand.u32 4294901760, %v2466_v16  ;;  %v10368_v6 = vand.u32 4294901760, %v8126_v48 }
 0x1dc   : > { %2451 = vmatmul.mubr.f32.gmra.mrb[4].mxu0 %v2450_v18  ;;  %v2461_v3 = vand.u32 4294901760, %v2460_v62  ;;  %10357 = vst [vmem:[#allocation74_spill] sm:$0xff] %v8437_v14  ;;  %v10359_v62 = vand.u32 4294901760, %v7767_v31  ;;  %10361 = vst [vmem:[#allocation75_spill] sm:$0xff] %v8453_v8  ;;  %v8457_v21 = vpack.c.bf16 %v8437_v14, %v8432_v49 }
 0x1dd   : > { %2531 = vmatprep.mubr.f32.mxu0 %v10353_v19  ;;  %v8487_v9 = vsub.f32 %v8126_v48, %v10368_v6 }
 0x1de   : > { %v8448_v18 = vsub.f32 %v7767_v31, %v10359_v62  ;;  %2462 = vmatprep.subr.mxu0 %v2461_v3  ;;  %3029 = vmatprep.mubr.f32.mxu1 %v2461_v3  ;;  %10362 = vst [vmem:[#allocation76_spill] sm:$0xff] %v8457_v21  ;;  %v10087_v31 = vand.u32 4294901760, %v8443_v28  ;;  %v8482_v62 = vsub.f32 %v8121_v1, %v10367_v23  ;;  %v10374_v1 = vand.u32 4294901760, %v8154_v41  ;;  %v10452_v21 = vld [vmem:[#allocation60_spill] sm:$0xff] }
 0x1df   : > { %2468 = vmatpush1.msra.mxu0 %v2467_v25  ;;  %3035 = vmatmul.mubr.f32.vlgmr.msra.gmra.mrb[2].mxu1 %v2467_v25  ;;  %v10365_v25 = vand.u32 4294901760, %v7791_v37  ;;  %10369 = vst [vmem:[#allocation79_spill] sm:$0xff] %v8487_v9  ;;  %v8494_v3 = vsub.f32 %v7796_v38, %v10370_v36  ;;  %v10376_v36 = vand.u32 4294901760, %v7808_v43 }
 0x1e0   : > { %2533 = vmatmul.mubr.f32.vlgmr.msra.gmra.mrb[0].mxu0 %v8379_v51  ;;  %2548 = vmatprep.subr.mxu0 %v8414_v15  ;;  %v10088_v35 = vand.u32 4294901760, %v8448_v18  ;;  %v8504_v23 = vsub.f32 %v8154_v41, %v10374_v1  ;;  %v3044_v48 = vsub.f32 %v8443_v28, %v10087_v31  ;;  %v8520_v6 = vpack.c.bf16 %v8487_v9, %v8482_v62 }
 0x1e1   : > { %2551 = vmatpush1.msra.mxu0 %v8410_v29  ;;  %2538 = vmatprep.mubr.f32.mxu0 %v10353_v19  ;;  %v8477_v16 = vsub.f32 %v7791_v37, %v10365_v25  ;;  %10371 = vst [vmem:[#allocation80_spill] sm:$0xff] %v8494_v3  ;;  %v10372_v37 = vand.u32 4294901760, %v8149_v40  ;;  %v10379_v41 = vand.u32 4294901760, %v8453_v8  ;;  %v10380_v1 = vand.u32 4294901760, %v7813_v44 }
 0x1e2   : > { %2632 = vmatprep.subr.mxu0 %v8403_v33  ;;  %6999 = vmatpush1.bf16.msra.mxu1 %v7829_v47  ;;  %10375 = vst [vmem:[#allocation82_spill] sm:$0xff] %v8504_v23  ;;  %v3056_v38 = vsub.f32 %v8448_v18, %v10088_v35  ;;  %10378 = vst [vmem:[#allocation84_spill] sm:$0xff] %v8520_v6  ;;  %v10385_v47 = vand.u32 4294901760, %v8192_v32  ;;  %v10449_v6 = vld [vmem:[#allocation59_spill] sm:$0xff] }
 0x1e3   : > { %10366 = vst [vmem:[#allocation78_spill] sm:$0xff] %v8477_v16  ;;  %7001 = vmatprep.subr.bf16.mxu1 %v7837_v50  ;;  %v8499_v25 = vsub.f32 %v8149_v40, %v10372_v37  ;;  %v8516_v40 = vsub.f32 %v7808_v43, %v10376_v36  ;;  %v3050_v37 = vsub.f32 %v8453_v8, %v10379_v41  ;;  %v10383_v43 = vand.u32 4294901760, %v8462_v0 }
 0x1e4   : > { %2540 = vmatmul.mubr.f32.gmra.mrb[4].mxu0 %v8385_v34  ;;  %v8528_v31 = vsub.f32 %v7813_v44, %v10380_v1  ;;  %v10384_v44 = vand.u32 4294901760, %v8187_v30  ;;  %v3057_v50 = vand.u32 4294901760, %v3056_v38 }
 0x1e5   : > { %10373 = vst [vmem:[#allocation81_spill] sm:$0xff] %v8499_v25  ;;  %2614 = vmatprep.mubr.f32.mxu0 %v10353_v19  ;;  %10377 = vst [vmem:[#allocation83_spill] sm:$0xff] %v8516_v40  ;;  %v8532_v35 = vpack.c.bf16 %v8504_v23, %v8499_v25  ;;  %v3062_v36 = vsub.f32 %v8462_v0, %v10383_v43  ;;  %v3045_v43 = vand.u32 4294901760, %v3044_v48  ;;  %v3051_v41 = vand.u32 4294901760, %v3050_v37 }
 0x1e6   : > { %10381 = vst [vmem:[#allocation85_spill] sm:$0xff] %v8528_v31  ;;  %7003 = vmatpush1.bf16.msra.mxu1 %v7867_v57  ;;  %v8545_v1 = vsub.f32 %v8187_v30, %v10384_v44  ;;  %v8550_v57 = vsub.f32 %v8192_v32, %v10385_v47  ;;  %v10386_v30 = vand.u32 4294901760, %v7818_v45  ;;  %v10389_v48 = vand.u32 4294901760, %v8477_v16 }
 0x1e7   : > { %10382 = vst [vmem:[#allocation86_spill] sm:$0xff] %v8532_v35  ;;  %7005 = vmatprep.subr.bf16.mxu1 %v7876_v60  ;;  %v3063_v47 = vand.u32 4294901760, %v3062_v36  ;;  %v10390_v37 = vand.u32 4294901760, %v8197_v61  ;;  %v10392_v36 = vand.u32 4294901760, %v8494_v3  ;;  %v10455_v35 = vld [vmem:[#allocation29_spill] sm:$0xff] }
 0x1e8   : > { %2617 = vmatmul.mubr.f32.vlgmr.msra.gmra.mrb[0].mxu0 %v8383_v12  ;;  %v8560_v44 = vsub.f32 %v7818_v45, %v10386_v30  ;;  %v8564_v32 = vpack.c.bf16 %v8550_v57, %v8545_v1  ;;  %v8570_v38 = vsub.f32 %v8477_v16, %v10389_v48  ;;  %v10391_v45 = vand.u32 4294901760, %v8202_v42 }
 0x1e9   : > { %2634 = vmatpush1.msra.mxu0 %v8400_v2  ;;  %2622 = vmatprep.mubr.f32.mxu0 %v10353_v19  ;;  %v8575_v29 = vsub.f32 %v8197_v61, %v10390_v37  ;;  %v8587_v60 = vsub.f32 %v8494_v3, %v10392_v36  ;;  %v10393_v48 = vand.u32 4294901760, %v7823_v46  ;;  %v10395_v61 = vand.u32 4294901760, %v8241_v13 }
 0x1ea   : > { %2719 = vmatprep.subr.mxu0 %v8422_v11  ;;  %10387 = vst [vmem:[#allocation87_spill] sm:$0xff] %v8560_v44  ;;  %10388 = vst [vmem:[#allocation88_spill] sm:$0xff] %v8564_v32  ;;  %7007 = vmatpush1.bf16.msra.mxu1 %v7905_v4  ;;  %v8580_v30 = vsub.f32 %v8202_v42, %v10391_v45  ;;  %v10396_v42 = vand.u32 4294901760, %v8246_v58  ;;  %v10398_v36 = vand.u32 4294901760, %v8516_v40 }
 0x1eb   : > { %7009 = vmatprep.subr.bf16.mxu1 %v7914_v7  ;;  %v8592_v4 = vsub.f32 %v7823_v46, %v10393_v48  ;;  %v8597_v37 = vsub.f32 %v8241_v13, %v10395_v61  ;;  %v8605_v7 = vpack.c.bf16 %v3057_v50, %v3045_v43  ;;  %v10399_v46 = vand.u32 4294901760, %v7844_v53 }
 0x1ec   : > { %2625 = vmatmul.mubr.f32.gmra.mrb[4].mxu0 %v8389_v52  ;;  %v8602_v45 = vsub.f32 %v8246_v58, %v10396_v42  ;;  %v8610_v11 = vsub.f32 %v8516_v40, %v10398_v36  ;;  %v8619_v13 = vpack.c.bf16 %v8580_v30, %v8575_v29  ;;  %v10402_v58 = vand.u32 4294901760, %v8528_v31 }
 0x1ed   : > { %10394 = vst [vmem:[#allocation89_spill] sm:$0xff] %v8592_v4  ;;  %2697 = vmatprep.mubr.f32.mxu0 %v10353_v19  ;;  %v8615_v48 = vsub.f32 %v7844_v53, %v10399_v46  ;;  %v10403_v43 = vand.u32 4294901760, %v7849_v54  ;;  %v8637_v36 = vpack.c.bf16 %v3063_v47, %v3051_v41  ;;  %v10409_v50 = vand.u32 4294901760, %v8264_v59 }
 0x1ee   : > { %10397 = vst [vmem:[#allocation90_spill] sm:$0xff] %v8602_v45  ;;  %10401 = vst [vmem:[#allocation92_spill] sm:$0xff] %v8619_v13  ;;  %v8624_v61 = vsub.f32 %v8528_v31, %v10402_v58  ;;  %v8634_v53 = vpack.c.bf16 %v8602_v45, %v8597_v37  ;;  %7011 = vmatpush1.bf16.msra.mxu1 %v7943_v17  ;;  %v10407_v58 = vand.u32 4294901760, %v8259_v22  ;;  %v10412_v46 = vand.u32 4294901760, %v8271_v10 }
 0x1ef   : > { %10400 = vst [vmem:[#allocation91_spill] sm:$0xff] %v8615_v48  ;;  %v8630_v42 = vsub.f32 %v7849_v54, %v10403_v43  ;;  %10406 = vst [vmem:[#allocation95_spill] sm:$0xff] %v8637_v36  ;;  %v8648_v54 = vsub.f32 %v8264_v59, %v10409_v50  ;;  %7013 = vmatprep.subr.bf16.mxu1 %v7952_v20  ;;  %v10411_v43 = vand.u32 4294901760, %v8383_v12  ;;  %v10414_v50 = vand.u32 4294901760, %v7854_v55 }
 0x1f0   : > { %10405 = vst [vmem:[#allocation94_spill] sm:$0xff] %v8634_v53  ;;  %v8643_v13 = vsub.f32 %v8259_v22, %v10407_v58  ;;  %v8658_v17 = vsub.f32 %v8271_v10, %v10412_v46  ;;  %v10413_v22 = vand.u32 4294901760, %v8276_v27  ;;  %v10417_v46 = vand.u32 4294901760, %v8560_v44 }
 0x1f1   : > { %10404 = vst [vmem:[#allocation93_spill] sm:$0xff] %v8630_v42  ;;  %10410 = vst [vmem:[#allocation97_spill] sm:$0xff] %v8648_v54  ;;  %2701 = vmatmul.mubr.f32.vlgmr.msra.gmra.mrb[0].mxu0 %v10411_v43  ;;  %v8672_v43 = vsub.f32 %v7854_v55, %v10414_v50  ;;  %v10419_v55 = vand.u32 4294901760, %v7859_v56  ;;  %v10425_v47 = vand.u32 4294901760, %v8301_v39 }
 0x1f2   : > { %10408 = vst [vmem:[#allocation96_spill] sm:$0xff] %v8643_v13  ;;  %v8663_v58 = vsub.f32 %v8276_v27, %v10413_v22  ;;  %2723 = vmatpush1.msra.mxu0 %v8419_v5  ;;  %2706 = vmatprep.mubr.f32.mxu0 %v10353_v19  ;;  %v8676_v10 = vpack.c.bf16 %v8648_v54, %v8643_v13  ;;  %v3087_v27 = vand.u32 4294901760, %v8624_v61  ;;  %v10421_v61 = vand.u32 4294901760, %v7883_v63 }
 0x1f3   : > { %10415 = vst [vmem:[#allocation98_spill] sm:$0xff] %v8672_v43  ;;  %2802 = vmatprep.subr.mxu0 %v8403_v33  ;;  %v8683_v22 = vsub.f32 %v8560_v44, %v10417_v46  ;;  %7015 = vmatpush1.bf16.msra.mxu1 %v7981_v26  ;;  %v8694_v50 = vsub.f32 %v7859_v56, %v10419_v55  ;;  %v10423_v46 = vand.u32 4294901760, %v8296_v24  ;;  %v10427_v26 = vld [vmem:[#allocation23_spill] sm:$0xff]  ;;  %v10428_v56 = vand.u32 4294901760, %v8389_v52 }
 0x1f4   : > { %10416 = vst [vmem:[#allocation99_spill] sm:$0xff] %v8676_v10  ;;  %v8688_v41 = vpack.c.bf16 %v8663_v58, %v8658_v17  ;;  %v8699_v59 = vsub.f32 %v7883_v63, %v10421_v61  ;;  %v8709_v5 = vsub.f32 %v8301_v39, %v10425_v47  ;;  %7017 = vmatprep.subr.bf16.mxu1 %v10427_v26  ;;  %v10429_v55 = vand.u32 4294901760, %v8592_v4  ;;  %v10430_v61 = vld [vmem:[#allocation7_spill] sm:$0xff]  ;;  %v10436_v39 = vld [vmem:[#allocation56_spill] sm:$0xff] }
 0x1f5   : > { %10420 = vst [vmem:[#allocation101_spill] sm:$0xff] %v8694_v50  ;;  %v8704_v12 = vsub.f32 %v8296_v24, %v10423_v46  ;;  %2710 = vmatmul.mubr.f32.gmra.mrb[4].mxu0 %v10428_v56  ;;  %v10431_v20 = vand.u32 4294901760, %v10430_v61  ;;  %v10433_v24 = vld [vmem:[#allocation55_spill] sm:$0xff]  ;;  %v10437_v47 = vand.u32 4294901760, %v10436_v39  ;;  %v10439_v52 = vand.u32 4294901760, %v8615_v48 }
 0x1f6   : > { %10418 = vst [vmem:[#allocation100_spill] sm:$0xff] %v8688_v41  ;;  %10422 = vst [vmem:[#allocation102_spill] sm:$0xff] %v8699_v59  ;;  %v3104_v63 = vsub.f32 %v8592_v4, %v10429_v55  ;;  %v10434_v46 = vand.u32 4294901760, %v10433_v24  ;;  %2786 = vmatprep.mubr.f32.mxu0 %v10353_v19  ;;  %v10440_v55 = vld [vmem:[#allocation8_spill] sm:$0xff]  ;;  %v10459_v4 = vld [vmem:[#allocation62_spill] sm:$0xff] }
 0x1f7   : > { %10424 = vst [vmem:[#allocation103_spill] sm:$0xff] %v8704_v12  ;;  %10426 = vst [vmem:[#allocation104_spill] sm:$0xff] %v8709_v5  ;;  %v8720_v41 = vsub.f32 %v10430_v61, %v10431_v20  ;;  %v8730_v26 = vsub.f32 %v10436_v39, %v10437_v47  ;;  %v3098_v56 = vsub.f32 %v8615_v48, %v10439_v52  ;;  %v10441_v53 = vand.u32 4294901760, %v10440_v55  ;;  %v10443_v61 = vld [vmem:[#allocation9_spill] sm:$0xff] }
 0x1f8   : > { %v8725_v10 = vsub.f32 %v10433_v24, %v10434_v46  ;;  %v10444_v32 = vand.u32 4294901760, %v10443_v61  ;;  %v8748_v46 = vpack.c.bf16 %v8709_v5, %v8704_v12  ;;  %v3093_v39 = vand.u32 4294901760, %v8683_v22 }
 0x1f9   : > { %10432 = vst [vmem:[#allocation7_spill] sm:$0xff] %v8720_v41  ;;  %10438 = vst [vmem:[#allocation56_spill] sm:$0xff] %v8730_v26  ;;  %v8739_v20 = vsub.f32 %v10440_v55, %v10441_v53  ;;  %v10446_v47 = vand.u32 4294901760, %v8630_v42  ;;  %v10448_v55 = vld [vmem:[#allocation28_spill] sm:$0xff]  ;;  %v10453_v48 = vand.u32 4294901760, %v10452_v21  ;;  %2788 = vmatmul.mubr.f32.vlgmr.msra.gmra.mrb[0].mxu0 %v8379_v51 }
 0x1fa   : > { %10435 = vst [vmem:[#allocation55_spill] sm:$0xff] %v8725_v10  ;;  %v8744_v24 = vsub.f32 %v10443_v61, %v10444_v32  ;;  %10445 = vst [vmem:[#allocation9_spill] sm:$0xff] %v8748_v46  ;;  %v8757_v53 = vpack.c.bf16 %v8730_v26, %v8725_v10  ;;  %7019 = vmatpush1.bf16.msra.mxu1 %v10448_v55  ;;  %v10450_v46 = vand.u32 4294901760, %v10449_v6  ;;  %v10456_v32 = vld [vmem:[#allocation61_spill] sm:$0xff]  ;;  %2804 = vmatpush1.msra.mxu0 %v8400_v2 }
 0x1fb   : > { %10442 = vst [vmem:[#allocation8_spill] sm:$0xff] %v8739_v20  ;;  %v3110_v52 = vsub.f32 %v8630_v42, %v10446_v47  ;;  %v8770_v47 = vsub.f32 %v10452_v21, %v10453_v48  ;;  %7021 = vmatprep.subr.bf16.mxu1 %v10455_v35  ;;  %v10457_v42 = vand.u32 4294901760, %v10456_v32  ;;  %2793 = vmatprep.mubr.f32.mxu0 %v10353_v19  ;;  %v10467_v21 = vld [vmem:[#allocation34_spill] sm:$0xff] }
 0x1fc   : > { %10447 = vst [vmem:[#allocation105_spill] sm:$0xff] %v8757_v53  ;;  %v8765_v22 = vsub.f32 %v10449_v6, %v10450_v46  ;;  %v3105_v53 = vand.u32 4294901760, %v3104_v63  ;;  %v10460_v6 = vand.u32 4294901760, %v10459_v4  ;;  %v10462_v63 = vld [vmem:[#allocation12_spill] sm:$0xff]  ;;  %6677 = vmatprep.subr.bf16.mxu0 %v8605_v7 }
 0x1fd   : > { %10454 = vst [vmem:[#allocation60_spill] sm:$0xff] %v8770_v47  ;;  %v8778_v61 = vsub.f32 %v10456_v32, %v10457_v42  ;;  %v10463_v55 = vand.u32 4294901760, %v10462_v63  ;;  %v3111_v32 = vand.u32 4294901760, %v3110_v52  ;;  %2795 = vmatmul.mubr.f32.gmra.mrb[4].mxu0 %v8385_v34 }
 0x1fe   : > { %10451 = vst [vmem:[#allocation59_spill] sm:$0xff] %v8765_v22  ;;  %v8783_v46 = vsub.f32 %v10459_v4, %v10460_v6  ;;  %v8796_v42 = vpack.c.bf16 %v8770_v47, %v8765_v22  ;;  %v3099_v4 = vand.u32 4294901760, %v3098_v56  ;;  %v10465_v6 = vand.u32 4294901760, %v8672_v43  ;;  %7023 = vmatpush1.bf16.msra.mxu1 %v10467_v21  ;;  %v10470_v56 = vld [vmem:[#allocation13_spill] sm:$0xff]  ;;  %2867 = vmatprep.mubr.f32.mxu0 %v10353_v19 }
 0x1ff   : > { %10458 = vst [vmem:[#allocation61_spill] sm:$0xff] %v8778_v61  ;;  %v8792_v35 = vsub.f32 %v10462_v63, %v10463_v55  ;;  %v10468_v55 = vand.u32 4294901760, %v8694_v50  ;;  %v10471_v52 = vand.u32 4294901760, %v10470_v56  ;;  %v10476_v21 = vand.u32 4294901760, %v8587_v60 }
 0x200   : > { %10461 = vst [vmem:[#allocation62_spill] sm:$0xff] %v8783_v46  ;;  %10464 = vst [vmem:[#allocation12_spill] sm:$0xff] %v8796_v42  ;;  %v3116_v44 = vsub.f32 %v8672_v43, %v10465_v6  ;;  %v8804_v48 = vpack.c.bf16 %v8783_v46, %v8778_v61  ;;  %v10469_v42 = vand.u32 4294901760, %v8699_v59  ;;  %v10472_v6 = vld [vmem:[#allocation14_spill] sm:$0xff]  ;;  %v10484_v60 = vand.u32 4294901760, %v8720_v41 }
 0x201   : > { %v3128_v63 = vsub.f32 %v8694_v50, %v10468_v55  ;;  %v8816_v40 = vsub.f32 %v10470_v56, %v10471_v52  ;;  %v10473_v43 = vand.u32 4294901760, %v10472_v6  ;;  %v10475_v55 = vand.u32 4294901760, %v8570_v38  ;;  %v10480_v52 = vld [vmem:[#allocation18_spill] sm:$0xff]  ;;  %2869 = vmatmul.mubr.f32.vlgmr.msra.gmra.mrb[0].mxu0 %v8379_v51 }
 0x202   : > { %10466 = vst [vmem:[#allocation106_spill] sm:$0xff] %v8804_v48  ;;  %v3122_v31 = vsub.f32 %v8699_v59, %v10469_v42  ;;  %v10474_v48 = vld [vmem:[#allocation35_spill] sm:$0xff]  ;;  %v10481_v2 = vand.u32 4294901760, %v10480_v52  ;;  %v3134_v38 = vsub.f32 %v8720_v41, %v10484_v60  ;;  %v8863_v16 = vpack.c.bf16 %v3111_v32, %v3099_v4  ;;  %v10491_v60 = vld [vmem:[#allocation38_spill] sm:$0xff]  ;;  %6679 = vmatpush1.bf16.msra.mxu0 %v8637_v36 }
 0x203   : > { %v8821_v15 = vsub.f32 %v10472_v6, %v10473_v43  ;;  %7025 = vmatprep.subr.bf16.mxu1 %v10474_v48  ;;  %v8829_v50 = vpack.c.bf16 %v10476_v21, %v10475_v55  ;;  %v10478_v42 = vld [vmem:[#allocation15_spill] sm:$0xff]  ;;  %v10485_v21 = vand.u32 4294901760, %v8739_v20  ;;  %v10486_v55 = vand.u32 4294901760, %v8744_v24  ;;  %2874 = vmatprep.mubr.f32.mxu0 %v10353_v19  ;;  %v10507_v36 = vld [vmem:[#allocation26_spill] sm:$0xff] }
 0x204   : > { %v10479_v59 = vand.u32 4294901760, %v10478_v42  ;;  %v8839_v43 = vsub.f32 %v10480_v52, %v10481_v2  ;;  %v10482_v6 = vld [vmem:[#allocation19_spill] sm:$0xff]  ;;  %v10487_v52 = vand.u32 4294901760, %v8610_v11  ;;  %10490 = vst [vmem:[#allocation18_spill] sm:$0xff] %v8863_v16  ;;  %v3117_v0 = vand.u32 4294901760, %v3116_v44  ;;  %7027 = vmatpush1.bf16.msra.mxu1 %v10491_v60 }
 0x205   : > { %10477 = vst [vmem:[#allocation13_spill] sm:$0xff] %v8829_v50  ;;  %v10483_v48 = vand.u32 4294901760, %v10482_v6  ;;  %v3152_v2 = vsub.f32 %v8744_v24, %v10486_v55  ;;  %v3129_v41 = vand.u32 4294901760, %v3128_v63  ;;  %v3123_v8 = vand.u32 4294901760, %v3122_v31  ;;  %v10492_v55 = vld [vmem:[#allocation39_spill] sm:$0xff]  ;;  %6681 = vmatprep.subr.bf16.mxu0 %v8829_v50  ;;  %2876 = vmatmul.mubr.f32.gmra.mrb[4].mxu0 %v8385_v34 }
 0x206   : > { %v8834_v56 = vsub.f32 %v10478_v42, %v10479_v59  ;;  %v3140_v59 = vsub.f32 %v8739_v20, %v10485_v21  ;;  %v10155_v42 = vand.u32 4294901760, %v8792_v35  ;;  %v10159_v21 = vand.u32 4294901760, %v8816_v40  ;;  %7029 = vmatprep.subr.bf16.mxu1 %v10492_v55  ;;  %v10502_v20 = vld [vmem:[#allocation25_spill] sm:$0xff]  ;;  %v10510_v19 = vld [vmem:[#allocation43_spill] sm:$0xff]  ;;  %3426 = vmatprep.mubr.f32.mxu0 %v8403_v33  ;;  %v10518_v55 = vld [vmem:[#allocation46_spill] sm:$0xff] }
 0x207   : > { %v8844_v3 = vsub.f32 %v10482_v6, %v10483_v48  ;;  %v8859_v48 = vpack.c.bf16 %v3087_v27, %v10487_v52  ;;  %v8861_v6 = vpack.c.bf16 %v3105_v53, %v3093_v39  ;;  %v10493_v53 = vld [vmem:[#allocation20_spill] sm:$0xff]  ;;  %v3135_v31 = vand.u32 4294901760, %v3134_v38  ;;  %v10496_v52 = vld [vmem:[#allocation21_spill] sm:$0xff] }
 0x208   : > { %v10494_v44 = vand.u32 4294901760, %v10493_v53  ;;  %v3141_v32 = vand.u32 4294901760, %v3140_v59  ;;  %v3153_v63 = vand.u32 4294901760, %v3152_v2  ;;  %v3146_v51 = vsub.f32 %v8792_v35, %v10155_v42  ;;  %v10504_v2 = vld [vmem:[#allocation42_spill] sm:$0xff] }
 0x209   : > { %10488 = vst [vmem:[#allocation14_spill] sm:$0xff] %v8859_v48  ;;  %10489 = vst [vmem:[#allocation15_spill] sm:$0xff] %v8861_v6  ;;  %v10497_v39 = vand.u32 4294901760, %v10496_v52  ;;  %v10503_v38 = vand.u32 4294901760, %v10502_v20  ;;  %7031 = vmatpush1.bf16.msra.mxu1 %v10504_v2  ;;  %v8900_v42 = vpack.c.bf16 %v3129_v41, %v3117_v0  ;;  %v3158_v50 = vsub.f32 %v8816_v40, %v10159_v21 }
 0x20a   : > { %v8876_v4 = vsub.f32 %v10493_v53, %v10494_v44  ;;  %v10499_v53 = vld [vmem:[#allocation24_spill] sm:$0xff]  ;;  %7033 = vmatprep.subr.bf16.mxu1 %v10510_v19  ;;  %v10511_v0 = vand.u32 4294901760, %v8834_v56  ;;  %v10513_v21 = vand.u32 4294901760, %v8844_v3  ;;  %6683 = vmatpush1.bf16.msra.mxu0 %v8859_v48  ;;  %v8929_v34 = vpack.c.bf16 %v3153_v63, %v3141_v32  ;;  %v10519_v63 = vld [vmem:[#allocation30_spill] sm:$0xff] }
 0x20b   : > { %v8887_v27 = vsub.f32 %v10496_v52, %v10497_v39  ;;  %v10500_v44 = vand.u32 4294901760, %v10499_v53  ;;  %v8897_v59 = vsub.f32 %v10502_v20, %v10503_v38  ;;  %10505 = vst [vmem:[#allocation24_spill] sm:$0xff] %v8900_v42  ;;  %v10506_v39 = vand.u32 4294901760, %v8821_v15  ;;  %6685 = vmatprep.subr.bf16.mxu0 %v8861_v6 }
 0x20c   : > { %10495 = vst [vmem:[#allocation19_spill] sm:$0xff] %v8876_v4  ;;  %v3176_v41 = vsub.f32 %v8834_v56, %v10511_v0  ;;  %v10512_v20 = vand.u32 4294901760, %v8839_v43  ;;  %10515 = vst [vmem:[#allocation107_spill] sm:$0xff] %v8929_v34  ;;  %v10520_v33 = vand.u32 4294901760, %v10519_v63  ;;  %v10522_v2 = vand.u32 4294901760, %v8876_v4 }
 0x20d   : > { %10498 = vst [vmem:[#allocation20_spill] sm:$0xff] %v8887_v27  ;;  %v8892_v11 = vsub.f32 %v10499_v53, %v10500_v44  ;;  %v3164_v52 = vsub.f32 %v8821_v15, %v10506_v39  ;;  %v10508_v53 = vand.u32 4294901760, %v10507_v36  ;;  %v3182_v39 = vsub.f32 %v8844_v3, %v10513_v21  ;;  %7035 = vmatpush1.bf16.msra.mxu1 %v10518_v55 }
 0x20e   : > { %v3170_v38 = vsub.f32 %v8839_v43, %v10512_v20  ;;  %v3147_v20 = vand.u32 4294901760, %v3146_v51  ;;  %v3177_v51 = vand.u32 4294901760, %v3176_v41  ;;  %v3188_v48 = vsub.f32 %v8876_v4, %v10522_v2  ;;  %6687 = vmatpush1.bf16.msra.mxu0 %v8863_v16  ;;  %v10529_v41 = vld [vmem:[#allocation33_spill] sm:$0xff] }
 0x20f   : > { %10501 = vst [vmem:[#allocation21_spill] sm:$0xff] %v8892_v11  ;;  %v8911_v44 = vsub.f32 %v10507_v36, %v10508_v53  ;;  %v8927_v36 = vpack.c.bf16 %v3135_v31, %v3123_v8  ;;  %v10516_v53 = vld [vmem:[#allocation27_spill] sm:$0xff]  ;;  %v3159_v8 = vand.u32 4294901760, %v3158_v50  ;;  %v3165_v31 = vand.u32 4294901760, %v3164_v52  ;;  %6689 = vmatprep.subr.bf16.mxu0 %v8900_v42  ;;  %v10537_v4 = vld [vmem:[#allocation49_spill] sm:$0xff] }
 0x210   : > { %v10517_v0 = vand.u32 4294901760, %v10516_v53  ;;  %v3171_v6 = vand.u32 4294901760, %v3170_v38  ;;  %v3183_v21 = vand.u32 4294901760, %v3182_v39  ;;  %v10523_v52 = vld [vmem:[#allocation31_spill] sm:$0xff]  ;;  %v10530_v38 = vand.u32 4294901760, %v10529_v41 }
 0x211   : > { %10509 = vst [vmem:[#allocation25_spill] sm:$0xff] %v8911_v44  ;;  %10514 = vst [vmem:[#allocation26_spill] sm:$0xff] %v8927_v36  ;;  %v10524_v32 = vand.u32 4294901760, %v10523_v52  ;;  %v10531_v2 = vand.u32 4294901760, %v8887_v27  ;;  %v10532_v16 = vand.u32 4294901760, %v8892_v11  ;;  %v8979_v60 = vpack.c.bf16 %v3159_v8, %v3147_v20 }
 0x212   : > { %v8934_v19 = vsub.f32 %v10516_v53, %v10517_v0  ;;  %v8945_v53 = vsub.f32 %v10519_v63, %v10520_v33  ;;  %v10521_v0 = vld [vmem:[#allocation47_spill] sm:$0xff]  ;;  %v10526_v33 = vld [vmem:[#allocation32_spill] sm:$0xff]  ;;  %v8966_v39 = vsub.f32 %v10529_v41, %v10530_v38  ;;  %v10536_v41 = vand.u32 4294901760, %v8911_v44  ;;  %6691 = vmatpush1.bf16.msra.mxu0 %v8927_v36 }
 0x213   : > { %7037 = vmatprep.subr.bf16.mxu1 %v10521_v0  ;;  %v8956_v55 = vsub.f32 %v10523_v52, %v10524_v32  ;;  %v10527_v63 = vand.u32 4294901760, %v10526_v33  ;;  %v3200_v50 = vsub.f32 %v8887_v27, %v10531_v2  ;;  %v3194_v32 = vsub.f32 %v8892_v11, %v10532_v16  ;;  %10535 = vst [vmem:[#allocation31_spill] sm:$0xff] %v8979_v60  ;;  %v10540_v16 = vld [vmem:[#allocation36_spill] sm:$0xff] }
 0x214   : > { %v10533_v52 = vand.u32 4294901760, %v8897_v59  ;;  %v3212_v38 = vsub.f32 %v8911_v44, %v10536_v41  ;;  %v8986_v2 = vpack.c.bf16 %v3177_v51, %v3165_v31  ;;  %v8988_v27 = vpack.c.bf16 %v3183_v21, %v3171_v6  ;;  %6693 = vmatprep.subr.bf16.mxu0 %v8929_v34  ;;  %v10548_v6 = vld [vmem:[#allocation51_spill] sm:$0xff] }
 0x215   : > { %10525 = vst [vmem:[#allocation27_spill] sm:$0xff] %v8956_v55  ;;  %v8961_v0 = vsub.f32 %v10526_v33, %v10527_v63  ;;  %v10534_v63 = vld [vmem:[#allocation48_spill] sm:$0xff]  ;;  %v10541_v11 = vand.u32 4294901760, %v10540_v16  ;;  %v10545_v41 = vand.u32 4294901760, %v8934_v19  ;;  %v3201_v51 = vand.u32 4294901760, %v3200_v50 }
 0x216   : > { %v3206_v33 = vsub.f32 %v8897_v59, %v10533_v52  ;;  %7039 = vmatpush1.bf16.msra.mxu1 %v10534_v63  ;;  %10538 = vst [vmem:[#allocation32_spill] sm:$0xff] %v8986_v2  ;;  %10539 = vst [vmem:[#allocation33_spill] sm:$0xff] %v8988_v27  ;;  %v10542_v63 = vld [vmem:[#allocation37_spill] sm:$0xff]  ;;  %v10547_v36 = vand.u32 4294901760, %v8945_v53  ;;  %v10549_v50 = vld [vmem:[#allocation40_spill] sm:$0xff]  ;;  %6695 = vmatpush1.bf16.msra.mxu0 %v8979_v60  ;;  %v10553_v31 = vand.u32 4294901760, %v8956_v55 }
 0x217   : > { %10528 = vst [vmem:[#allocation30_spill] sm:$0xff] %v8961_v0  ;;  %7041 = vmatprep.subr.bf16.mxu1 %v10537_v4  ;;  %v8993_v52 = vsub.f32 %v10540_v16, %v10541_v11  ;;  %v10543_v20 = vand.u32 4294901760, %v10542_v63  ;;  %v3224_v42 = vsub.f32 %v8934_v19, %v10545_v41  ;;  %v3189_v11 = vand.u32 4294901760, %v3188_v48  ;;  %6697 = vmatprep.subr.bf16.mxu0 %v8986_v2 }
 0x218   : > { %v3195_v16 = vand.u32 4294901760, %v3194_v32  ;;  %v3207_v4 = vand.u32 4294901760, %v3206_v33  ;;  %v3218_v44 = vsub.f32 %v8945_v53, %v10547_v36  ;;  %v10550_v32 = vand.u32 4294901760, %v10549_v50 }
 0x219   : > { %v8998_v8 = vsub.f32 %v10542_v63, %v10543_v20  ;;  %v10546_v63 = vld [vmem:[#allocation50_spill] sm:$0xff]  ;;  %v3213_v20 = vand.u32 4294901760, %v3212_v38  ;;  %v10551_v38 = vld [vmem:[#allocation41_spill] sm:$0xff]  ;;  %v3225_v36 = vand.u32 4294901760, %v3224_v42  ;;  %v3230_v41 = vsub.f32 %v8956_v55, %v10553_v31 }
 0x21a   : > { %7043 = vmatpush1.bf16.msra.mxu1 %v10546_v63  ;;  %v9020_v33 = vsub.f32 %v10549_v50, %v10550_v32  ;;  %v10552_v34 = vand.u32 4294901760, %v10551_v38  ;;  %v10554_v21 = vand.u32 4294901760, %v8961_v0  ;;  %v9038_v32 = vpack.c.bf16 %v3201_v51, %v3189_v11  ;;  %6699 = vmatpush1.bf16.msra.mxu0 %v8988_v27 }
 0x21b   : > { %10544 = vst [vmem:[#allocation36_spill] sm:$0xff] %v8998_v8  ;;  %7045 = vmatprep.subr.bf16.mxu1 %v10548_v6  ;;  %v10555_v6 = vand.u32 4294901760, %v8966_v39  ;;  %v3219_v42 = vand.u32 4294901760, %v3218_v44  ;;  %v10559_v60 = vand.u32 4294901760, %v8432_v49  ;;  %v10560_v55 = vand.u32 4294901760, %v8437_v14  ;;  %v10567_v44 = vld [vmem:[#allocation45_spill] sm:$0xff] }
 0x21c   : > { %v9025_v63 = vsub.f32 %v10551_v38, %v10552_v34  ;;  %v3236_v48 = vsub.f32 %v8961_v0, %v10554_v21  ;;  %10556 = vst [vmem:[#allocation37_spill] sm:$0xff] %v9038_v32  ;;  %v10557_v34 = vld [vmem:[#allocation52_spill] sm:$0xff]  ;;  %v9041_v38 = vpack.c.bf16 %v3207_v4, %v3195_v16  ;;  %v10561_v0 = vld [vmem:[#allocation53_spill] sm:$0xff]  ;;  %v10563_v51 = vand.u32 4294901760, %v8998_v8  ;;  %6701 = vmatprep.subr.bf16.mxu0 %v9038_v32 }
 0x21d   : > { %v3248_v50 = vsub.f32 %v8966_v39, %v10555_v6  ;;  %v3242_v31 = vsub.f32 %v8432_v49, %v10559_v60  ;;  %v3254_v21 = vsub.f32 %v8437_v14, %v10560_v55  ;;  %v10562_v6 = vand.u32 4294901760, %v8993_v52  ;;  %v10570_v49 = vld [vmem:[#allocation57_spill] sm:$0xff] }
 0x21e   : > { %7047 = vmatpush1.bf16.msra.mxu1 %v10557_v34  ;;  %10558 = vst [vmem:[#allocation40_spill] sm:$0xff] %v9041_v38  ;;  %v3272_v4 = vsub.f32 %v8998_v8, %v10563_v51  ;;  %v9059_v60 = vpack.c.bf16 %v3225_v36, %v3213_v20  ;;  %v3231_v2 = vand.u32 4294901760, %v3230_v41  ;;  %v3237_v55 = vand.u32 4294901760, %v3236_v48  ;;  %v10569_v20 = vld [vmem:[#allocation54_spill] sm:$0xff]  ;;  %6703 = vmatpush1.bf16.msra.mxu0 %v9041_v38 }
 0x21f   : > { %7049 = vmatprep.subr.bf16.mxu1 %v10561_v0  ;;  %v3260_v11 = vsub.f32 %v8993_v52, %v10562_v6  ;;  %v3249_v14 = vand.u32 4294901760, %v3248_v50  ;;  %v10565_v0 = vld [vmem:[#allocation44_spill] sm:$0xff]  ;;  %v10568_v16 = vand.u32 4294901760, %v10567_v44  ;;  %v3243_v41 = vand.u32 4294901760, %v3242_v31  ;;  %v10577_v36 = vld [vmem:[#allocation58_spill] sm:$0xff] }
 0x220   : > { %10564 = vst [vmem:[#allocation41_spill] sm:$0xff] %v9059_v60  ;;  %v10566_v34 = vand.u32 4294901760, %v10565_v0  ;;  %v3255_v48 = vand.u32 4294901760, %v3254_v21  ;;  %v3273_v32 = vand.u32 4294901760, %v3272_v4  ;;  %v10572_v8 = vand.u32 4294901760, %v9025_v63  ;;  %6705 = vmatprep.subr.bf16.mxu0 %v9059_v60  ;;  %v10580_v60 = vld [vmem:[#allocation63_spill] sm:$0xff] }
 0x221   : > { %v9072_v27 = vsub.f32 %v10567_v44, %v10568_v16  ;;  %v3261_v6 = vand.u32 4294901760, %v3260_v11  ;;  %v9085_v31 = vpack.c.bf16 %v3231_v2, %v3219_v42  ;;  %v9087_v21 = vpack.c.bf16 %v3249_v14, %v3237_v55 }
 0x222   : > { %v9067_v51 = vsub.f32 %v10565_v0, %v10566_v34  ;;  %7051 = vmatpush1.bf16.msra.mxu1 %v10569_v20  ;;  %v10571_v0 = vand.u32 4294901760, %v9020_v33  ;;  %v3278_v44 = vsub.f32 %v9025_v63, %v10572_v8  ;;  %v10575_v16 = vand.u32 4294901760, %v8482_v62 }
 0x223   : > { %7053 = vmatprep.subr.bf16.mxu1 %v10570_v49  ;;  %10573 = vst [vmem:[#allocation44_spill] sm:$0xff] %v9085_v31  ;;  %10574 = vst [vmem:[#allocation45_spill] sm:$0xff] %v9087_v21  ;;  %v10576_v4 = vand.u32 4294901760, %v8487_v9  ;;  %v10578_v2 = vand.u32 4294901760, %v8499_v25  ;;  %v10579_v42 = vand.u32 4294901760, %v8504_v23  ;;  %v9108_v38 = vpack.c.bf16 %v3273_v32, %v3261_v6  ;;  %6707 = vmatpush1.bf16.msra.mxu0 %v9085_v31 }
 0x224   : > { %v3266_v34 = vsub.f32 %v9020_v33, %v10571_v0  ;;  %v3284_v11 = vsub.f32 %v8482_v62, %v10575_v16  ;;  %v9106_v16 = vpack.c.bf16 %v3255_v48, %v3243_v41  ;;  %v3279_v50 = vand.u32 4294901760, %v3278_v44  ;;  %6709 = vmatprep.subr.bf16.mxu0 %v9087_v21 }
 0x225   : > { %v3296_v0 = vsub.f32 %v8487_v9, %v10576_v4  ;;  %v3290_v14 = vsub.f32 %v8499_v25, %v10578_v2  ;;  %v3302_v55 = vsub.f32 %v8504_v23, %v10579_v42  ;;  %10582 = vst [vmem:[#allocation108_spill] sm:$0xff] %v9108_v38  ;;  %v10194_v8 = vand.u32 4294901760, %v8545_v1 }
 0x226   : > { %7055 = vmatpush1.bf16.msra.mxu1 %v10577_v36  ;;  %10581 = vst [vmem:[#allocation54_spill] sm:$0xff] %v9106_v16  ;;  %v3267_v4 = vand.u32 4294901760, %v3266_v34  ;;  %v3285_v42 = vand.u32 4294901760, %v3284_v11  ;;  %v10583_v41 = vand.u32 4294901760, %v9067_v51  ;;  %v10584_v6 = vand.u32 4294901760, %v9072_v27  ;;  %v10585_v34 = vld [vmem:[#allocation64_spill] sm:$0xff] }
 0x227   : > { %7057 = vmatprep.subr.bf16.mxu1 %v10580_v60  ;;  %v3297_v23 = vand.u32 4294901760, %v3296_v0  ;;  %v3291_v44 = vand.u32 4294901760, %v3290_v14  ;;  %v3303_v9 = vand.u32 4294901760, %v3302_v55  ;;  %6711 = vmatpush1.bf16.msra.mxu0 %v9106_v16  ;;  %v10587_v14 = vand.u32 4294901760, %v8550_v57 }
 0x228   : > { %v3308_v32 = vsub.f32 %v9067_v51, %v10583_v41  ;;  %v3320_v48 = vsub.f32 %v9072_v27, %v10584_v6  ;;  %v9126_v11 = vpack.c.bf16 %v3279_v50, %v3267_v4  ;;  %v3314_v6 = vsub.f32 %v8545_v1, %v10194_v8  ;;  %6713 = vmatprep.subr.bf16.mxu0 %v9108_v38 }
 0x229   : > { %v3326_v55 = vsub.f32 %v8550_v57, %v10587_v14  ;;  %v10588_v25 = vand.u32 4294901760, %v8575_v29  ;;  %v10589_v50 = vand.u32 4294901760, %v8580_v30  ;;  %v9144_v41 = vpack.c.bf16 %v3297_v23, %v3285_v42 }
 0x22a   : > { %7059 = vmatpush1.bf16.msra.mxu1 %v10585_v34  ;;  %10586 = vst [vmem:[#allocation64_spill] sm:$0xff] %v9126_v11  ;;  %v3309_v0 = vand.u32 4294901760, %v3308_v32  ;;  %v3321_v2 = vand.u32 4294901760, %v3320_v48  ;;  %v9146_v16 = vpack.c.bf16 %v3303_v9, %v3291_v44  ;;  %v10592_v8 = vand.u32 4294901760, %v8597_v37 }
 0x22b   : > { %7061 = vmatprep.subr.bf16.mxu1 %v8605_v7  ;;  %v3332_v7 = vsub.f32 %v8575_v29, %v10588_v25  ;;  %v3344_v4 = vsub.f32 %v8580_v30, %v10589_v50  ;;  %10590 = vst [vmem:[#allocation109_spill] sm:$0xff] %v9144_v41  ;;  %v10593_v21 = vand.u32 4294901760, %v8602_v45  ;;  %v10594_v31 = vand.u32 4294901760, %v8643_v13  ;;  %6715 = vmatpush1.bf16.msra.mxu0 %v9126_v11 }
 0x22c   : > { %10591 = vst [vmem:[#allocation110_spill] sm:$0xff] %v9146_v16  ;;  %v3338_v14 = vsub.f32 %v8597_v37, %v10592_v8  ;;  %v10595_v38 = vand.u32 4294901760, %v8648_v54  ;;  %v3315_v32 = vand.u32 4294901760, %v3314_v6  ;;  %v3327_v8 = vand.u32 4294901760, %v3326_v55  ;;  %6717 = vmatprep.subr.bf16.mxu0 %v9144_v41  ;;  %v10642_v41 = vld [vmem:[#allocation25_spill] sm:$0xff] }
 0x22d   : > { %v3350_v25 = vsub.f32 %v8602_v45, %v10593_v21  ;;  %v3356_v50 = vsub.f32 %v8643_v13, %v10594_v31  ;;  %v3333_v48 = vand.u32 4294901760, %v3332_v7  ;;  %v3345_v44 = vand.u32 4294901760, %v3344_v4 }
 0x22e   : > { %v3368_v23 = vsub.f32 %v8648_v54, %v10595_v38  ;;  %v9164_v21 = vpack.c.bf16 %v3321_v2, %v3309_v0  ;;  %v10203_v31 = vand.u32 4294901760, %v8704_v12  ;;  %v10202_v13 = vand.u32 4294901760, %v8709_v5 }
 0x22f   : > { %v3339_v45 = vand.u32 4294901760, %v3338_v14  ;;  %v3351_v38 = vand.u32 4294901760, %v3350_v25  ;;  %v3357_v54 = vand.u32 4294901760, %v3356_v50  ;;  %v10597_v9 = vand.u32 4294901760, %v8658_v17  ;;  %6719 = vmatpush1.bf16.msra.mxu0 %v9146_v16  ;;  %v10640_v16 = vld [vmem:[#allocation21_spill] sm:$0xff] }
 0x230   : > { %10596 = vst [vmem:[#allocation111_spill] sm:$0xff] %v9164_v21  ;;  %v3369_v42 = vand.u32 4294901760, %v3368_v23  ;;  %v10598_v6 = vand.u32 4294901760, %v8663_v58  ;;  %v9175_v2 = vpack.c.bf16 %v3327_v8, %v3315_v32  ;;  %v9177_v0 = vpack.c.bf16 %v3345_v44, %v3333_v48  ;;  %6721 = vmatprep.subr.bf16.mxu0 %v9164_v21 }
 0x231   : > { %v3362_v11 = vsub.f32 %v8658_v17, %v10597_v9  ;;  %v10205_v7 = vand.u32 4294901760, %v8725_v10  ;;  %v10204_v4 = vand.u32 4294901760, %v8730_v26  ;;  %v3380_v14 = vsub.f32 %v8704_v12, %v10203_v31  ;;  %v10663_v12 = vld [vmem:[#allocation106_spill] sm:$0xff] }
 0x232   : > { %v3374_v55 = vsub.f32 %v8663_v58, %v10598_v6  ;;  %10599 = vst [vmem:[#allocation112_spill] sm:$0xff] %v9175_v2  ;;  %10600 = vst [vmem:[#allocation113_spill] sm:$0xff] %v9177_v0  ;;  %v3392_v25 = vsub.f32 %v8709_v5, %v10202_v13  ;;  %v10206_v50 = vand.u32 4294901760, %v8765_v22  ;;  %v10207_v23 = vand.u32 4294901760, %v8770_v47  ;;  %v10662_v5 = vld [vmem:[#allocation12_spill] sm:$0xff] }
 0x233   : > { %v9190_v9 = vpack.c.bf16 %v3351_v38, %v3339_v45  ;;  %v9192_v32 = vpack.c.bf16 %v3369_v42, %v3357_v54  ;;  %v3363_v8 = vand.u32 4294901760, %v3362_v11  ;;  %6723 = vmatpush1.bf16.msra.mxu0 %v9175_v2  ;;  %v3386_v44 = vsub.f32 %v8725_v10, %v10205_v7  ;;  %v10637_v2 = vld [vmem:[#allocation19_spill] sm:$0xff] }
 0x234   : > { %v3375_v48 = vand.u32 4294901760, %v3374_v55  ;;  %v3398_v6 = vsub.f32 %v8730_v26, %v10204_v4  ;;  %v10208_v13 = vand.u32 4294901760, %v8778_v61  ;;  %v10209_v31 = vand.u32 4294901760, %v8783_v46  ;;  %6725 = vmatprep.subr.bf16.mxu0 %v9177_v0  ;;  %v10632_v0 = vld [vmem:[#allocation8_spill] sm:$0xff]  ;;  %v10657_v26 = vld [vmem:[#allocation94_spill] sm:$0xff]  ;;  %v10658_v10 = vld [vmem:[#allocation99_spill] sm:$0xff] }
 0x235   : > { %10601 = vst [vmem:[#allocation114_spill] sm:$0xff] %v9190_v9  ;;  %10602 = vst [vmem:[#allocation115_spill] sm:$0xff] %v9192_v32  ;;  %v3381_v45 = vand.u32 4294901760, %v3380_v14  ;;  %v3393_v54 = vand.u32 4294901760, %v3392_v25  ;;  %v3404_v11 = vsub.f32 %v8765_v22, %v10206_v50  ;;  %v3416_v42 = vsub.f32 %v8770_v47, %v10207_v23  ;;  %v10650_v47 = vld [vmem:[#allocation76_spill] sm:$0xff] }
 0x236   : > { %v9210_v38 = vpack.c.bf16 %v3375_v48, %v3363_v8  ;;  %v3387_v55 = vand.u32 4294901760, %v3386_v44  ;;  %v3399_v4 = vand.u32 4294901760, %v3398_v6  ;;  %v3410_v7 = vsub.f32 %v8778_v61, %v10208_v13  ;;  %v10655_v22 = vld [vmem:[#allocation88_spill] sm:$0xff] }
 0x237   : > { %6727 = vmatpush1.bf16.msra.mxu0 %v9190_v9  ;;  %v3422_v14 = vsub.f32 %v8783_v46, %v10209_v31  ;;  %v9220_v25 = vpack.c.bf16 %v3393_v54, %v3381_v45  ;;  %v3405_v50 = vand.u32 4294901760, %v3404_v11  ;;  %v3417_v23 = vand.u32 4294901760, %v3416_v42  ;;  %v10610_v54 = vld [vmem:[#allocation77_spill] sm:$0xff]  ;;  %v10615_v42 = vld [vmem:[#allocation67_spill] sm:$0xff]  ;;  %v10646_v46 = vld [vmem:[#allocation30_spill] sm:$0xff] }
 0x238   : > { %10603 = vst [vmem:[#allocation116_spill] sm:$0xff] %v9210_v38  ;;  %6729 = vmatprep.subr.bf16.mxu0 %v9192_v32  ;;  %v9223_v8 = vpack.c.bf16 %v3399_v4, %v3387_v55  ;;  %v3411_v48 = vand.u32 4294901760, %v3410_v7  ;;  %v9234_v45 = vpack.c.bf16 %v8448_v18, %v8443_v28  ;;  %v10609_v4 = vld [vmem:[#allocation75_spill] sm:$0xff]  ;;  %v10616_v55 = vld [vmem:[#allocation70_spill] sm:$0xff] }
 0x239   : > { %10604 = vst [vmem:[#allocation117_spill] sm:$0xff] %v9220_v25  ;;  %v3423_v44 = vand.u32 4294901760, %v3422_v14  ;;  %v9226_v6 = vpack.c.bf16 %v3417_v23, %v3405_v50  ;;  %v9239_v7 = vpack.c.bf16 %v10610_v54, %v10609_v4  ;;  %v10612_v50 = vld [vmem:[#allocation78_spill] sm:$0xff]  ;;  %v10613_v23 = vld [vmem:[#allocation80_spill] sm:$0xff]  ;;  %v10617_v14 = vld [vmem:[#allocation83_spill] sm:$0xff] }
 0x23a   : > { %10605 = vst [vmem:[#allocation118_spill] sm:$0xff] %v9223_v8  ;;  %10608 = vst [vmem:[#allocation121_spill] sm:$0xff] %v9234_v45  ;;  %v9244_v11 = vpack.c.bf16 %v10613_v23, %v10612_v50  ;;  %v10620_v31 = vld [vmem:[#allocation87_spill] sm:$0xff]  ;;  %v10629_v32 = vld [vmem:[#allocation102_spill] sm:$0xff] }
 0x23b   : > { %6731 = vmatpush1.bf16.msra.mxu0 %v9210_v38  ;;  %10606 = vst [vmem:[#allocation119_spill] sm:$0xff] %v9226_v6  ;;  %v9229_v13 = vpack.c.bf16 %v3423_v44, %v3411_v48  ;;  %10611 = vst [vmem:[#allocation75_spill] sm:$0xff] %v9239_v7  ;;  %v10618_v48 = vld [vmem:[#allocation85_spill] sm:$0xff] }
 0x23c   : > { %6733 = vmatprep.subr.bf16.mxu0 %v9220_v25  ;;  %10614 = vst [vmem:[#allocation77_spill] sm:$0xff] %v9244_v11  ;;  %v9251_v44 = vpack.c.bf16 %v10618_v48, %v10617_v14 }
 0x23d   : > { %10607 = vst [vmem:[#allocation120_spill] sm:$0xff] %v9229_v13 }
 0x23e   : > { %10619 = vst [vmem:[#allocation78_spill] sm:$0xff] %v9251_v44 }
 0x23f   : > { %6735 = vmatpush1.bf16.msra.mxu0 %v9223_v8  ;;  %v10624_v8 = vld [vmem:[#allocation93_spill] sm:$0xff] }
 0x240   : > { %6737 = vmatprep.subr.bf16.mxu0 %v9226_v6 }
 0x243   : > { %6739 = vmatpush1.bf16.msra.mxu0 %v9229_v13  ;;  %v10621_v13 = vld [vmem:[#allocation89_spill] sm:$0xff] }
 0x244   : > { %6741 = vmatprep.subr.bf16.mxu0 %v9234_v45  ;;  %v9256_v6 = vpack.c.bf16 %v10621_v13, %v10620_v31  ;;  %v10623_v45 = vld [vmem:[#allocation91_spill] sm:$0xff] }
 0x245   : > { %v9261_v25 = vpack.c.bf16 %v10624_v8, %v10623_v45 }
 0x246   : > { %3428 = vmatmul.mubr.f32.vlgmr.msra.gmra.mrb[6].mxu0 %v10615_v42  ;;  %10622 = vst [vmem:[#allocation80_spill] sm:$0xff] %v9256_v6 }
 0x247   : > { %6743 = vmatpush1.bf16.msra.mxu0 %v9239_v7  ;;  %3628 = vmatprep.mubr.f32.mxu0 %v10616_v55  ;;  %10625 = vst [vmem:[#allocation70_spill] sm:$0xff] %v9261_v25  ;;  %v10626_v7 = vld [vmem:[#allocation98_spill] sm:$0xff]  ;;  %v10627_v55 = vld [vmem:[#allocation101_spill] sm:$0xff] }
 0x248   : > { %6745 = vmatprep.subr.bf16.mxu0 %v9244_v11  ;;  %v9266_v38 = vpack.c.bf16 %v10627_v55, %v10626_v7  ;;  %v10630_v11 = vld [vmem:[#allocation7_spill] sm:$0xff] }
 0x249   : > { %v9271_v9 = vpack.c.bf16 %v10630_v11, %v10629_v32 }
 0x24a   : > { %10628 = vst [vmem:[#allocation83_spill] sm:$0xff] %v9266_v38 }
 0x24b   : > { %6747 = vmatpush1.bf16.msra.mxu0 %v9251_v44  ;;  %10631 = vst [vmem:[#allocation85_spill] sm:$0xff] %v9271_v9  ;;  %v9276_v44 = vpack.c.bf16 %v8744_v24, %v10632_v0 }
 0x24c   : > { %6749 = vmatprep.subr.bf16.mxu0 %v9256_v6  ;;  %v9281_v6 = vpack.c.bf16 %v8816_v40, %v8792_v35 }
 0x24d   : > { %10633 = vst [vmem:[#allocation87_spill] sm:$0xff] %v9276_v44 }
 0x24e   : > { %10634 = vst [vmem:[#allocation89_spill] sm:$0xff] %v9281_v6 }
 0x24f   : > { %6751 = vmatpush1.bf16.msra.mxu0 %v9261_v25  ;;  %v9286_v25 = vpack.c.bf16 %v8834_v56, %v8821_v15 }
 0x250   : > { %6753 = vmatprep.subr.bf16.mxu0 %v9266_v38  ;;  %v9291_v38 = vpack.c.bf16 %v8844_v3, %v8839_v43 }
 0x251   : > { %10635 = vst [vmem:[#allocation91_spill] sm:$0xff] %v9286_v25 }
 0x252   : > { %10636 = vst [vmem:[#allocation93_spill] sm:$0xff] %v9291_v38 }
 0x253   : > { %6755 = vmatpush1.bf16.msra.mxu0 %v9271_v9  ;;  %v10638_v9 = vld [vmem:[#allocation20_spill] sm:$0xff] }
 0x254   : > { %6757 = vmatprep.subr.bf16.mxu0 %v9276_v44  ;;  %v9296_v21 = vpack.c.bf16 %v10638_v9, %v10637_v2  ;;  %v9301_v44 = vpack.c.bf16 %v8897_v59, %v10640_v16 }
 0x256   : > { %10639 = vst [vmem:[#allocation98_spill] sm:$0xff] %v9296_v21  ;;  %10641 = vst [vmem:[#allocation101_spill] sm:$0xff] %v9301_v44 }
 0x257   : > { %6759 = vmatpush1.bf16.msra.mxu0 %v9281_v6  ;;  %v9306_v6 = vpack.c.bf16 %v8934_v19, %v10642_v41 }
 0x258   : > { %6761 = vmatprep.subr.bf16.mxu0 %v9286_v25  ;;  %v10644_v25 = vld [vmem:[#allocation27_spill] sm:$0xff] }
 0x259   : > { %10643 = vst [vmem:[#allocation102_spill] sm:$0xff] %v9306_v6  ;;  %v9311_v42 = vpack.c.bf16 %v10644_v25, %v8945_v53 }
 0x25b   : > { %6763 = vmatpush1.bf16.msra.mxu0 %v9291_v38  ;;  %10645 = vst [vmem:[#allocation7_spill] sm:$0xff] %v9311_v42  ;;  %v9316_v38 = vpack.c.bf16 %v8966_v39, %v10646_v46 }
 0x25c   : > { %6765 = vmatprep.subr.bf16.mxu0 %v9296_v21  ;;  %v10648_v21 = vld [vmem:[#allocation36_spill] sm:$0xff] }
 0x25d   : > { %10647 = vst [vmem:[#allocation8_spill] sm:$0xff] %v9316_v38  ;;  %v9322_v61 = vpack.c.bf16 %v10648_v21, %v8993_v52 }
 0x25f   : > { %6767 = vmatpush1.bf16.msra.mxu0 %v9301_v44  ;;  %10649 = vst [vmem:[#allocation19_spill] sm:$0xff] %v9322_v61  ;;  %v9327_v44 = vpack.c.bf16 %v9025_v63, %v9020_v33 }
 0x260   : > { %6769 = vmatprep.subr.bf16.mxu0 %v9306_v6  ;;  %v10652_v6 = vld [vmem:[#allocation84_spill] sm:$0xff] }
 0x261   : > { %10651 = vst [vmem:[#allocation20_spill] sm:$0xff] %v9327_v44 }
 0x263   : > { %6771 = vmatpush1.bf16.msra.mxu0 %v9311_v42  ;;  %v9334_v42 = vpack.c.bf16 %v9072_v27, %v9067_v51 }
 0x264   : > { %6773 = vmatprep.subr.bf16.mxu0 %v9316_v38  ;;  %v10654_v38 = vld [vmem:[#allocation86_spill] sm:$0xff] }
 0x265   : > { %10653 = vst [vmem:[#allocation21_spill] sm:$0xff] %v9334_v42 }
 0x267   : > { %6775 = vmatpush1.bf16.msra.mxu0 %v10650_v47  ;;  %v10656_v47 = vld [vmem:[#allocation92_spill] sm:$0xff] }
 0x268   : > { %6777 = vmatprep.subr.bf16.mxu0 %v9322_v61  ;;  %v10659_v61 = vld [vmem:[#allocation100_spill] sm:$0xff] }
 0x26b   : > { %6779 = vmatpush1.bf16.msra.mxu0 %v9327_v44  ;;  %v10660_v44 = vld [vmem:[#allocation9_spill] sm:$0xff] }
 0x26c   : > { %6781 = vmatprep.subr.bf16.mxu0 %v10652_v6  ;;  %v10661_v6 = vld [vmem:[#allocation105_spill] sm:$0xff] }
 0x26f   : > { %6783 = vmatpush1.bf16.msra.mxu0 %v10654_v38  ;;  %v10664_v38 = vld [vmem:[#allocation2_spill] sm:$0xff] }
 0x270   : > { %6785 = vmatprep.subr.bf16.mxu0 %v9334_v42  ;;  %v10665_v42 = vld [vmem:[#allocation69_spill] sm:$0xff] }
 0x273   : > { %6787 = vmatpush1.bf16.msra.mxu0 %v10655_v22  ;;  %v10666_v22 = vld [vmem:[#allocation3_spill] sm:$0xff] }
 0x274   : > { %6789 = vmatprep.subr.bf16.mxu0 %v10656_v47  ;;  %v10667_v47 = vld [vmem:[#allocation72_spill] sm:$0xff] }
 0x277   : > { %6791 = vmatpush1.bf16.msra.mxu0 %v10657_v26  ;;  %v10668_v26 = vld [vmem:[#allocation4_spill] sm:$0xff] }
 0x278   : > { %6793 = vmatprep.subr.bf16.mxu0 %v10658_v10  ;;  %v10669_v10 = vld [vmem:[#allocation5_spill] sm:$0xff] }
 0x27b   : > { %6795 = vmatpush1.bf16.msra.mxu0 %v10659_v61  ;;  %v10670_v61 = vld [vmem:[#allocation6_spill] sm:$0xff] }
 0x27c   : > { %6797 = vmatprep.subr.bf16.mxu0 %v10660_v44  ;;  %v10671_v44 = vld [vmem:[#allocation10_spill] sm:$0xff] }
 0x27f   : > { %6799 = vmatpush1.bf16.msra.mxu0 %v10661_v6  ;;  %v10672_v6 = vld [vmem:[#allocation11_spill] sm:$0xff] }
 0x280   : > { %6801 = vmatprep.subr.bf16.mxu0 %v10662_v5  ;;  %v10673_v5 = vld [vmem:[#allocation16_spill] sm:$0xff] }
 0x283   : > { %6803 = vmatpush1.bf16.msra.mxu0 %v10663_v12  ;;  %v10674_v12 = vld [vmem:[#allocation17_spill] sm:$0xff] }
 0x284   : > { %6805 = vmatprep.subr.bf16.mxu0 %v10664_v38  ;;  %v10675_v38 = vld [vmem:[#allocation22_spill] sm:$0xff] }
 0x286   : > { %3631 = vmatmul.mubr.f32.vlgmr.msra.gmra.mrb[6].mxu0 %v10665_v42  ;;  %v10676_v42 = vld [vmem:[#allocation23_spill] sm:$0xff] }
 0x287   : > { %6807 = vmatpush1.bf16.msra.mxu0 %v10666_v22  ;;  %3768 = vmatprep.mubr.f32.mxu0 %v10667_v47  ;;  %v10677_v22 = vld [vmem:[#allocation28_spill] sm:$0xff]  ;;  %v10678_v47 = vld [vmem:[#allocation29_spill] sm:$0xff] }
 0x288   : > { %6809 = vmatprep.subr.bf16.mxu0 %v10668_v26  ;;  %v10679_v26 = vld [vmem:[#allocation34_spill] sm:$0xff] }
 0x28b   : > { %6811 = vmatpush1.bf16.msra.mxu0 %v10669_v10  ;;  %v10680_v10 = vld [vmem:[#allocation35_spill] sm:$0xff] }
 0x28c   : > { %6813 = vmatprep.subr.bf16.mxu0 %v10670_v61  ;;  %v10681_v61 = vld [vmem:[#allocation38_spill] sm:$0xff] }
 0x28f   : > { %6815 = vmatpush1.bf16.msra.mxu0 %v10671_v44  ;;  %v10682_v44 = vld [vmem:[#allocation39_spill] sm:$0xff] }
 0x290   : > { %6817 = vmatprep.subr.bf16.mxu0 %v10672_v6  ;;  %v10683_v6 = vld [vmem:[#allocation42_spill] sm:$0xff] }
 0x293   : > { %6819 = vmatpush1.bf16.msra.mxu0 %v10673_v5  ;;  %v10684_v5 = vld [vmem:[#allocation43_spill] sm:$0xff] }
 0x294   : > { %6821 = vmatprep.subr.bf16.mxu0 %v10674_v12  ;;  %v10685_v12 = vld [vmem:[#allocation46_spill] sm:$0xff] }
 0x297   : > { %6823 = vmatpush1.bf16.msra.mxu0 %v10675_v38  ;;  %v10686_v38 = vld [vmem:[#allocation47_spill] sm:$0xff] }
 0x298   : > { %6825 = vmatprep.subr.bf16.mxu0 %v10676_v42  ;;  %v10687_v42 = vld [vmem:[#allocation48_spill] sm:$0xff] }
 0x29b   : > { %6827 = vmatpush1.bf16.msra.mxu0 %v10677_v22  ;;  %v10688_v22 = vld [vmem:[#allocation49_spill] sm:$0xff] }
 0x29c   : > { %6829 = vmatprep.subr.bf16.mxu0 %v10678_v47  ;;  %v10689_v47 = vld [vmem:[#allocation50_spill] sm:$0xff] }
 0x29f   : > { %6831 = vmatpush1.bf16.msra.mxu0 %v10679_v26  ;;  %v10690_v26 = vld [vmem:[#allocation51_spill] sm:$0xff] }
 0x2a0   : > { %6833 = vmatprep.subr.bf16.mxu0 %v10680_v10  ;;  %v10691_v10 = vld [vmem:[#allocation52_spill] sm:$0xff] }
 0x2a3   : > { %6835 = vmatpush1.bf16.msra.mxu0 %v10681_v61 }
 0x2a4   : > { %6837 = vmatprep.subr.bf16.mxu0 %v10682_v44  ;;  %v10693_v44 = vld [vmem:[#allocation53_spill] sm:$0xff] }
 0x2a7   : > { %6839 = vmatpush1.bf16.msra.mxu0 %v10683_v6 }
 0x2a8   : > { %6841 = vmatprep.subr.bf16.mxu0 %v10684_v5 }
 0x2ab   : > { %6843 = vmatpush1.bf16.msra.mxu0 %v10685_v12 }
 0x2ac   : > { %6845 = vmatprep.subr.bf16.mxu0 %v10686_v38 }
 0x2af   : > { %6847 = vmatpush1.bf16.msra.mxu0 %v10687_v42 }
 0x2b0   : > { %6849 = vmatprep.subr.bf16.mxu0 %v10688_v22 }
 0x2b2   : > { %v9375_v61 = vpop.f32.mrb[2].mxu1 }
 0x2b3   : > { %6851 = vmatpush1.bf16.msra.mxu0 %v10689_v47  ;;  %10692 = vst [vmem:[#allocation25_spill] sm:$0xff] %v9375_v61  ;;  %v9378_v6 = vpop.f32.mrb[3].mxu1  ;;  %v10695_v47 = vand.u32 4294901760, %v8443_v28  ;;  %v10697_v61 = vand.u32 4294901760, %v10609_v4  ;;  %v10701_v28 = vld [vmem:[#allocation71_spill] sm:$0xff]  ;;  %v10704_v4 = vand.u32 4294901760, %v10618_v48 }
 0x2b4   : > { %6853 = vmatprep.subr.bf16.mxu0 %v10690_v26  ;;  %10694 = vst [vmem:[#allocation27_spill] sm:$0xff] %v9378_v6  ;;  %v10696_v26 = vand.u32 4294901760, %v8448_v18  ;;  %v10698_v6 = vand.u32 4294901760, %v10610_v54  ;;  %v10703_v18 = vand.u32 4294901760, %v10617_v14  ;;  %v10706_v54 = vand.u32 4294901760, %v10621_v13 }
 0x2b5   : > { %v10709_v14 = vand.u32 4294901760, %v10626_v7  ;;  %v10710_v48 = vand.u32 4294901760, %v10627_v55  ;;  %v10711_v13 = vand.u32 4294901760, %v10629_v32  ;;  %v10715_v7 = vand.u32 4294901760, %v8792_v35 }
 0x2b6   : > { %v9388_v22 = vpack.c.bf16 %v10696_v26, %v10695_v47  ;;  %v10702_v26 = vld [vmem:[#allocation68_spill] sm:$0xff]  ;;  %v10716_v55 = vand.u32 4294901760, %v8816_v40  ;;  %v10717_v32 = vand.u32 4294901760, %v8821_v15  ;;  %v10722_v35 = vand.u32 4294901760, %v10637_v2 }
 0x2b7   : > { %6855 = vmatpush1.bf16.msra.mxu0 %v10691_v10  ;;  %v9432_v47 = vpack.c.bf16 %v10710_v48, %v10709_v14  ;;  %v10723_v40 = vand.u32 4294901760, %v10638_v9  ;;  %v10725_v15 = vand.u32 4294901760, %v10640_v16  ;;  %v10731_v2 = vand.u32 4294901760, %v8945_v53 }
 0x2b8   : > { %6857 = vmatprep.subr.bf16.mxu0 %v10693_v44  ;;  %v9395_v44 = vpack.c.bf16 %v10698_v6, %v10697_v61  ;;  %v9411_v61 = vpack.c.bf16 %v10704_v4, %v10703_v18  ;;  %v10705_v6 = vand.u32 4294901760, %v10620_v31  ;;  %v10712_v31 = vand.u32 4294901760, %v10630_v11 }
 0x2b9   : > { %v9453_v4 = vpack.c.bf16 %v10716_v55, %v10715_v7  ;;  %v10718_v11 = vand.u32 4294901760, %v8834_v56  ;;  %v10726_v56 = vand.u32 4294901760, %v8897_v59  ;;  %v10732_v9 = vand.u32 4294901760, %v10644_v25 }
 0x2ba   : > { %v10734_v59 = vand.u32 4294901760, %v10646_v46  ;;  %v10735_v16 = vand.u32 4294901760, %v8966_v39  ;;  %v10742_v53 = vand.u32 4294901760, %v8993_v52  ;;  %v10743_v25 = vand.u32 4294901760, %v10648_v21  ;;  %v10752_v52 = vld [vmem:[#allocation81_spill] sm:$0xff] }
 0x2bb   : > { %6859 = vmatpush1.bf16.msra.mxu0 %v10569_v20  ;;  %v9495_v48 = vpack.c.bf16 %v10732_v9, %v10731_v2  ;;  %v10745_v46 = vand.u32 4294901760, %v9020_v33  ;;  %v10746_v39 = vand.u32 4294901760, %v9025_v63  ;;  %v10753_v21 = vand.u32 4294901760, %v10752_v52  ;;  %v10785_v52 = vld [vmem:[#allocation56_spill] sm:$0xff] }
 0x2bc   : > { %6861 = vmatprep.subr.bf16.mxu0 %v10570_v49  ;;  %v9516_v7 = vpack.c.bf16 %v10743_v25, %v10742_v53  ;;  %v10757_v63 = vand.u32 4294901760, %v9067_v51  ;;  %v10758_v33 = vand.u32 4294901760, %v9072_v27  ;;  %v10763_v2 = vand.u32 4294901760, %v8575_v29  ;;  %v10767_v51 = vld [vmem:[#allocation90_spill] sm:$0xff] }
 0x2bd   : > { %10733 = vst [vmem:[#allocation43_spill] sm:$0xff] %v9495_v48  ;;  %v9523_v55 = vpack.c.bf16 %v10746_v39, %v10745_v46  ;;  %v10764_v9 = vand.u32 4294901760, %v8580_v30  ;;  %v10766_v27 = vand.u32 4294901760, %v8597_v37  ;;  %v10775_v29 = vand.u32 4294901760, %v8658_v17  ;;  %v10778_v37 = vld [vmem:[#allocation103_spill] sm:$0xff]  ;;  %v10780_v46 = vld [vmem:[#allocation104_spill] sm:$0xff] }
 0x2be   : > { %10744 = vst [vmem:[#allocation48_spill] sm:$0xff] %v9516_v7  ;;  %v10776_v30 = vand.u32 4294901760, %v8663_v58  ;;  %v10779_v25 = vand.u32 4294901760, %v10778_v37  ;;  %v10781_v39 = vand.u32 4294901760, %v10780_v46  ;;  %v10788_v17 = vld [vmem:[#allocation59_spill] sm:$0xff]  ;;  %v10806_v37 = vld [vmem:[#allocation16_spill] sm:$0xff] }
 0x2bf   : > { %6863 = vmatpush1.bf16.msra.mxu0 %v10577_v36  ;;  %v10699_v36 = vand.u32 4294901760, %v10612_v50  ;;  %v10708_v50 = vand.u32 4294901760, %v10624_v8  ;;  %v10713_v8 = vand.u32 4294901760, %v10632_v0  ;;  %v10720_v0 = vand.u32 4294901760, %v8844_v3  ;;  %10747 = vst [vmem:[#allocation52_spill] sm:$0xff] %v9523_v55  ;;  %v10808_v46 = vld [vmem:[#allocation22_spill] sm:$0xff] }
 0x2c0   : > { %6865 = vmatprep.subr.bf16.mxu0 %v10580_v60  ;;  %v10700_v60 = vand.u32 4294901760, %v10613_v23  ;;  %v10728_v3 = vand.u32 4294901760, %v10642_v41  ;;  %v9579_v53 = vpack.c.bf16 %v10776_v30, %v10775_v29  ;;  %v10789_v58 = vand.u32 4294901760, %v10788_v17  ;;  %v10804_v29 = vld [vmem:[#allocation10_spill] sm:$0xff]  ;;  %v10805_v30 = vld [vmem:[#allocation11_spill] sm:$0xff] }
 0x2c1   : > { %v10815_v17 = vld [vmem:[#allocation39_spill] sm:$0xff] }
 0x2c2   : > { %v9402_v49 = vpack.c.bf16 %v10700_v60, %v10699_v36  ;;  %v9418_v60 = vpack.c.bf16 %v10706_v54, %v10705_v6  ;;  %v10707_v36 = vand.u32 4294901760, %v10623_v45  ;;  %v10714_v45 = vand.u32 4294901760, %v8744_v24  ;;  %10777 = vst [vmem:[#allocation90_spill] sm:$0xff] %v9579_v53 }
 0x2c3   : > { %6867 = vmatpush1.bf16.msra.mxu0 %v10585_v34  ;;  %v9460_v6 = vpack.c.bf16 %v10718_v11, %v10717_v32  ;;  %v10719_v24 = vand.u32 4294901760, %v8839_v43  ;;  %v10729_v43 = vand.u32 4294901760, %v8934_v19  ;;  %v10737_v19 = vld [vmem:[#allocation73_spill] sm:$0xff]  ;;  %v10748_v32 = vand.u32 4294901760, %v8482_v62  ;;  %v10749_v11 = vld [vmem:[#allocation79_spill] sm:$0xff] }
 0x2c4   : > { %6869 = vmatprep.subr.bf16.mxu0 %v9388_v22  ;;  %v9425_v23 = vpack.c.bf16 %v10708_v50, %v10707_v36  ;;  %v9446_v18 = vpack.c.bf16 %v10714_v45, %v10713_v8  ;;  %v9474_v36 = vpack.c.bf16 %v10723_v40, %v10722_v35  ;;  %v9481_v50 = vpack.c.bf16 %v10726_v56, %v10725_v15  ;;  %v10754_v35 = vld [vmem:[#allocation82_spill] sm:$0xff] }
 0x2c5   : > { %v9467_v54 = vpack.c.bf16 %v10720_v0, %v10719_v24  ;;  %v9488_v14 = vpack.c.bf16 %v10729_v43, %v10728_v3  ;;  %v10738_v41 = vand.u32 4294901760, %v10737_v19  ;;  %v10750_v24 = vand.u32 4294901760, %v10749_v11  ;;  %v10783_v11 = vld [vmem:[#allocation55_spill] sm:$0xff] }
 0x2c6   : > { %3772 = vmatmul.mubr.f32.vlgmr.msra.gmra.mrb[6].mxu0 %v10701_v28  ;;  %v9439_v28 = vpack.c.bf16 %v10712_v31, %v10711_v13  ;;  %10724 = vst [vmem:[#allocation36_spill] sm:$0xff] %v9474_v36  ;;  %10727 = vst [vmem:[#allocation69_spill] sm:$0xff] %v9481_v50  ;;  %v9502_v13 = vpack.c.bf16 %v10735_v16, %v10734_v59  ;;  %v10739_v31 = vld [vmem:[#allocation74_spill] sm:$0xff]  ;;  %v10755_v40 = vand.u32 4294901760, %v10754_v35  ;;  %v10760_v62 = vand.u32 4294901760, %v8545_v1 }
 0x2c7   : > { %6871 = vmatpush1.bf16.msra.mxu0 %v9395_v44  ;;  %4035 = vmatprep.mubr.f32.mxu0 %v10702_v26  ;;  %10721 = vst [vmem:[#allocation30_spill] sm:$0xff] %v9467_v54  ;;  %10730 = vst [vmem:[#allocation72_spill] sm:$0xff] %v9488_v14  ;;  %v10740_v8 = vand.u32 4294901760, %v10739_v31  ;;  %v9530_v0 = vpack.c.bf16 %v10750_v24, %v10748_v32  ;;  %v9544_v56 = vpack.c.bf16 %v10758_v33, %v10757_v63 }
 0x2c8   : > { %6873 = vmatprep.subr.bf16.mxu0 %v9402_v49  ;;  %10736 = vst [vmem:[#allocation46_spill] sm:$0xff] %v9502_v13  ;;  %v9537_v15 = vpack.c.bf16 %v10755_v40, %v10753_v21  ;;  %v10761_v3 = vand.u32 4294901760, %v8550_v57  ;;  %v9558_v59 = vpack.c.bf16 %v10764_v9, %v10763_v2  ;;  %v10768_v16 = vand.u32 4294901760, %v10767_v51  ;;  %v10770_v57 = vld [vmem:[#allocation96_spill] sm:$0xff]  ;;  %v10795_v2 = vld [vmem:[#allocation62_spill] sm:$0xff] }
 0x2c9   : > { %v9509_v45 = vpack.c.bf16 %v10740_v8, %v10738_v41  ;;  %10751 = vst [vmem:[#allocation71_spill] sm:$0xff] %v9530_v0  ;;  %10759 = vst [vmem:[#allocation73_spill] sm:$0xff] %v9544_v56  ;;  %v10771_v1 = vand.u32 4294901760, %v10770_v57  ;;  %v10772_v41 = vld [vmem:[#allocation97_spill] sm:$0xff]  ;;  %v9586_v32 = vpack.c.bf16 %v10781_v39, %v10779_v25  ;;  %v10784_v24 = vand.u32 4294901760, %v10783_v11  ;;  %v10790_v40 = vld [vmem:[#allocation60_spill] sm:$0xff] }
 0x2ca   : > { %10756 = vst [vmem:[#allocation68_spill] sm:$0xff] %v9537_v15  ;;  %v9551_v43 = vpack.c.bf16 %v10761_v3, %v10760_v62  ;;  %10765 = vst [vmem:[#allocation79_spill] sm:$0xff] %v9558_v59  ;;  %v9565_v19 = vpack.c.bf16 %v10768_v16, %v10766_v27  ;;  %v10773_v31 = vand.u32 4294901760, %v10772_v41  ;;  %v10786_v21 = vand.u32 4294901760, %v10785_v52  ;;  %v10793_v62 = vld [vmem:[#allocation61_spill] sm:$0xff]  ;;  %v10798_v51 = vld [vmem:[#allocation2_spill] sm:$0xff] }
 0x2cb   : > { %6875 = vmatpush1.bf16.msra.mxu0 %v9411_v61  ;;  %10741 = vst [vmem:[#allocation47_spill] sm:$0xff] %v9509_v45  ;;  %10782 = vst [vmem:[#allocation96_spill] sm:$0xff] %v9586_v32  ;;  %v10791_v63 = vand.u32 4294901760, %v10790_v40  ;;  %v10794_v3 = vand.u32 4294901760, %v10793_v62  ;;  %v10796_v9 = vand.u32 4294901760, %v10795_v2  ;;  %v10799_v16 = vld [vmem:[#allocation67_spill] sm:$0xff] }
 0x2cc   : > { %6877 = vmatprep.subr.bf16.mxu0 %v9418_v60  ;;  %10762 = vst [vmem:[#allocation74_spill] sm:$0xff] %v9551_v43  ;;  %10769 = vst [vmem:[#allocation81_spill] sm:$0xff] %v9565_v19  ;;  %v9572_v8 = vpack.c.bf16 %v10773_v31, %v10771_v1  ;;  %v9593_v35 = vpack.c.bf16 %v10786_v21, %v10784_v24  ;;  %v10800_v57 = vld [vmem:[#allocation3_spill] sm:$0xff]  ;;  %v10801_v1 = vld [vmem:[#allocation4_spill] sm:$0xff] }
 0x2cd   : > { %v9600_v33 = vpack.c.bf16 %v10791_v63, %v10789_v58  ;;  %v9607_v27 = vpack.c.bf16 %v10796_v9, %v10794_v3  ;;  %v10802_v41 = vld [vmem:[#allocation5_spill] sm:$0xff]  ;;  %v10803_v31 = vld [vmem:[#allocation6_spill] sm:$0xff]  ;;  %v10809_v39 = vld [vmem:[#allocation23_spill] sm:$0xff] }
 0x2ce   : > { %10774 = vst [vmem:[#allocation82_spill] sm:$0xff] %v9572_v8  ;;  %10787 = vst [vmem:[#allocation97_spill] sm:$0xff] %v9593_v35  ;;  %v10807_v25 = vld [vmem:[#allocation17_spill] sm:$0xff]  ;;  %v10810_v11 = vld [vmem:[#allocation28_spill] sm:$0xff] }
 0x2cf   : > { %6879 = vmatpush1.bf16.msra.mxu0 %v9425_v23  ;;  %10792 = vst [vmem:[#allocation103_spill] sm:$0xff] %v9600_v33  ;;  %10797 = vst [vmem:[#allocation104_spill] sm:$0xff] %v9607_v27  ;;  %v10812_v24 = vld [vmem:[#allocation34_spill] sm:$0xff]  ;;  %v10813_v52 = vld [vmem:[#allocation35_spill] sm:$0xff] }
 0x2d0   : > { %6881 = vmatprep.subr.bf16.mxu0 %v9432_v47  ;;  %v10814_v21 = vld [vmem:[#allocation38_spill] sm:$0xff]  ;;  %v10817_v40 = vld [vmem:[#allocation49_spill] sm:$0xff]  ;;  %v10819_v62 = vld [vmem:[#allocation51_spill] sm:$0xff] }
 0x2d1   : > { %v10816_v58 = vld [vmem:[#allocation42_spill] sm:$0xff]  ;;  %v10820_v3 = vld [vmem:[#allocation53_spill] sm:$0xff] }
 0x2d2   : > { %v10818_v63 = vld [vmem:[#allocation50_spill] sm:$0xff]  ;;  %v10821_v2 = vld [vmem:[#allocation57_spill] sm:$0xff] }
 0x2d3   : > { %6883 = vmatpush1.bf16.msra.mxu0 %v9439_v28  ;;  %v10822_v9 = vld [vmem:[#allocation58_spill] sm:$0xff] }
 0x2d4   : > { %6885 = vmatprep.subr.bf16.mxu0 %v9446_v18 }
 0x2d7   : > { %6887 = vmatpush1.bf16.msra.mxu0 %v9453_v4 }
 0x2d8   : > { %6889 = vmatprep.subr.bf16.mxu0 %v9460_v6 }
 0x2db   : > { %6891 = vmatpush1.bf16.msra.mxu0 %v9467_v54 }
 0x2dc   : > { %6893 = vmatprep.subr.bf16.mxu0 %v9474_v36 }
 0x2df   : > { %6895 = vmatpush1.bf16.msra.mxu0 %v9481_v50 }
 0x2e0   : > { %6897 = vmatprep.subr.bf16.mxu0 %v9488_v14 }
 0x2e3   : > { %6899 = vmatpush1.bf16.msra.mxu0 %v9495_v48 }
 0x2e4   : > { %6901 = vmatprep.subr.bf16.mxu0 %v9502_v13  ;;  %v10826_v13 = vld [vmem:[#allocation27_spill] sm:$0xff] }
 0x2e7   : > { %6903 = vmatpush1.bf16.msra.mxu0 %v9509_v45 }
 0x2e8   : > { %6905 = vmatprep.subr.bf16.mxu0 %v9516_v7  ;;  %v10825_v7 = vld [vmem:[#allocation25_spill] sm:$0xff] }
 0x2eb   : > { %6907 = vmatpush1.bf16.msra.mxu0 %v9523_v55 }
 0x2ec   : > { %6909 = vmatprep.subr.bf16.mxu0 %v9530_v0 }
 0x2ef   : > { %6911 = vmatpush1.bf16.msra.mxu0 %v9537_v15 }
 0x2f0   : > { %6913 = vmatprep.subr.bf16.mxu0 %v9544_v56 }
 0x2f3   : > { %6915 = vmatpush1.bf16.msra.mxu0 %v9551_v43 }
 0x2f4   : > { %6917 = vmatprep.subr.bf16.mxu0 %v9558_v59 }
 0x2f7   : > { %6919 = vmatpush1.bf16.msra.mxu0 %v9565_v19 }
 0x2f8   : > { %6921 = vmatprep.subr.bf16.mxu0 %v9572_v8 }
 0x2fb   : > { %6923 = vmatpush1.bf16.msra.mxu0 %v9579_v53  ;;  %v6605_v53 = vld [vmem:[%s9914_s6 + $0x18] sm:$0xff] }
 0x2fc   : > { %6925 = vmatprep.subr.bf16.mxu0 %v9586_v32  ;;  %v4187_v19 = vsel %vm2361_vm8, %v6605_v53, 0 }
 0x2fd   : > { %v9658_v43 = vand.u32 4294901760, %v4187_v19 }
 0x2ff   : > { %6927 = vmatpush1.bf16.msra.mxu0 %v9593_v35  ;;  %v6604_v35 = vld [vmem:[%s9914_s6 + $0x10] sm:$0xff]  ;;  %v4268_v56 = vsub.f32 %v4187_v19, %v9658_v43 }
 0x300   : > { %6929 = vmatprep.subr.bf16.mxu0 %v9600_v33  ;;  %v10824_v33 = vmov 0.0   ;;  %v4184_v32 = vsel %vm2361_vm8, %v6604_v35, 0 }
 0x301   : > { %v9654_v8 = vand.u32 4294901760, %v4184_v32  ;;  %v4269_v55 = vand.u32 4294901760, %v4268_v56 }
 0x303   : > { %6931 = vmatpush1.bf16.msra.mxu0 %v9607_v27  ;;  %v10823_v27 = vld [vmem:[#allocation63_spill] sm:$0xff]  ;;  %v4257_v59 = vsub.f32 %v4184_v32, %v9654_v8  ;;  %v4270_v36 = vsub.f32 %v4268_v56, %v4269_v55 }
 0x304   : > { %6933 = vmatprep.subr.bf16.mxu0 %v10798_v51 }
 0x306   : > { %4037 = vmatmul.mubr.f32.vlgmr.msra.gmra.mrb[6].mxu0 %v10799_v16 }
 0x307   : > { %6935 = vmatpush1.bf16.msra.mxu0 %v10800_v57  ;;  %4172 = vmatprep.mubr.f32.mxu0 %v10702_v26  ;;  %v10811_v26 = vld [vmem:[#allocation29_spill] sm:$0xff] }
 0x308   : > { %6937 = vmatprep.subr.bf16.mxu0 %v10801_v1 }
 0x30b   : > { %6939 = vmatpush1.bf16.msra.mxu0 %v10802_v41 }
 0x30c   : > { %6941 = vmatprep.subr.bf16.mxu0 %v10803_v31 }
 0x30f   : > { %6943 = vmatpush1.bf16.msra.mxu0 %v10804_v29 }
 0x310   : > { %6945 = vmatprep.subr.bf16.mxu0 %v10805_v30 }
 0x313   : > { %6947 = vmatpush1.bf16.msra.mxu0 %v10806_v37 }
 0x314   : > { %6949 = vmatprep.subr.bf16.mxu0 %v10807_v25 }
 0x317   : > { %6951 = vmatpush1.bf16.msra.mxu0 %v10808_v46 }
 0x318   : > { %6953 = vmatprep.subr.bf16.mxu0 %v10809_v39 }
 0x31b   : > { %6955 = vmatpush1.bf16.msra.mxu0 %v10810_v11 }
 0x31c   : > { %6957 = vmatprep.subr.bf16.mxu0 %v10811_v26 }
 0x31f   : > { %6959 = vmatpush1.bf16.msra.mxu0 %v10812_v24 }
 0x320   : > { %6961 = vmatprep.subr.bf16.mxu0 %v10813_v52 }
 0x323   : > { %6963 = vmatpush1.bf16.msra.mxu0 %v10814_v21 }
 0x324   : > { %6965 = vmatprep.subr.bf16.mxu0 %v10815_v17 }
 0x327   : > { %6967 = vmatpush1.bf16.msra.mxu0 %v10816_v58 }
 0x328   : > { %6969 = vmatprep.subr.bf16.mxu0 %v10684_v5 }
 0x32b   : > { %6971 = vmatpush1.bf16.msra.mxu0 %v10685_v12 }
 0x32c   : > { %6973 = vmatprep.subr.bf16.mxu0 %v10686_v38 }
 0x32f   : > { %6975 = vmatpush1.bf16.msra.mxu0 %v10687_v42 }
 0x330   : > { %6977 = vmatprep.subr.bf16.mxu0 %v10817_v40 }
 0x333   : > { %6979 = vmatpush1.bf16.msra.mxu0 %v10818_v63 }
 0x334   : > { %6981 = vmatprep.subr.bf16.mxu0 %v10819_v62 }
 0x337   : > { %6983 = vmatpush1.bf16.msra.mxu0 %v10691_v10 }
 0x338   : > { %6985 = vmatprep.subr.bf16.mxu0 %v10820_v3 }
 0x33b   : > { %6987 = vmatpush1.bf16.msra.mxu0 %v10569_v20 }
 0x33c   : > { %6989 = vmatprep.subr.bf16.mxu0 %v10821_v2 }
 0x33f   : > { %6991 = vmatpush1.bf16.msra.mxu0 %v10822_v9 }
 0x340   : > { %6993 = vmatprep.subr.bf16.mxu0 %v10823_v27 }
 0x343   : > { %6995 = vmatpush1.bf16.msra.mxu0 %v10585_v34 }
 0x346   : > { %4174 = vmatmul.mubr.f32.vlgmr.msra.gmra.mrb[6].mxu0 %v10799_v16  ;;  %v4258_v16 = vand.u32 4294901760, %v4257_v59 }
 0x347   : > { %4255 = vmatprep.mubr.f32.mxu0 %v10824_v33 }
 0x348   : > { %v4259_v0 = vsub.f32 %v4257_v59, %v4258_v16 }
 0x34a   : > { %v4260_v53 = vand.u32 4294901760, %v4259_v0 }
 0x419   : > { %v4175_v15 = vpop.f32.mrb[6].mxu0 }
 0x41a   : > { %v7390_v35 = vadd.f32 %v4175_v15, %v10825_v7  ;;  %v4177_v45 = vpop.f32.mrb[7].mxu0 }
 0x41b   : > { %v7391_v48 = vadd.f32 %v4177_v45, %v10826_v13  ;;  %v4271_v13 = vand.u32 4294901760, %v4270_v36  ;;  %v10827_v36 = vld [vmem:[#allocation95_spill] sm:$0xff] }
 0x41c   : > { %v9663_v14 = vand.u32 4294901760, %v7390_v35 }
 0x41d   : > { %v9665_v50 = vand.u32 4294901760, %v7391_v48 }
 0x41e   : > { %v9668_v32 = vsub.f32 %v7390_v35, %v9663_v14  ;;  %v10828_v35 = vld [vmem:[#allocation13_spill] sm:$0xff] }
 0x41f   : > { %v9671_v54 = vsub.f32 %v7391_v48, %v9665_v50  ;;  %4190 = vmatprep.subr.mxu0 %v9665_v50 }
 0x420   : > { %v9675_v19 = vand.u32 4294901760, %v9668_v32  ;;  %4192 = vmatpush1.msra.mxu0 %v9663_v14 }
 0x421   : > { %4261 = vmatmul.mubr.f32.vlgmr.msra.gmra.mrb[0].mxu0 %v4260_v53  ;;  %v9679_v45 = vand.u32 4294901760, %v9671_v54  ;;  %v10829_v53 = vld [vmem:[#allocation14_spill] sm:$0xff] }
 0x422   : > { %4266 = vmatprep.mubr.f32.mxu0 %v10824_v33  ;;  %v4287_v7 = vsub.f32 %v9668_v32, %v9675_v19 }
 0x423   : > { %v4281_v48 = vsub.f32 %v9671_v54, %v9679_v45 }
 0x424   : > { %v4288_v15 = vand.u32 4294901760, %v4287_v7  ;;  %v10831_v7 = vld [vmem:[#allocation18_spill] sm:$0xff] }
 0x425   : > { %4272 = vmatmul.mubr.f32.gmra.mrb[4].mxu0 %v4271_v13  ;;  %v4282_v0 = vand.u32 4294901760, %v4281_v48  ;;  %v10830_v13 = vld [vmem:[#allocation15_spill] sm:$0xff]  ;;  %v10832_v48 = vld [vmem:[#allocation24_spill] sm:$0xff] }
 0x426   : > { %4352 = vmatprep.mubr.f32.mxu0 %v10824_v33 }
 0x427   : > { %4283 = vmatprep.subr.mxu0 %v4282_v0  ;;  %4840 = vmatprep.mubr.f32.mxu1 %v4282_v0  ;;  %v10833_v0 = vld [vmem:[#allocation26_spill] sm:$0xff] }
 0x428   : > { %4289 = vmatpush1.msra.mxu0 %v4288_v15  ;;  %4846 = vmatmul.mubr.f32.vlgmr.msra.gmra.mrb[4].mxu1 %v4288_v15  ;;  %v10834_v15 = vld [vmem:[#allocation107_spill] sm:$0xff] }
 0x429   : > { %7063 = vmatpush1.bf16.msra.mxu1 %v10827_v36  ;;  %4354 = vmatmul.mubr.f32.vlgmr.msra.gmra.mrb[0].mxu0 %v9654_v8  ;;  %v10835_v36 = vld [vmem:[#allocation31_spill] sm:$0xff] }
 0x42a   : > { %4369 = vmatprep.subr.mxu0 %v9671_v54  ;;  %5237 = vmatprep.mubr.f32.mxu1 %v9665_v50 }
 0x42b   : > { %4372 = vmatpush1.msra.mxu0 %v9668_v32  ;;  %7065 = vmatprep.subr.bf16.mxu1 %v10828_v35  ;;  %v10837_v35 = vld [vmem:[#allocation33_spill] sm:$0xff] }
 0x42c   : > { %4453 = vmatprep.subr.mxu0 %v9665_v50  ;;  %4359 = vmatprep.mubr.f32.mxu0 %v10824_v33 }
 0x42d   : > { %7067 = vmatpush1.bf16.msra.mxu1 %v10829_v53  ;;  %4361 = vmatmul.mubr.f32.gmra.mrb[4].mxu0 %v9658_v43  ;;  %v10838_v53 = vld [vmem:[#allocation37_spill] sm:$0xff] }
 0x42e   : > { %7069 = vmatprep.subr.bf16.mxu1 %v10830_v13  ;;  %4435 = vmatprep.mubr.f32.mxu0 %v10824_v33  ;;  %v10841_v13 = vld [vmem:[#allocation44_spill] sm:$0xff] }
 0x431   : > { %7071 = vmatpush1.bf16.msra.mxu1 %v10831_v7  ;;  %4438 = vmatmul.mubr.f32.vlgmr.msra.gmra.mrb[0].mxu0 %v4257_v59  ;;  %v10836_v59 = vld [vmem:[#allocation32_spill] sm:$0xff]  ;;  %v10842_v7 = vld [vmem:[#allocation45_spill] sm:$0xff] }
 0x432   : > { %4455 = vmatpush1.msra.mxu0 %v9663_v14  ;;  %7073 = vmatprep.subr.bf16.mxu1 %v10832_v48  ;;  %v10844_v48 = vld [vmem:[#allocation108_spill] sm:$0xff] }
 0x433   : > { %4540 = vmatprep.subr.mxu0 %v9679_v45  ;;  %4443 = vmatprep.mubr.f32.mxu0 %v10824_v33 }
 0x435   : > { %7075 = vmatpush1.bf16.msra.mxu1 %v10833_v0  ;;  %4446 = vmatmul.mubr.f32.gmra.mrb[4].mxu0 %v4268_v56  ;;  %v10839_v56 = vld [vmem:[#allocation40_spill] sm:$0xff] }
 0x436   : > { %7077 = vmatprep.subr.bf16.mxu1 %v10834_v15  ;;  %4518 = vmatprep.mubr.f32.mxu0 %v10824_v33  ;;  %v10845_v0 = vld [vmem:[#allocation64_spill] sm:$0xff]  ;;  %v10846_v15 = vld [vmem:[#allocation109_spill] sm:$0xff] }
 0x439   : > { %7079 = vmatpush1.bf16.msra.mxu1 %v10835_v36  ;;  %4522 = vmatmul.mubr.f32.vlgmr.msra.gmra.mrb[0].mxu0 %v4258_v16  ;;  %v10840_v16 = vld [vmem:[#allocation41_spill] sm:$0xff]  ;;  %v10847_v36 = vld [vmem:[#allocation110_spill] sm:$0xff] }
 0x43a   : > { %4544 = vmatpush1.msra.mxu0 %v9675_v19  ;;  %7081 = vmatprep.subr.bf16.mxu1 %v10836_v59  ;;  %v10848_v59 = vld [vmem:[#allocation111_spill] sm:$0xff] }
 0x43b   : > { %4623 = vmatprep.subr.mxu0 %v9665_v50  ;;  %4527 = vmatprep.mubr.f32.mxu0 %v10824_v33 }
 0x43d   : > { %7083 = vmatpush1.bf16.msra.mxu1 %v10837_v35  ;;  %4531 = vmatmul.mubr.f32.gmra.mrb[4].mxu0 %v4269_v55  ;;  %v10843_v55 = vld [vmem:[#allocation54_spill] sm:$0xff]  ;;  %v10849_v35 = vld [vmem:[#allocation112_spill] sm:$0xff] }
 0x43e   : > { %7085 = vmatprep.subr.bf16.mxu1 %v10838_v53  ;;  %4607 = vmatprep.mubr.f32.mxu0 %v10824_v33  ;;  %v10850_v53 = vld [vmem:[#allocation113_spill] sm:$0xff] }
 0x441   : > { %7087 = vmatpush1.bf16.msra.mxu1 %v10839_v56  ;;  %4609 = vmatmul.mubr.f32.vlgmr.msra.gmra.mrb[0].mxu0 %v9654_v8  ;;  %v10852_v56 = vld [vmem:[#allocation115_spill] sm:$0xff] }
 0x442   : > { %4625 = vmatpush1.msra.mxu0 %v9663_v14  ;;  %7089 = vmatprep.subr.bf16.mxu1 %v10840_v16  ;;  %v10853_v16 = vld [vmem:[#allocation116_spill] sm:$0xff] }
 0x443   : > { %4614 = vmatprep.mubr.f32.mxu0 %v10824_v33 }
 0x445   : > { %7091 = vmatpush1.bf16.msra.mxu1 %v10841_v13  ;;  %4616 = vmatmul.mubr.f32.gmra.mrb[4].mxu0 %v9658_v43  ;;  %v10854_v13 = vld [vmem:[#allocation117_spill] sm:$0xff] }
 0x446   : > { %7093 = vmatprep.subr.bf16.mxu1 %v10842_v7  ;;  %4688 = vmatprep.mubr.f32.mxu0 %v10824_v33  ;;  %v10856_v7 = vld [vmem:[#allocation119_spill] sm:$0xff] }
 0x449   : > { %7095 = vmatpush1.bf16.msra.mxu1 %v10843_v55  ;;  %4690 = vmatmul.mubr.f32.vlgmr.msra.gmra.mrb[0].mxu0 %v9654_v8  ;;  %v10851_v8 = vld [vmem:[#allocation114_spill] sm:$0xff]  ;;  %v10857_v55 = vld [vmem:[#allocation120_spill] sm:$0xff] }
 0x44a   : > { %7097 = vmatprep.subr.bf16.mxu1 %v10844_v48  ;;  %4695 = vmatprep.mubr.f32.mxu0 %v10824_v33  ;;  %v10858_v48 = vld [vmem:[#allocation121_spill] sm:$0xff] }
 0x44d   : > { %7099 = vmatpush1.bf16.msra.mxu1 %v10845_v0  ;;  %4697 = vmatmul.mubr.f32.gmra.mrb[4].mxu0 %v9658_v43  ;;  %v10855_v43 = vld [vmem:[#allocation118_spill] sm:$0xff]  ;;  %v10859_v0 = vld [vmem:[#allocation75_spill] sm:$0xff] }
 0x44e   : > { %7101 = vmatprep.subr.bf16.mxu1 %v10846_v15  ;;  %6070 = vmatprep.mubr.f32.mxu0 %v10824_v33  ;;  %v10860_v15 = vld [vmem:[#allocation77_spill] sm:$0xff] }
 0x451   : > { %7103 = vmatpush1.bf16.msra.mxu1 %v10847_v36  ;;  %v10861_v36 = vld [vmem:[#allocation78_spill] sm:$0xff] }
 0x452   : > { %7105 = vmatprep.subr.bf16.mxu1 %v10848_v59  ;;  %v10862_v59 = vld [vmem:[#allocation80_spill] sm:$0xff] }
 0x455   : > { %7107 = vmatpush1.bf16.msra.mxu1 %v10849_v35  ;;  %v10863_v35 = vld [vmem:[#allocation70_spill] sm:$0xff] }
 0x456   : > { %7109 = vmatprep.subr.bf16.mxu1 %v10850_v53  ;;  %v10864_v53 = vld [vmem:[#allocation83_spill] sm:$0xff] }
 0x459   : > { %7111 = vmatpush1.bf16.msra.mxu1 %v10851_v8  ;;  %v10865_v8 = vld [vmem:[#allocation85_spill] sm:$0xff] }
 0x45a   : > { %7113 = vmatprep.subr.bf16.mxu1 %v10852_v56  ;;  %v10866_v56 = vld [vmem:[#allocation87_spill] sm:$0xff] }
 0x45d   : > { %7115 = vmatpush1.bf16.msra.mxu1 %v10853_v16  ;;  %v10867_v16 = vld [vmem:[#allocation89_spill] sm:$0xff] }
 0x45e   : > { %7117 = vmatprep.subr.bf16.mxu1 %v10854_v13  ;;  %v10868_v13 = vld [vmem:[#allocation91_spill] sm:$0xff] }
 0x461   : > { %7119 = vmatpush1.bf16.msra.mxu1 %v10855_v43  ;;  %v10869_v43 = vld [vmem:[#allocation93_spill] sm:$0xff] }
 0x462   : > { %7121 = vmatprep.subr.bf16.mxu1 %v10856_v7  ;;  %v10871_v7 = vld [vmem:[#allocation101_spill] sm:$0xff] }
 0x465   : > { %7123 = vmatpush1.bf16.msra.mxu1 %v10857_v55  ;;  %v10872_v55 = vld [vmem:[#allocation102_spill] sm:$0xff] }
 0x466   : > { %7125 = vmatprep.subr.bf16.mxu1 %v10858_v48  ;;  %v10873_v48 = vld [vmem:[#allocation7_spill] sm:$0xff] }
 0x468   : > { %5239 = vmatmul.mubr.f32.vlgmr.msra.gmra.mrb[4].mxu1 %v9663_v14 }
 0x469   : > { %7127 = vmatpush1.bf16.msra.mxu1 %v10859_v0  ;;  %5439 = vmatprep.mubr.f32.mxu1 %v9671_v54  ;;  %v10870_v54 = vld [vmem:[#allocation98_spill] sm:$0xff]  ;;  %v10874_v0 = vld [vmem:[#allocation8_spill] sm:$0xff] }
 0x46a   : > { %7129 = vmatprep.subr.bf16.mxu1 %v10860_v15  ;;  %v10875_v15 = vld [vmem:[#allocation76_spill] sm:$0xff] }
 0x46d   : > { %7131 = vmatpush1.bf16.msra.mxu1 %v10861_v36  ;;  %v10876_v36 = vld [vmem:[#allocation19_spill] sm:$0xff] }
 0x46e   : > { %7133 = vmatprep.subr.bf16.mxu1 %v10862_v59  ;;  %v10877_v59 = vld [vmem:[#allocation20_spill] sm:$0xff] }
 0x471   : > { %7135 = vmatpush1.bf16.msra.mxu1 %v10863_v35  ;;  %v10878_v35 = vld [vmem:[#allocation84_spill] sm:$0xff] }
 0x472   : > { %7137 = vmatprep.subr.bf16.mxu1 %v10864_v53  ;;  %v10879_v53 = vld [vmem:[#allocation86_spill] sm:$0xff] }
 0x475   : > { %7139 = vmatpush1.bf16.msra.mxu1 %v10865_v8  ;;  %v10880_v8 = vld [vmem:[#allocation21_spill] sm:$0xff] }
 0x476   : > { %7141 = vmatprep.subr.bf16.mxu1 %v10866_v56  ;;  %v10881_v56 = vld [vmem:[#allocation88_spill] sm:$0xff] }
 0x479   : > { %7143 = vmatpush1.bf16.msra.mxu1 %v10867_v16  ;;  %v10882_v16 = vld [vmem:[#allocation92_spill] sm:$0xff] }
 0x47a   : > { %7145 = vmatprep.subr.bf16.mxu1 %v10868_v13  ;;  %v10883_v13 = vld [vmem:[#allocation94_spill] sm:$0xff] }
 0x47d   : > { %7147 = vmatpush1.bf16.msra.mxu1 %v10869_v43  ;;  %v10884_v43 = vld [vmem:[#allocation99_spill] sm:$0xff] }
 0x47e   : > { %7149 = vmatprep.subr.bf16.mxu1 %v10870_v54  ;;  %v10885_v54 = vld [vmem:[#allocation100_spill] sm:$0xff] }
 0x481   : > { %7151 = vmatpush1.bf16.msra.mxu1 %v10871_v7  ;;  %v10886_v7 = vld [vmem:[#allocation9_spill] sm:$0xff] }
 0x482   : > { %7153 = vmatprep.subr.bf16.mxu1 %v10872_v55  ;;  %v10887_v55 = vld [vmem:[#allocation105_spill] sm:$0xff] }
 0x485   : > { %7155 = vmatpush1.bf16.msra.mxu1 %v10873_v48  ;;  %v10888_v48 = vld [vmem:[#allocation12_spill] sm:$0xff] }
 0x486   : > { %7157 = vmatprep.subr.bf16.mxu1 %v10874_v0  ;;  %v10889_v0 = vld [vmem:[#allocation106_spill] sm:$0xff] }
 0x489   : > { %7159 = vmatpush1.bf16.msra.mxu1 %v10875_v15  ;;  %v10904_v15 = vld [vmem:[#allocation81_spill] sm:$0xff] }
 0x48a   : > { %7161 = vmatprep.subr.bf16.mxu1 %v10876_v36  ;;  %v10905_v36 = vld [vmem:[#allocation82_spill] sm:$0xff] }
 0x48d   : > { %7163 = vmatpush1.bf16.msra.mxu1 %v10877_v59  ;;  %v10906_v59 = vld [vmem:[#allocation90_spill] sm:$0xff] }
 0x48e   : > { %7165 = vmatprep.subr.bf16.mxu1 %v10878_v35  ;;  %v10907_v35 = vld [vmem:[#allocation96_spill] sm:$0xff] }
 0x491   : > { %7167 = vmatpush1.bf16.msra.mxu1 %v10879_v53  ;;  %v10908_v53 = vld [vmem:[#allocation97_spill] sm:$0xff] }
 0x492   : > { %7169 = vmatprep.subr.bf16.mxu1 %v10880_v8  ;;  %v10909_v8 = vld [vmem:[#allocation103_spill] sm:$0xff] }
 0x495   : > { %7171 = vmatpush1.bf16.msra.mxu1 %v10881_v56  ;;  %v10910_v56 = vld [vmem:[#allocation104_spill] sm:$0xff] }
 0x496   : > { %7173 = vmatprep.subr.bf16.mxu1 %v10882_v16  ;;  %v2890_v16 = vpop.permute.xlu1 %2889 }
 0x499   : > { %7175 = vmatpush1.bf16.msra.mxu1 %v10883_v13 }
 0x49a   : > { %7177 = vmatprep.subr.bf16.mxu1 %v10884_v43 }
 0x49d   : > { %7179 = vmatpush1.bf16.msra.mxu1 %v10885_v54 }
 0x49e   : > { %7181 = vmatprep.subr.bf16.mxu1 %v10886_v7 }
 0x4a1   : > { %7183 = vmatpush1.bf16.msra.mxu1 %v10887_v55 }
 0x4a2   : > { %7185 = vmatprep.subr.bf16.mxu1 %v10888_v48 }
 0x4a5   : > { %7187 = vmatpush1.bf16.msra.mxu1 %v10889_v0 }
 0x4a6   : > { %7189 = vmatprep.subr.bf16.mxu1 %v10798_v51 }
 0x4a8   : > { %5442 = vmatmul.mubr.f32.vlgmr.msra.gmra.mrb[4].mxu1 %v9668_v32  ;;  %v10901_v32 = vld [vmem:[#allocation73_spill] sm:$0xff] }
 0x4a9   : > { %7191 = vmatpush1.bf16.msra.mxu1 %v10800_v57  ;;  %5579 = vmatprep.mubr.f32.mxu1 %v9679_v45  ;;  %v10903_v45 = vld [vmem:[#allocation79_spill] sm:$0xff] }
 0x4aa   : > { %7193 = vmatprep.subr.bf16.mxu1 %v10801_v1 }
 0x4ad   : > { %7195 = vmatpush1.bf16.msra.mxu1 %v10802_v41 }
 0x4ae   : > { %7197 = vmatprep.subr.bf16.mxu1 %v10803_v31 }
 0x4b1   : > { %7199 = vmatpush1.bf16.msra.mxu1 %v10804_v29 }
 0x4b2   : > { %7201 = vmatprep.subr.bf16.mxu1 %v10805_v30 }
 0x4b5   : > { %7203 = vmatpush1.bf16.msra.mxu1 %v10806_v37 }
 0x4b6   : > { %7205 = vmatprep.subr.bf16.mxu1 %v10807_v25 }
 0x4b9   : > { %7207 = vmatpush1.bf16.msra.mxu1 %v10808_v46 }
 0x4ba   : > { %7209 = vmatprep.subr.bf16.mxu1 %v10809_v39 }
 0x4bd   : > { %7211 = vmatpush1.bf16.msra.mxu1 %v10810_v11 }
 0x4be   : > { %7213 = vmatprep.subr.bf16.mxu1 %v10811_v26 }
 0x4c1   : > { %7215 = vmatpush1.bf16.msra.mxu1 %v10812_v24 }
 0x4c2   : > { %7217 = vmatprep.subr.bf16.mxu1 %v10813_v52 }
 0x4c5   : > { %7219 = vmatpush1.bf16.msra.mxu1 %v10814_v21 }
 0x4c6   : > { %7221 = vmatprep.subr.bf16.mxu1 %v10815_v17 }
 0x4c9   : > { %7223 = vmatpush1.bf16.msra.mxu1 %v10816_v58 }
 0x4ca   : > { %7225 = vmatprep.subr.bf16.mxu1 %v10684_v5 }
 0x4cd   : > { %7227 = vmatpush1.bf16.msra.mxu1 %v10685_v12 }
 0x4ce   : > { %7229 = vmatprep.subr.bf16.mxu1 %v10686_v38 }
 0x4d1   : > { %7231 = vmatpush1.bf16.msra.mxu1 %v10687_v42 }
 0x4d2   : > { %7233 = vmatprep.subr.bf16.mxu1 %v10817_v40 }
 0x4d5   : > { %7235 = vmatpush1.bf16.msra.mxu1 %v10818_v63 }
 0x4d6   : > { %7237 = vmatprep.subr.bf16.mxu1 %v10819_v62 }
 0x4d9   : > { %7239 = vmatpush1.bf16.msra.mxu1 %v10691_v10 }
 0x4da   : > { %7241 = vmatprep.subr.bf16.mxu1 %v10820_v3 }
 0x4dd   : > { %7243 = vmatpush1.bf16.msra.mxu1 %v10569_v20 }
 0x4de   : > { %7245 = vmatprep.subr.bf16.mxu1 %v10821_v2 }
 0x4e1   : > { %7247 = vmatpush1.bf16.msra.mxu1 %v10822_v9 }
 0x4e2   : > { %7249 = vmatprep.subr.bf16.mxu1 %v10823_v27 }
 0x4e5   : > { %7251 = vmatpush1.bf16.msra.mxu1 %v10585_v34 }
 0x4e6   : > { %7253 = vmatprep.subr.bf16.mxu1 %v9388_v22  ;;  %v10890_v22 = vld [vmem:[#allocation30_spill] sm:$0xff] }
 0x4e8   : > { %5583 = vmatmul.mubr.f32.vlgmr.msra.gmra.mrb[4].mxu1 %v9675_v19  ;;  %v10902_v19 = vld [vmem:[#allocation74_spill] sm:$0xff] }
 0x4e9   : > { %7255 = vmatpush1.bf16.msra.mxu1 %v9395_v44  ;;  %5846 = vmatprep.mubr.f32.mxu1 %v9665_v50  ;;  %v10891_v44 = vld [vmem:[#allocation36_spill] sm:$0xff] }
 0x4ea   : > { %7257 = vmatprep.subr.bf16.mxu1 %v9402_v49  ;;  %v10892_v49 = vld [vmem:[#allocation69_spill] sm:$0xff] }
 0x4ed   : > { %7259 = vmatpush1.bf16.msra.mxu1 %v9411_v61  ;;  %v10893_v61 = vld [vmem:[#allocation72_spill] sm:$0xff] }
 0x4ee   : > { %7261 = vmatprep.subr.bf16.mxu1 %v9418_v60  ;;  %v10894_v60 = vld [vmem:[#allocation43_spill] sm:$0xff] }
 0x4f1   : > { %7263 = vmatpush1.bf16.msra.mxu1 %v9425_v23  ;;  %v10895_v23 = vld [vmem:[#allocation46_spill] sm:$0xff] }
 0x4f2   : > { %7265 = vmatprep.subr.bf16.mxu1 %v9432_v47  ;;  %v10896_v47 = vld [vmem:[#allocation47_spill] sm:$0xff] }
 0x4f5   : > { %7267 = vmatpush1.bf16.msra.mxu1 %v9439_v28  ;;  %v10897_v28 = vld [vmem:[#allocation48_spill] sm:$0xff] }
 0x4f6   : > { %7269 = vmatprep.subr.bf16.mxu1 %v9446_v18  ;;  %v10898_v18 = vld [vmem:[#allocation52_spill] sm:$0xff] }
 0x4f9   : > { %7271 = vmatpush1.bf16.msra.mxu1 %v9453_v4  ;;  %v10899_v4 = vld [vmem:[#allocation71_spill] sm:$0xff] }
 0x4fa   : > { %7273 = vmatprep.subr.bf16.mxu1 %v9460_v6  ;;  %v10900_v6 = vld [vmem:[#allocation68_spill] sm:$0xff] }
 0x4fd   : > { %7275 = vmatpush1.bf16.msra.mxu1 %v10890_v22 }
 0x4fe   : > { %7277 = vmatprep.subr.bf16.mxu1 %v10891_v44 }
 0x501   : > { %7279 = vmatpush1.bf16.msra.mxu1 %v10892_v49 }
 0x502   : > { %7281 = vmatprep.subr.bf16.mxu1 %v10893_v61 }
 0x505   : > { %7283 = vmatpush1.bf16.msra.mxu1 %v10894_v60 }
 0x506   : > { %7285 = vmatprep.subr.bf16.mxu1 %v10895_v23  ;;  %v2885_v23 = vpop.permute.xlu0 %2884 }
 0x509   : > { %7287 = vmatpush1.bf16.msra.mxu1 %v10896_v47 }
 0x50a   : > { %7289 = vmatprep.subr.bf16.mxu1 %v10897_v28 }
 0x50d   : > { %7291 = vmatpush1.bf16.msra.mxu1 %v10898_v18 }
 0x50e   : > { %7293 = vmatprep.subr.bf16.mxu1 %v10899_v4 }
 0x511   : > { %7295 = vmatpush1.bf16.msra.mxu1 %v10900_v6 }
 0x512   : > { %7297 = vmatprep.subr.bf16.mxu1 %v10901_v32 }
 0x515   : > { %7299 = vmatpush1.bf16.msra.mxu1 %v10902_v19 }
 0x516   : > { %7301 = vmatprep.subr.bf16.mxu1 %v10903_v45 }
 0x519   : > { %7303 = vmatpush1.bf16.msra.mxu1 %v10904_v15 }
 0x51a   : > { %7305 = vmatprep.subr.bf16.mxu1 %v10905_v36 }
 0x51d   : > { %7307 = vmatpush1.bf16.msra.mxu1 %v10906_v59 }
 0x51e   : > { %7309 = vmatprep.subr.bf16.mxu1 %v10907_v35 }
 0x521   : > { %7311 = vmatpush1.bf16.msra.mxu1 %v10908_v53 }
 0x522   : > { %7313 = vmatprep.subr.bf16.mxu1 %v10909_v8 }
 0x525   : > { %7315 = vmatpush1.bf16.msra.mxu1 %v10910_v56 }
 0x526   : > { %7317 = vmatprep.subr.bf16.mxu1 %v10798_v51 }
 0x528   : > { %5848 = vmatmul.mubr.f32.vlgmr.msra.gmra.mrb[4].mxu1 %v9663_v14 }
 0x529   : > { %7319 = vmatpush1.bf16.msra.mxu1 %v10800_v57  ;;  %5983 = vmatprep.mubr.f32.mxu1 %v9665_v50 }
 0x52a   : > { %7321 = vmatprep.subr.bf16.mxu1 %v10801_v1 }
 0x52d   : > { %7323 = vmatpush1.bf16.msra.mxu1 %v10802_v41 }
 0x52e   : > { %7325 = vmatprep.subr.bf16.mxu1 %v10803_v31 }
 0x531   : > { %7327 = vmatpush1.bf16.msra.mxu1 %v10804_v29  ;;  %v10911_v29 = vld [vmem:[#allocation65_spill] sm:$0xff] }
 0x532   : > { %7329 = vmatprep.subr.bf16.mxu1 %v10805_v30 }
 0x535   : > { %7331 = vmatpush1.bf16.msra.mxu1 %v10806_v37  ;;  %v10912_v37 = vld [vmem:[#allocation66_spill] sm:$0xff] }
 0x536   : > { %7333 = vmatprep.subr.bf16.mxu1 %v10807_v25 }
 0x539   : > { %7335 = vmatpush1.bf16.msra.mxu1 %v10808_v46 }
 0x53a   : > { %7337 = vmatprep.subr.bf16.mxu1 %v10809_v39 }
 0x53d   : > { %7339 = vmatpush1.bf16.msra.mxu1 %v10810_v11 }
 0x53e   : > { %7341 = vmatprep.subr.bf16.mxu1 %v10811_v26 }
 0x541   : > { %7343 = vmatpush1.bf16.msra.mxu1 %v10812_v24 }
 0x542   : > { %7345 = vmatprep.subr.bf16.mxu1 %v10813_v52 }
 0x545   : > { %7347 = vmatpush1.bf16.msra.mxu1 %v10814_v21 }
 0x546   : > { %7349 = vmatprep.subr.bf16.mxu1 %v10815_v17 }
 0x549   : > { %7351 = vmatpush1.bf16.msra.mxu1 %v10816_v58 }
 0x54a   : > { %7353 = vmatprep.subr.bf16.mxu1 %v10684_v5  ;;  %v6606_v5 = vld [vmem:[%s9914_s6 + $0x20] sm:$0xff] }
 0x54d   : > { %7355 = vmatpush1.bf16.msra.mxu1 %v10685_v12  ;;  %v5999_v12 = vsel %vm2361_vm8, %v6606_v5, 0 }
 0x54e   : > { %7357 = vmatprep.subr.bf16.mxu1 %v10686_v38 }
 0x551   : > { %7359 = vmatpush1.bf16.msra.mxu1 %v10687_v42 }
 0x552   : > { %7361 = vmatprep.subr.bf16.mxu1 %v10817_v40 }
 0x555   : > { %7363 = vmatpush1.bf16.msra.mxu1 %v10818_v63 }
 0x556   : > { %7365 = vmatprep.subr.bf16.mxu1 %v10819_v62 }
 0x559   : > { %7367 = vmatpush1.bf16.msra.mxu1 %v10691_v10  ;;  %v6607_v10 = vld [vmem:[%s9914_s6 + $0x28] sm:$0xff] }
 0x55a   : > { %7369 = vmatprep.subr.bf16.mxu1 %v10820_v3  ;;  %v6002_v38 = vsel %vm2361_vm8, %v6607_v10, 0 }
 0x55b   : > { %v6082_v50 = vand.u32 4294901760, %v6002_v38 }
 0x55d   : > { %7371 = vmatpush1.bf16.msra.mxu1 %v10569_v20  ;;  %v6071_v20 = vand.u32 4294901760, %v5999_v12  ;;  %v6083_v51 = vsub.f32 %v6002_v38, %v6082_v50 }
 0x55e   : > { %7373 = vmatprep.subr.bf16.mxu1 %v10821_v2 }
 0x55f   : > { %v6072_v42 = vsub.f32 %v5999_v12, %v6071_v20  ;;  %v6084_v31 = vand.u32 4294901760, %v6083_v51 }
 0x561   : > { %7375 = vmatpush1.bf16.msra.mxu1 %v10822_v9  ;;  %v6085_v26 = vsub.f32 %v6083_v51, %v6084_v31 }
 0x562   : > { %7377 = vmatprep.subr.bf16.mxu1 %v10823_v27  ;;  %v6073_v27 = vand.u32 4294901760, %v6072_v42 }
 0x563   : > { %v6086_v17 = vand.u32 4294901760, %v6085_v26 }
 0x564   : > { %v6074_v41 = vsub.f32 %v6072_v42, %v6073_v27 }
 0x565   : > { %7379 = vmatpush1.bf16.msra.mxu1 %v10585_v34 }
 0x566   : > { %v6075_v11 = vand.u32 4294901760, %v6074_v41 }
 0x568   : > { %5985 = vmatmul.mubr.f32.vlgmr.msra.gmra.mrb[4].mxu1 %v9663_v14 }
 0x63b   : > { %v5986_v34 = vpop.f32.mrb[4].mxu1 }
 0x63c   : > { %v5991_v57 = vmul.f32 2.0, %v5986_v34  ;;  %v5988_v14 = vpop.f32.mrb[5].mxu1 }
 0x63d   : > { %v5992_v1 = vmul.f32 2.0, %v5988_v14 }
 0x63e   : > { %v5993_v30 = vsub.f32 %v5991_v57, %v10911_v29 }
 0x63f   : > { %v5994_v25 = vsub.f32 %v5992_v1, %v10912_v37 }
 0x640   : > { %v6006_v46 = vand.u32 4294901760, %v5993_v30 }
 0x641   : > { %v6004_v39 = vand.u32 4294901760, %v5994_v25 }
 0x642   : > { %v6100_v24 = vsub.f32 %v5993_v30, %v6006_v46 }
 0x643   : > { %v6094_v52 = vsub.f32 %v5994_v25, %v6004_v39  ;;  %6005 = vmatprep.subr.mxu0 %v6004_v39 }
 0x644   : > { %v6101_v21 = vand.u32 4294901760, %v6100_v24  ;;  %6007 = vmatpush1.msra.mxu0 %v6006_v46 }
 0x645   : > { %6076 = vmatmul.mubr.f32.vlgmr.msra.gmra.mrb[0].mxu0 %v6075_v11  ;;  %v6095_v58 = vand.u32 4294901760, %v6094_v52 }
 0x646   : > { %6081 = vmatprep.mubr.f32.mxu0 %v10824_v33  ;;  %v6102_v40 = vsub.f32 %v6100_v24, %v6101_v21 }
 0x647   : > { %v6096_v63 = vsub.f32 %v6094_v52, %v6095_v58 }
 0x648   : > { %v6103_v3 = vand.u32 4294901760, %v6102_v40 }
 0x649   : > { %6087 = vmatmul.mubr.f32.gmra.mrb[4].mxu0 %v6086_v17  ;;  %v6097_v62 = vand.u32 4294901760, %v6096_v63 }
 0x64a   : > { %6167 = vmatprep.mubr.f32.mxu0 %v10824_v33 }
 0x64b   : > { %6098 = vmatprep.subr.mxu0 %v6097_v62 }
 0x64c   : > { %6104 = vmatpush1.msra.mxu0 %v6103_v3 }
 0x64d   : > { %6169 = vmatmul.mubr.f32.vlgmr.msra.gmra.mrb[0].mxu0 %v6071_v20  ;;  %6184 = vmatprep.subr.mxu0 %v6094_v52 }
 0x64e   : > { %6187 = vmatpush1.msra.mxu0 %v6100_v24  ;;  %6174 = vmatprep.mubr.f32.mxu0 %v10824_v33 }
 0x64f   : > { %6268 = vmatprep.subr.mxu0 %v6004_v39 }
 0x651   : > { %6176 = vmatmul.mubr.f32.gmra.mrb[4].mxu0 %v6082_v50 }
 0x652   : > { %6250 = vmatprep.mubr.f32.mxu0 %v10824_v33 }
 0x655   : > { %6253 = vmatmul.mubr.f32.vlgmr.msra.gmra.mrb[0].mxu0 %v6072_v42 }
 0x656   : > { %6270 = vmatpush1.msra.mxu0 %v6006_v46  ;;  %6258 = vmatprep.mubr.f32.mxu0 %v10824_v33 }
 0x657   : > { %6355 = vmatprep.subr.mxu0 %v6095_v58 }
 0x659   : > { %6261 = vmatmul.mubr.f32.gmra.mrb[4].mxu0 %v6083_v51 }
 0x65a   : > { %6333 = vmatprep.mubr.f32.mxu0 %v10824_v33 }
 0x65d   : > { %6337 = vmatmul.mubr.f32.vlgmr.msra.gmra.mrb[0].mxu0 %v6073_v27 }
 0x65e   : > { %6359 = vmatpush1.msra.mxu0 %v6101_v21  ;;  %6342 = vmatprep.mubr.f32.mxu0 %v10824_v33 }
 0x65f   : > { %6438 = vmatprep.subr.mxu0 %v6004_v39 }
 0x661   : > { %6346 = vmatmul.mubr.f32.gmra.mrb[4].mxu0 %v6084_v31 }
 0x662   : > { %6422 = vmatprep.mubr.f32.mxu0 %v10824_v33 }
 0x665   : > { %6424 = vmatmul.mubr.f32.vlgmr.msra.gmra.mrb[0].mxu0 %v6071_v20 }
 0x666   : > { %6440 = vmatpush1.msra.mxu0 %v6006_v46  ;;  %6429 = vmatprep.mubr.f32.mxu0 %v10824_v33 }
 0x669   : > { %6431 = vmatmul.mubr.f32.gmra.mrb[4].mxu0 %v6082_v50 }
 0x66a   : > { %6503 = vmatprep.mubr.f32.mxu0 %v10824_v33 }
 0x66d   : > { %6505 = vmatmul.mubr.f32.vlgmr.msra.gmra.mrb[0].mxu0 %v6071_v20 }
 0x66e   : > { %6510 = vmatprep.mubr.f32.mxu0 %v10824_v33  ;;  %v312_v33 = vpop.permute.xlu1 %311 }
 0x66f   : > { %v7380_v47 = vadd.f32 %v2885_v23, %v312_v33 }
 0x671   : > { %6512 = vmatmul.mubr.f32.gmra.mrb[4].mxu0 %v6082_v50 }
 0x740   : > { %v6506_v2 = vpop.f32.mrb[0].mxu0 }
 0x741   : > { %v6508_v9 = vpop.f32.mrb[1].mxu0  ;;  %v7381_v28 = vadd.f32 %v7380_v47, %v6506_v2 }
 0x742   : > { %v7383_v4 = vadd.f32 %v7380_v47, %v6508_v9 }
 0x744   : > { %v6513_v13 = vpop.f32.mrb[4].mxu0 }
 0x745   : > { %v7388_v43 = vadd.f32 %v6513_v13, %v2890_v16  ;;  %v6515_v54 = vpop.f32.mrb[5].mxu0 }
 0x746   : > { %v7389_v7 = vadd.f32 %v6515_v54, %v2890_v16 }
 0x747   : > { %v6522_v55 = vsub.f32 0.0, %v7388_v43 }
 0x748   : > { %v6523_v48 = vsub.f32 0.0, %v7389_v7 }
 0x749   : > { %v6524_v0 = vmul.f32 1.442695, %v6522_v55 }
 0x74a   : > { %v6526_v22 = vmul.f32 1.442695, %v6523_v48 }
 0x74b   : > { %7537 = vpow2.f32 %v6524_v0 }
 0x74c   : > { %7539 = vpow2.f32 %v6526_v22 }
 0x755   : > { %v7538_v44 = vpop.eup %7537 }
 0x756   : > { %v7540_v49 = vpop.eup %7539  ;;  %v6528_v61 = vadd.f32 1.0, %v7538_v44 }
 0x757   : > { %v6529_v60 = vadd.f32 1.0, %v7540_v49 }
 0x758   : > { %7541 = vrcp.f32 %v6528_v61 }
 0x759   : > { %7543 = vrcp.f32 %v6529_v60 }
 0x762   : > { %v7542_v18 = vpop.eup %7541 }
 0x763   : > { %v7544_v6 = vpop.eup %7543  ;;  %v6534_v32 = vmul.f32 %v7542_v18, %v7381_v28 }
 0x764   : > { %v6535_v19 = vmul.f32 %v7544_v6, %v7383_v4 }
 0x765   : > { %6536 = vst [vmem:[%s305_s12] sm:$0xff] %v6534_v32 }
 0x766   : > { %6537 = vst [vmem:[%s305_s12 + $0x8] sm:$0xff] %v6535_v19 }
 0x767 PF: > { %s18_s27 = sadd.s32 1, %s7551_s27  }
 0x768   : > { %p15_p4 = scmp.ge.s32.totalorder %s18_s27, 4  }
 0x76a   :  { %17 = sbr.rel (!%p15_p4) target bundleno = 1 (0x1), region = 86 }

</bundles_post_ra>
